<compile_context>
chip_gen: v5e
topology: v5e:2x2
jax: 0.10.0
libtpu: 0.0.40
codegen_flags: <defaults>
</compile_context>

<pallas_src>
import functools

import jax
import jax.numpy as jnp
from jax.experimental import pallas as pl
from jax.experimental.pallas import tpu as pltpu

EPS = 1e-5
EXPANSION = 4
_STAT_ROWS = 8                       # sublane-aligned stats block: row0=sum, row1=sumsq
_VMEM_LIMIT = 48 * 1024 * 1024       # > default scoped limit, < v7x physical 64 MiB


def _round_up(x, m):
    return ((x + m - 1) // m) * m


def _row_tile(n_rows, target):
    t = min(target, _round_up(n_rows, 8))
    return _round_up(t, 8)


def _compiler_params():
    return pltpu.CompilerParams(
        dimension_semantics=("parallel",),
        vmem_limit_bytes=_VMEM_LIMIT,
    )


def _finalize_bn(partial, count):
    """partial: (_STAT_ROWS*G, C) per-tile [sum; sumsq; pad...] -> affine (2,C), mean."""
    p = partial.reshape(-1, _STAT_ROWS, partial.shape[-1])
    s = p[:, 0, :].sum(axis=0)
    q = p[:, 1, :].sum(axis=0)
    mean = s / count
    var = jnp.maximum(q / count - mean * mean, 0.0)      # biased var (train-mode BN)
    inv = jax.lax.rsqrt(var + EPS)
    ab = jnp.stack([inv, -mean * inv], axis=0)           # y*ab[0] + ab[1] == bn(y)
    return ab.astype(jnp.float32), mean.astype(jnp.float32)


def _write_stats(ps_ref, y2d):
    """y2d: (rows, C) f32; write per-tile channel sums into an (8, C) block."""
    ps_ref[...] = jnp.zeros_like(ps_ref)
    ps_ref[0:1, :] = jnp.sum(y2d, axis=0, keepdims=True)
    ps_ref[1:2, :] = jnp.sum(y2d * y2d, axis=0, keepdims=True)


# ---------------------------------------------------------------------------
# stage 1: 1x1 conv (bf16 MXU) + BN1 partial sums
# ---------------------------------------------------------------------------
def _stage1_kernel(x_ref, w1_ref, y1_ref, ps_ref):
    x = x_ref[...]
    y = jnp.dot(x.astype(jnp.bfloat16), w1_ref[...],
                preferred_element_type=jnp.float32)
    y1_ref[...] = y
    _write_stats(ps_ref, y)


# ---------------------------------------------------------------------------
# stage 2: apply BN1 + ReLU, 3x3 conv as 9 accumulating MXU matmuls over a
# zero-padded h1 slab in VMEM scratch (no im2col), BN2 partial sums
# ---------------------------------------------------------------------------
def _make_stage2_kernel(H, W, C, Ho, Wo, stride):
    def kernel(ab1_ref, y1_ref, w2_ref, y2_ref, ps_ref, slab_ref):
        ab1 = ab1_ref[...]
        a1 = ab1[0:1, :].reshape(1, 1, C)
        b1 = ab1[1:2, :].reshape(1, 1, C)
        h1 = jnp.maximum(y1_ref[0] * a1 + b1, 0.0)            # (H, W, C) f32

        # halo'd activation slab (zero border == conv padding of h1)
        slab_ref[...] = jnp.zeros_like(slab_ref)
        slab_ref[pl.ds(1, H), pl.ds(1, W), :] = h1

        acc = jnp.zeros((Ho * Wo, C), jnp.float32)
        for dh in range(3):
            for dw in range(3):
                if stride == 1:
                    idx_h, idx_w = pl.ds(dh, Ho), pl.ds(dw, Wo)
                else:
                    idx_h, idx_w = pl.ds(dh, Ho, stride), pl.ds(dw, Wo, stride)
                tap = slab_ref[idx_h, idx_w, :]                # (Ho, Wo, C)
                acc = acc + jnp.dot(
                    tap.reshape(Ho * Wo, C).astype(jnp.bfloat16),
                    w2_ref[3 * dh + dw],
                    preferred_element_type=jnp.float32)

        y2_ref[0] = acc.reshape(Ho, Wo, C)
        _write_stats(ps_ref, acc)
    return kernel


# ---------------------------------------------------------------------------
# stage 3: apply BN2 + ReLU, expansion 1x1 conv, (projection) shortcut 1x1
# conv, BN3 / BNsc partial sums
# ---------------------------------------------------------------------------
def _stage3_proj_kernel(y2_ref, xsc_ref, ab2_ref, w3_ref, ws_ref,
                        y3_ref, ysc_ref, ps3_ref, pssc_ref):
    ab2 = ab2_ref[...]
    h2 = jnp.maximum(y2_ref[...] * ab2[0:1, :] + ab2[1:2, :], 0.0)
    y3 = jnp.dot(h2.astype(jnp.bfloat16), w3_ref[...],
                 preferred_element_type=jnp.float32)
    ysc = jnp.dot(xsc_ref[...].astype(jnp.bfloat16), ws_ref[...],
                  preferred_element_type=jnp.float32)
    y3_ref[...] = y3
    ysc_ref[...] = ysc
    _write_stats(ps3_ref, y3)
    _write_stats(pssc_ref, ysc)


def _stage3_id_kernel(y2_ref, ab2_ref, w3_ref, y3_ref, ps3_ref):
    ab2 = ab2_ref[...]
    h2 = jnp.maximum(y2_ref[...] * ab2[0:1, :] + ab2[1:2, :], 0.0)
    y3 = jnp.dot(h2.astype(jnp.bfloat16), w3_ref[...],
                 preferred_element_type=jnp.float32)
    y3_ref[...] = y3
    _write_stats(ps3_ref, y3)


# ---------------------------------------------------------------------------
# stage 4: finalize -- bn3(y3) + bn_sc(ysc) (or identity shortcut), ReLU
# ---------------------------------------------------------------------------
def _stage4_proj_kernel(y3_ref, ysc_ref, ab3_ref, absc_ref, o_ref):
    ab3 = ab3_ref[...]
    absc = absc_ref[...]
    r = y3_ref[...] * ab3[0:1, :] + ab3[1:2, :]
    s = ysc_ref[...] * absc[0:1, :] + absc[1:2, :]
    o_ref[...] = jnp.maximum(r + s, 0.0)


def _stage4_id_kernel(y3_ref, sc_ref, ab3_ref, o_ref):
    ab3 = ab3_ref[...]
    r = y3_ref[...] * ab3[0:1, :] + ab3[1:2, :]
    o_ref[...] = jnp.maximum(r + sc_ref[...], 0.0)


# ---------------------------------------------------------------------------
# wrapper
# ---------------------------------------------------------------------------
def bottleneck_forward(x_nchw, params, stride=1, tile_rows=512):
    """x_nchw: (N, Cin, H, W) f32.  params = (w1, w2, w3, ws):
       w1 (Cin, C), w2 (3, 3, C, C) HWIO, w3 (C, 4C), ws (Cin, 4C) or None.
       Returns (N, 4C, Ho, Wo) f32 (NCHW, like the PyTorch module)."""
    w1, w2, w3, ws = params
    N, Cin, H, W = x_nchw.shape
    C = w1.shape[1]
    Cexp = w3.shape[1]
    use_proj = (stride != 1) or (Cin != Cexp)
    if use_proj and ws is None:
        raise ValueError("projection shortcut requires ws")

    Ho = (H + 2 - 3) // stride + 1
    Wo = (W + 2 - 3) // stride + 1
    M1 = N * H * W
    M2 = N * Ho * Wo

    x = jnp.transpose(x_nchw, (0, 2, 3, 1)).astype(jnp.float32)   # NHWC
    x_flat = x.reshape(M1, Cin)

    w1_bf = w1.astype(jnp.bfloat16)                               # (Cin, C)
    w2_bf = w2.astype(jnp.bfloat16).reshape(9, C, C)              # (kh*kw, Ci, Co)
    w3_bf = w3.astype(jnp.bfloat16)                               # (C, Cexp)
    ws_bf = ws.astype(jnp.bfloat16) if use_proj else None         # (Cin, Cexp)

    cp = _compiler_params()

    # ---------------- stage 1: conv1 + BN1 partial sums (row-tiled) -------
    t1 = _row_tile(M1, tile_rows)
    m1p = _round_up(M1, t1)
    g1 = m1p // t1
    x_p = jnp.pad(x_flat, ((0, m1p - M1), (0, 0)))   # zero rows -> y1=0, stats unaffected
    y1_flat, ps1 = pl.pallas_call(
        _stage1_kernel,
        out_shape=(jax.ShapeDtypeStruct((m1p, C), jnp.float32),
                   jax.ShapeDtypeStruct((_STAT_ROWS * g1, C), jnp.float32)),
        grid=(g1,),
        in_specs=[pl.BlockSpec((t1, Cin), lambda i: (i, 0)),
                  pl.BlockSpec((Cin, C), lambda i: (0, 0))],
        out_specs=(pl.BlockSpec((t1, C), lambda i: (i, 0)),
                   pl.BlockSpec((_STAT_ROWS, C), lambda i: (i, 0))),
        compiler_params=cp,
    )(x_p, w1_bf)
    ab1, _ = _finalize_bn(ps1, M1)

    # ------------- stage 2: 3x3 conv (9 MXU taps, VMEM halo slab) ---------
    # TODO(synk): for very large H*W tile stage 2 over output-row bands with a
    # halo'd slab instead of one whole image per grid step.
    y1_img = y1_flat[:M1].reshape(N, H, W, C)
    y2_img, ps2 = pl.pallas_call(
        _make_stage2_kernel(H, W, C, Ho, Wo, stride),
        out_shape=(jax.ShapeDtypeStruct((N, Ho, Wo, C), jnp.float32),
                   jax.ShapeDtypeStruct((_STAT_ROWS * N, C), jnp.float32)),
        grid=(N,),
        in_specs=[pl.BlockSpec((2, C), lambda n: (0, 0)),
                  pl.BlockSpec((1, H, W, C), lambda n: (n, 0, 0, 0)),
                  pl.BlockSpec((9, C, C), lambda n: (0, 0, 0))],
        out_specs=(pl.BlockSpec((1, Ho, Wo, C), lambda n: (n, 0, 0, 0)),
                   pl.BlockSpec((_STAT_ROWS, C), lambda n: (n, 0))),
        scratch_shapes=[pltpu.VMEM((H + 2, W + 2, C), jnp.float32)],
        compiler_params=cp,
    )(ab1, y1_img, w2_bf)
    ab2, mean2 = _finalize_bn(ps2, M2)

    # ---------------- stage 3: expansion conv + shortcut conv -------------
    t2 = _row_tile(M2, tile_rows)
    m2p = _round_up(M2, t2)
    g2 = m2p // t2
    pad2 = m2p - M2
    y2_flat = y2_img.reshape(M2, C)
    if pad2:
        # pad rows with the BN2 mean so they normalize to 0 and add nothing to stats
        y2_p = jnp.concatenate(
            [y2_flat, jnp.broadcast_to(mean2[None, :], (pad2, C))], axis=0)
    else:
        y2_p = y2_flat

    if use_proj:
        if stride == 1:
            xsc_flat = x_flat                       # reuse -- no duplicated HBM copy
        else:
            xsc_flat = x[:, ::stride, ::stride, :].reshape(M2, Cin)
        xsc_p = jnp.pad(xsc_flat, ((0, pad2), (0, 0)))

        y3_flat, ysc_flat, ps3, pssc = pl.pallas_call(
            _stage3_proj_kernel,
            out_shape=(jax.ShapeDtypeStruct((m2p, Cexp), jnp.float32),
                       jax.ShapeDtypeStruct((m2p, Cexp), jnp.float32),
                       jax.ShapeDtypeStruct((_STAT_ROWS * g2, Cexp), jnp.float32),
                       jax.ShapeDtypeStruct((_STAT_ROWS * g2, Cexp), jnp.float32)),
            grid=(g2,),
            in_specs=[pl.BlockSpec((t2, C), lambda i: (i, 0)),
                      pl.BlockSpec((t2, Cin), lambda i: (i, 0)),
                      pl.BlockSpec((2, C), lambda i: (0, 0)),
                      pl.BlockSpec((C, Cexp), lambda i: (0, 0)),
                      pl.BlockSpec((Cin, Cexp), lambda i: (0, 0))],
            out_specs=(pl.BlockSpec((t2, Cexp), lambda i: (i, 0)),
                       pl.BlockSpec((t2, Cexp), lambda i: (i, 0)),
                       pl.BlockSpec((_STAT_ROWS, Cexp), lambda i: (i, 0)),
                       pl.BlockSpec((_STAT_ROWS, Cexp), lambda i: (i, 0))),
            compiler_params=cp,
        )(y2_p, xsc_p, ab2, w3_bf, ws_bf)
        ab3, _ = _finalize_bn(ps3, M2)
        absc, _ = _finalize_bn(pssc, M2)

        out_flat = pl.pallas_call(
            _stage4_proj_kernel,
            out_shape=jax.ShapeDtypeStruct((m2p, Cexp), jnp.float32),
            grid=(g2,),
            in_specs=[pl.BlockSpec((t2, Cexp), lambda i: (i, 0)),
                      pl.BlockSpec((t2, Cexp), lambda i: (i, 0)),
                      pl.BlockSpec((2, Cexp), lambda i: (0, 0)),
                      pl.BlockSpec((2, Cexp), lambda i: (0, 0))],
            out_specs=pl.BlockSpec((t2, Cexp), lambda i: (i, 0)),
            compiler_params=cp,
        )(y3_flat, ysc_flat, ab3, absc)
    else:
        y3_flat, ps3 = pl.pallas_call(
            _stage3_id_kernel,
            out_shape=(jax.ShapeDtypeStruct((m2p, Cexp), jnp.float32),
                       jax.ShapeDtypeStruct((_STAT_ROWS * g2, Cexp), jnp.float32)),
            grid=(g2,),
            in_specs=[pl.BlockSpec((t2, C), lambda i: (i, 0)),
                      pl.BlockSpec((2, C), lambda i: (0, 0)),
                      pl.BlockSpec((C, Cexp), lambda i: (0, 0))],
            out_specs=(pl.BlockSpec((t2, Cexp), lambda i: (i, 0)),
                       pl.BlockSpec((_STAT_ROWS, Cexp), lambda i: (i, 0))),
            compiler_params=cp,
        )(y2_p, ab2, w3_bf)
        ab3, _ = _finalize_bn(ps3, M2)
        sc_p = jnp.pad(x_flat, ((0, pad2), (0, 0)))   # identity: Cin==Cexp, stride==1

        out_flat = pl.pallas_call(
            _stage4_id_kernel,
            out_shape=jax.ShapeDtypeStruct((m2p, Cexp), jnp.float32),
            grid=(g2,),
            in_specs=[pl.BlockSpec((t2, Cexp), lambda i: (i, 0)),
                      pl.BlockSpec((t2, Cexp), lambda i: (i, 0)),
                      pl.BlockSpec((2, Cexp), lambda i: (0, 0))],
            out_specs=pl.BlockSpec((t2, Cexp), lambda i: (i, 0)),
            compiler_params=cp,
        )(y3_flat, sc_p, ab3)

    out = out_flat[:M2].reshape(N, Ho, Wo, Cexp)
    return jnp.transpose(out, (0, 3, 1, 2))           # back to NCHW


# ---------------------------------------------------------------------------
# pure-JAX reference (same bf16-matmul / f32-BN numerics) for validation
# ---------------------------------------------------------------------------
def _reference_forward(x_nchw, params, stride=1):
    w1, w2, w3, ws = params
    Cin = x_nchw.shape[1]
    Cexp = w3.shape[1]
    use_proj = (stride != 1) or (Cin != Cexp)
    x = jnp.transpose(x_nchw, (0, 2, 3, 1)).astype(jnp.float32)
    bf = jnp.bfloat16

    def bn(y):
        m = jnp.mean(y, axis=(0, 1, 2), keepdims=True)
        v = jnp.mean((y - m) ** 2, axis=(0, 1, 2), keepdims=True)
        return (y - m) * jax.lax.rsqrt(v + EPS)

    y1 = jnp.einsum('nhwi,io->nhwo', x.astype(bf), w1.astype(bf),
                    preferred_element_type=jnp.float32)
    h1 = jnp.maximum(bn(y1), 0.0)
    y2 = jax.lax.conv_general_dilated(
        h1.astype(bf), w2.astype(bf), window_strides=(stride, stride),
        padding=((1, 1), (1, 1)), dimension_numbers=('NHWC', 'HWIO', 'NHWC'),
        preferred_element_type=jnp.float32)
    h2 = jnp.maximum(bn(y2), 0.0)
    y3 = jnp.einsum('nhwi,io->nhwo', h2.astype(bf), w3.astype(bf),
                    preferred_element_type=jnp.float32)
    res = bn(y3)
    if use_proj:
        xs = x[:, ::stride, ::stride, :]
        ysc = jnp.einsum('nhwi,io->nhwo', xs.astype(bf), ws.astype(bf),
                         preferred_element_type=jnp.float32)
        sc = bn(ysc)
    else:
        sc = x
    out = jnp.maximum(res + sc, 0.0)
    return jnp.transpose(out, (0, 3, 1, 2))


if __name__ == "__main__":
    # BottleNeck(in_channels=4, out_channels=4, stride=1) on a toy input.
    # NOTE: toy channel counts (<128 lanes) underutilize the MXU/vreg lanes;
    # that is inherent to this configuration, not the kernel structure.
    N, Cin, H, W = 2, 4, 16, 16
    C = 4
    stride = 1
    Cexp = C * EXPANSION

    key = jax.random.PRNGKey(0)
    k0, k1, k2, k3, k4 = jax.random.split(key, 5)
    x = jax.random.normal(k0, (N, Cin, H, W), dtype=jnp.float32)
    w1 = jax.random.normal(k1, (Cin, C), dtype=jnp.float32) * 0.1
    w2 = jax.random.normal(k2, (3, 3, C, C), dtype=jnp.float32) * 0.1
    w3 = jax.random.normal(k3, (C, Cexp), dtype=jnp.float32) * 0.1
    ws = jax.random.normal(k4, (Cin, Cexp), dtype=jnp.float32) * 0.1
    params = (w1, w2, w3, ws)

    # tile_rows=128 -> 4 row-tiles per row-tiled stage: exercises the grid,
    # the pipelined BlockSpecs and the cross-tile BN partial-sum reduction.
    fwd = jax.jit(functools.partial(bottleneck_forward, stride=stride, tile_rows=128))
    out = jax.block_until_ready(fwd(x, params))

    Ho = (H + 2 - 3) // stride + 1
    Wo = (W + 2 - 3) // stride + 1
    assert out.shape == (N, Cexp, Ho, Wo), out.shape
    assert bool(jnp.all(out >= 0.0))                      # final ReLU

    ref = _reference_forward(x, params, stride=stride)
    max_err = float(jnp.max(jnp.abs(out - ref)))
    assert max_err < 5e-3, f"mismatch vs reference: {max_err}"

    print("KERNEL_OK")
</pallas_src>

<mosaic_0001>
module attributes {stable_mosaic.version = 11 : i64} {
  func.func @_stage1_kernel(%arg0: i32, %arg1: memref<128x4xf32, #tpu.memory_space<vmem>>, %arg2: memref<4x4xbf16, #tpu.memory_space<vmem>>, %arg3: memref<128x4xf32, #tpu.memory_space<vmem>>, %arg4: memref<8x4xf32, #tpu.memory_space<vmem>>) attributes {dimension_semantics = [#tpu.dimension_semantics<parallel>], iteration_bounds = array<i64: 4>, scalar_prefetch = 0 : i64, scratch_operands = 0 : i64, tpu.core_type = #tpu.core_type<tc>, window_params = [{transform_indices = @transform_0, window_bounds = array<i64: 128, 4>}, {pipeline_mode = #tpu.pipeline_mode<synchronous>, transform_indices = @transform_1, window_bounds = array<i64: 4, 4>}, {transform_indices = @transform_2, window_bounds = array<i64: 128, 4>}, {transform_indices = @transform_3, window_bounds = array<i64: 8, 4>}]} {
    %c0 = arith.constant 0 : index
    %c0_0 = arith.constant 0 : index
    %0 = vector.load %arg1[%c0, %c0_0] : memref<128x4xf32, #tpu.memory_space<vmem>>, vector<128x4xf32>
    %1 = arith.truncf %0 : vector<128x4xf32> to vector<128x4xbf16>
    %c0_1 = arith.constant 0 : index
    %c0_2 = arith.constant 0 : index
    %2 = vector.load %arg2[%c0_1, %c0_2] : memref<4x4xbf16, #tpu.memory_space<vmem>>, vector<4x4xbf16>
    %cst = arith.constant dense<0.000000e+00> : vector<128x4xf32>
    %3 = tpu.matmul %1, %2, %cst {dimension_numbers = #tpu.dot_dimension_numbers<[1], [0], [0], [1], [0, 0, 1, 1], [], []>} : vector<128x4xbf16>, vector<4x4xbf16>, vector<128x4xf32> -> vector<128x4xf32>
    %c0_3 = arith.constant 0 : index
    %c0_4 = arith.constant 0 : index
    %4 = vector.load %arg3[%c0_3, %c0_4] : memref<128x4xf32, #tpu.memory_space<vmem>>, vector<128x4xf32>
    tpu.vector_store %arg3[%c0_3, %c0_4], %3 {strides = array<i32>} : memref<128x4xf32, #tpu.memory_space<vmem>>, vector<128x4xf32>,
    %cst_5 = arith.constant 0.000000e+00 : f32
    %5 = vector.broadcast %cst_5 : f32 to vector<8x4xf32>
    %c0_6 = arith.constant 0 : index
    %c0_7 = arith.constant 0 : index
    %6 = vector.load %arg4[%c0_6, %c0_7] : memref<8x4xf32, #tpu.memory_space<vmem>>, vector<8x4xf32>
    tpu.vector_store %arg4[%c0_6, %c0_7], %5 {strides = array<i32>} : memref<8x4xf32, #tpu.memory_space<vmem>>, vector<8x4xf32>,
    %cst_8 = arith.constant dense<0.000000e+00> : vector<4xf32>
    %7 = vector.multi_reduction <add>, %3, %cst_8 [0] : vector<128x4xf32> to vector<4xf32>
    %8 = vector.shape_cast %7 : vector<4xf32> to vector<1x4xf32>
    %c0_9 = arith.constant 0 : index
    %c0_10 = arith.constant 0 : index
    %9 = vector.load %arg4[%c0_9, %c0_10] : memref<8x4xf32, #tpu.memory_space<vmem>>, vector<1x4xf32>
    tpu.vector_store %arg4[%c0_9, %c0_10], %8 {strides = array<i32>} : memref<8x4xf32, #tpu.memory_space<vmem>>, vector<1x4xf32>,
    %10 = arith.mulf %3, %3 : vector<128x4xf32>
    %cst_11 = arith.constant dense<0.000000e+00> : vector<4xf32>
    %11 = vector.multi_reduction <add>, %10, %cst_11 [0] : vector<128x4xf32> to vector<4xf32>
    %12 = vector.shape_cast %11 : vector<4xf32> to vector<1x4xf32>
    %c1 = arith.constant 1 : index
    %c0_12 = arith.constant 0 : index
    %13 = vector.load %arg4[%c1, %c0_12] : memref<8x4xf32, #tpu.memory_space<vmem>>, vector<1x4xf32>
    tpu.vector_store %arg4[%c1, %c0_12], %12 {strides = array<i32>} : memref<8x4xf32, #tpu.memory_space<vmem>>, vector<1x4xf32>,
    return
  }
  func.func @transform_0(%arg0: i32) -> (i32, i32) {
    %c0_i32 = arith.constant 0 : i32
    %c0_i32_0 = arith.constant 0 : i32
    return %arg0, %c0_i32 : i32, i32
  }
  func.func @transform_1(%arg0: i32) -> (i32, i32) {
    %c0_i32 = arith.constant 0 : i32
    %c0_i32_0 = arith.constant 0 : i32
    %c0_i32_1 = arith.constant 0 : i32
    return %c0_i32, %c0_i32_0 : i32, i32
  }
  func.func @transform_2(%arg0: i32) -> (i32, i32) {
    %c0_i32 = arith.constant 0 : i32
    %c0_i32_0 = arith.constant 0 : i32
    return %arg0, %c0_i32 : i32, i32
  }
  func.func @transform_3(%arg0: i32) -> (i32, i32) {
    %c0_i32 = arith.constant 0 : i32
    %c0_i32_0 = arith.constant 0 : i32
    return %arg0, %c0_i32 : i32, i32
  }
}

module attributes {stable_mosaic.version = 11 : i64} {
  func.func @kernel(%arg0: i32, %arg1: memref<2x4xf32, #tpu.memory_space<vmem>>, %arg2: memref<1x16x16x4xf32, #tpu.memory_space<vmem>>, %arg3: memref<9x4x4xbf16, #tpu.memory_space<vmem>>, %arg4: memref<1x16x16x4xf32, #tpu.memory_space<vmem>>, %arg5: memref<8x4xf32, #tpu.memory_space<vmem>>, %arg6: memref<18x18x4xf32, #tpu.memory_space<vmem>>) attributes {dimension_semantics = [#tpu.dimension_semantics<parallel>], iteration_bounds = array<i64: 2>, scalar_prefetch = 0 : i64, scratch_operands = 1 : i64, tpu.core_type = #tpu.core_type<tc>, window_params = [{pipeline_mode = #tpu.pipeline_mode<synchronous>, transform_indices = @transform_0, window_bounds = array<i64: 2, 4>}, {transform_indices = @transform_1, window_bounds = array<i64: 1, 16, 16, 4>}, {pipeline_mode = #tpu.pipeline_mode<synchronous>, transform_indices = @transform_2, window_bounds = array<i64: 9, 4, 4>}, {transform_indices = @transform_3, window_bounds = array<i64: 1, 16, 16, 4>}, {transform_indices = @transform_4, window_bounds = array<i64: 8, 4>}]} {
    %c0 = arith.constant 0 : index
    %c0_0 = arith.constant 0 : index
    %0 = vector.load %arg1[%c0, %c0_0] : memref<2x4xf32, #tpu.memory_space<vmem>>, vector<2x4xf32>
    %1 = vector.extract_strided_slice %0 {offsets = [0, 0], sizes = [1, 4], strides = [1, 1]} : vector<2x4xf32> to vector<1x4xf32>
    %2 = vector.shape_cast %1 : vector<1x4xf32> to vector<1x1x4xf32>
    %3 = vector.extract_strided_slice %0 {offsets = [1, 0], sizes = [1, 4], strides = [1, 1]} : vector<2x4xf32> to vector<1x4xf32>
    %4 = vector.shape_cast %3 : vector<1x4xf32> to vector<1x1x4xf32>
    %c0_1 = arith.constant 0 : index
    %c0_2 = arith.constant 0 : index
    %c0_3 = arith.constant 0 : index
    %c0_4 = arith.constant 0 : index
    %5 = vector.load %arg2[%c0_1, %c0_2, %c0_3, %c0_4] : memref<1x16x16x4xf32, #tpu.memory_space<vmem>>, vector<1x16x16x4xf32>
    %6 = vector.shape_cast %5 : vector<1x16x16x4xf32> to vector<16x16x4xf32>
    %7 = vector.broadcast %2 : vector<1x1x4xf32> to vector<16x16x4xf32>
    %8 = arith.mulf %6, %7 : vector<16x16x4xf32>
    %9 = vector.broadcast %4 : vector<1x1x4xf32> to vector<16x16x4xf32>
    %10 = arith.addf %8, %9 : vector<16x16x4xf32>
    %cst = arith.constant 0.000000e+00 : f32
    %11 = vector.broadcast %cst : f32 to vector<16x16x4xf32>
    %12 = arith.maximumf %10, %11 : vector<16x16x4xf32>
    %cst_5 = arith.constant 0.000000e+00 : f32
    %13 = vector.broadcast %cst_5 : f32 to vector<18x18x4xf32>
    %c0_6 = arith.constant 0 : index
    %c0_7 = arith.constant 0 : index
    %c0_8 = arith.constant 0 : index
    %14 = vector.load %arg6[%c0_6, %c0_7, %c0_8] : memref<18x18x4xf32, #tpu.memory_space<vmem>>, vector<18x18x4xf32>
    tpu.vector_store %arg6[%c0_6, %c0_7, %c0_8], %13 {strides = array<i32>} : memref<18x18x4xf32, #tpu.memory_space<vmem>>, vector<18x18x4xf32>,
    %c1 = arith.constant 1 : index
    %c1_9 = arith.constant 1 : index
    %c0_10 = arith.constant 0 : index
    %15 = vector.load %arg6[%c1, %c1_9, %c0_10] : memref<18x18x4xf32, #tpu.memory_space<vmem>>, vector<16x16x4xf32>
    tpu.vector_store %arg6[%c1, %c1_9, %c0_10], %12 {strides = array<i32>} : memref<18x18x4xf32, #tpu.memory_space<vmem>>, vector<16x16x4xf32>,
    %cst_11 = arith.constant 0.000000e+00 : f32
    %16 = vector.broadcast %cst_11 : f32 to vector<256x4xf32>
    %c0_12 = arith.constant 0 : index
    %c0_13 = arith.constant 0 : index
    %c0_14 = arith.constant 0 : index
    %17 = vector.load %arg6[%c0_12, %c0_13, %c0_14] : memref<18x18x4xf32, #tpu.memory_space<vmem>>, vector<16x16x4xf32>
    %18 = vector.shape_cast %17 : vector<16x16x4xf32> to vector<256x4xf32>
    %19 = arith.truncf %18 : vector<256x4xf32> to vector<256x4xbf16>
    %c0_15 = arith.constant 0 : index
    %c0_16 = arith.constant 0 : index
    %c0_17 = arith.constant 0 : index
    %20 = vector.load %arg3[%c0_15, %c0_16, %c0_17] : memref<9x4x4xbf16, #tpu.memory_space<vmem>>, vector<1x4x4xbf16>
    %21 = vector.shape_cast %20 : vector<1x4x4xbf16> to vector<4x4xbf16>
    %cst_18 = arith.constant dense<0.000000e+00> : vector<256x4xf32>
    %22 = tpu.matmul %19, %21, %cst_18 {dimension_numbers = #tpu.dot_dimension_numbers<[1], [0], [0], [1], [0, 0, 1, 1], [], []>} : vector<256x4xbf16>, vector<4x4xbf16>, vector<256x4xf32> -> vector<256x4xf32>
    %23 = arith.addf %16, %22 : vector<256x4xf32>
    %c0_19 = arith.constant 0 : index
    %c1_20 = arith.constant 1 : index
    %c0_21 = arith.constant 0 : index
    %24 = vector.load %arg6[%c0_19, %c1_20, %c0_21] : memref<18x18x4xf32, #tpu.memory_space<vmem>>, vector<16x16x4xf32>
    %25 = vector.shape_cast %24 : vector<16x16x4xf32> to vector<256x4xf32>
    %26 = arith.truncf %25 : vector<256x4xf32> to vector<256x4xbf16>
    %c1_22 = arith.constant 1 : index
    %c0_23 = arith.constant 0 : index
    %c0_24 = arith.constant 0 : index
    %27 = vector.load %arg3[%c1_22, %c0_23, %c0_24] : memref<9x4x4xbf16, #tpu.memory_space<vmem>>, vector<1x4x4xbf16>
    %28 = vector.shape_cast %27 : vector<1x4x4xbf16> to vector<4x4xbf16>
    %cst_25 = arith.constant dense<0.000000e+00> : vector<256x4xf32>
    %29 = tpu.matmul %26, %28, %cst_25 {dimension_numbers = #tpu.dot_dimension_numbers<[1], [0], [0], [1], [0, 0, 1, 1], [], []>} : vector<256x4xbf16>, vector<4x4xbf16>, vector<256x4xf32> -> vector<256x4xf32>
    %30 = arith.addf %23, %29 : vector<256x4xf32>
    %c0_26 = arith.constant 0 : index
    %c2 = arith.constant 2 : index
    %c0_27 = arith.constant 0 : index
    %31 = vector.load %arg6[%c0_26, %c2, %c0_27] : memref<18x18x4xf32, #tpu.memory_space<vmem>>, vector<16x16x4xf32>
    %32 = vector.shape_cast %31 : vector<16x16x4xf32> to vector<256x4xf32>
    %33 = arith.truncf %32 : vector<256x4xf32> to vector<256x4xbf16>
    %c2_28 = arith.constant 2 : index
    %c0_29 = arith.constant 0 : index
    %c0_30 = arith.constant 0 : index
    %34 = vector.load %arg3[%c2_28, %c0_29, %c0_30] : memref<9x4x4xbf16, #tpu.memory_space<vmem>>, vector<1x4x4xbf16>
    %35 = vector.shape_cast %34 : vector<1x4x4xbf16> to vector<4x4xbf16>
    %cst_31 = arith.constant dense<0.000000e+00> : vector<256x4xf32>
    %36 = tpu.matmul %33, %35, %cst_31 {dimension_numbers = #tpu.dot_dimension_numbers<[1], [0], [0], [1], [0, 0, 1, 1], [], []>} : vector<256x4xbf16>, vector<4x4xbf16>, vector<256x4xf32> -> vector<256x4xf32>
    %37 = arith.addf %30, %36 : vector<256x4xf32>
    %c1_32 = arith.constant 1 : index
    %c0_33 = arith.constant 0 : index
    %c0_34 = arith.constant 0 : index
    %38 = vector.load %arg6[%c1_32, %c0_33, %c0_34] : memref<18x18x4xf32, #tpu.memory_space<vmem>>, vector<16x16x4xf32>
    %39 = vector.shape_cast %38 : vector<16x16x4xf32> to vector<256x4xf32>
    %40 = arith.truncf %39 : vector<256x4xf32> to vector<256x4xbf16>
    %c3 = arith.constant 3 : index
    %c0_35 = arith.constant 0 : index
    %c0_36 = arith.constant 0 : index
    %41 = vector.load %arg3[%c3, %c0_35, %c0_36] : memref<9x4x4xbf16, #tpu.memory_space<vmem>>, vector<1x4x4xbf16>
    %42 = vector.shape_cast %41 : vector<1x4x4xbf16> to vector<4x4xbf16>
    %cst_37 = arith.constant dense<0.000000e+00> : vector<256x4xf32>
    %43 = tpu.matmul %40, %42, %cst_37 {dimension_numbers = #tpu.dot_dimension_numbers<[1], [0], [0], [1], [0, 0, 1, 1], [], []>} : vector<256x4xbf16>, vector<4x4xbf16>, vector<256x4xf32> -> vector<256x4xf32>
    %44 = arith.addf %37, %43 : vector<256x4xf32>
    %c1_38 = arith.constant 1 : index
    %c1_39 = arith.constant 1 : index
    %c0_40 = arith.constant 0 : index
    %45 = vector.load %arg6[%c1_38, %c1_39, %c0_40] : memref<18x18x4xf32, #tpu.memory_space<vmem>>, vector<16x16x4xf32>
    %46 = vector.shape_cast %45 : vector<16x16x4xf32> to vector<256x4xf32>
    %47 = arith.truncf %46 : vector<256x4xf32> to vector<256x4xbf16>
    %c4 = arith.constant 4 : index
    %c0_41 = arith.constant 0 : index
    %c0_42 = arith.constant 0 : index
    %48 = vector.load %arg3[%c4, %c0_41, %c0_42] : memref<9x4x4xbf16, #tpu.memory_space<vmem>>, vector<1x4x4xbf16>
    %49 = vector.shape_cast %48 : vector<1x4x4xbf16> to vector<4x4xbf16>
    %cst_43 = arith.constant dense<0.000000e+00> : vector<256x4xf32>
    %50 = tpu.matmul %47, %49, %cst_43 {dimension_numbers = #tpu.dot_dimension_numbers<[1], [0], [0], [1], [0, 0, 1, 1], [], []>} : vector<256x4xbf16>, vector<4x4xbf16>, vector<256x4xf32> -> vector<256x4xf32>
    %51 = arith.addf %44, %50 : vector<256x4xf32>
    %c1_44 = arith.constant 1 : index
    %c2_45 = arith.constant 2 : index
    %c0_46 = arith.constant 0 : index
    %52 = vector.load %arg6[%c1_44, %c2_45, %c0_46] : memref<18x18x4xf32, #tpu.memory_space<vmem>>, vector<16x16x4xf32>
    %53 = vector.shape_cast %52 : vector<16x16x4xf32> to vector<256x4xf32>
    %54 = arith.truncf %53 : vector<256x4xf32> to vector<256x4xbf16>
    %c5 = arith.constant 5 : index
    %c0_47 = arith.constant 0 : index
    %c0_48 = arith.constant 0 : index
    %55 = vector.load %arg3[%c5, %c0_47, %c0_48] : memref<9x4x4xbf16, #tpu.memory_space<vmem>>, vector<1x4x4xbf16>
    %56 = vector.shape_cast %55 : vector<1x4x4xbf16> to vector<4x4xbf16>
    %cst_49 = arith.constant dense<0.000000e+00> : vector<256x4xf32>
    %57 = tpu.matmul %54, %56, %cst_49 {dimension_numbers = #tpu.dot_dimension_numbers<[1], [0], [0], [1], [0, 0, 1, 1], [], []>} : vector<256x4xbf16>, vector<4x4xbf16>, vector<256x4xf32> -> vector<256x4xf32>
    %58 = arith.addf %51, %57 : vector<256x4xf32>
    %c2_50 = arith.constant 2 : index
    %c0_51 = arith.constant 0 : index
    %c0_52 = arith.constant 0 : index
    %59 = vector.load %arg6[%c2_50, %c0_51, %c0_52] : memref<18x18x4xf32, #tpu.memory_space<vmem>>, vector<16x16x4xf32>
    %60 = vector.shape_cast %59 : vector<16x16x4xf32> to vector<256x4xf32>
    %61 = arith.truncf %60 : vector<256x4xf32> to vector<256x4xbf16>
    %c6 = arith.constant 6 : index
    %c0_53 = arith.constant 0 : index
    %c0_54 = arith.constant 0 : index
    %62 = vector.load %arg3[%c6, %c0_53, %c0_54] : memref<9x4x4xbf16, #tpu.memory_space<vmem>>, vector<1x4x4xbf16>
    %63 = vector.shape_cast %62 : vector<1x4x4xbf16> to vector<4x4xbf16>
    %cst_55 = arith.constant dense<0.000000e+00> : vector<256x4xf32>
    %64 = tpu.matmul %61, %63, %cst_55 {dimension_numbers = #tpu.dot_dimension_numbers<[1], [0], [0], [1], [0, 0, 1, 1], [], []>} : vector<256x4xbf16>, vector<4x4xbf16>, vector<256x4xf32> -> vector<256x4xf32>
    %65 = arith.addf %58, %64 : vector<256x4xf32>
    %c2_56 = arith.constant 2 : index
    %c1_57 = arith.constant 1 : index
    %c0_58 = arith.constant 0 : index
    %66 = vector.load %arg6[%c2_56, %c1_57, %c0_58] : memref<18x18x4xf32, #tpu.memory_space<vmem>>, vector<16x16x4xf32>
    %67 = vector.shape_cast %66 : vector<16x16x4xf32> to vector<256x4xf32>
    %68 = arith.truncf %67 : vector<256x4xf32> to vector<256x4xbf16>
    %c7 = arith.constant 7 : index
    %c0_59 = arith.constant 0 : index
    %c0_60 = arith.constant 0 : index
    %69 = vector.load %arg3[%c7, %c0_59, %c0_60] : memref<9x4x4xbf16, #tpu.memory_space<vmem>>, vector<1x4x4xbf16>
    %70 = vector.shape_cast %69 : vector<1x4x4xbf16> to vector<4x4xbf16>
    %cst_61 = arith.constant dense<0.000000e+00> : vector<256x4xf32>
    %71 = tpu.matmul %68, %70, %cst_61 {dimension_numbers = #tpu.dot_dimension_numbers<[1], [0], [0], [1], [0, 0, 1, 1], [], []>} : vector<256x4xbf16>, vector<4x4xbf16>, vector<256x4xf32> -> vector<256x4xf32>
    %72 = arith.addf %65, %71 : vector<256x4xf32>
    %c2_62 = arith.constant 2 : index
    %c2_63 = arith.constant 2 : index
    %c0_64 = arith.constant 0 : index
    %73 = vector.load %arg6[%c2_62, %c2_63, %c0_64] : memref<18x18x4xf32, #tpu.memory_space<vmem>>, vector<16x16x4xf32>
    %74 = vector.shape_cast %73 : vector<16x16x4xf32> to vector<256x4xf32>
    %75 = arith.truncf %74 : vector<256x4xf32> to vector<256x4xbf16>
    %c8 = arith.constant 8 : index
    %c0_65 = arith.constant 0 : index
    %c0_66 = arith.constant 0 : index
    %76 = vector.load %arg3[%c8, %c0_65, %c0_66] : memref<9x4x4xbf16, #tpu.memory_space<vmem>>, vector<1x4x4xbf16>
    %77 = vector.shape_cast %76 : vector<1x4x4xbf16> to vector<4x4xbf16>
    %cst_67 = arith.constant dense<0.000000e+00> : vector<256x4xf32>
    %78 = tpu.matmul %75, %77, %cst_67 {dimension_numbers = #tpu.dot_dimension_numbers<[1], [0], [0], [1], [0, 0, 1, 1], [], []>} : vector<256x4xbf16>, vector<4x4xbf16>, vector<256x4xf32> -> vector<256x4xf32>
    %79 = arith.addf %72, %78 : vector<256x4xf32>
    %80 = vector.shape_cast %79 : vector<256x4xf32> to vector<16x16x4xf32>
    %c0_68 = arith.constant 0 : index
    %c0_69 = arith.constant 0 : index
    %c0_70 = arith.constant 0 : index
    %c0_71 = arith.constant 0 : index
    %81 = vector.load %arg4[%c0_68, %c0_69, %c0_70, %c0_71] : memref<1x16x16x4xf32, #tpu.memory_space<vmem>>, vector<1x16x16x4xf32>
    %82 = vector.shape_cast %81 : vector<1x16x16x4xf32> to vector<16x16x4xf32>
    %83 = vector.shape_cast %80 : vector<16x16x4xf32> to vector<1x16x16x4xf32>
    tpu.vector_store %arg4[%c0_68, %c0_69, %c0_70, %c0_71], %83 {strides = array<i32>} : memref<1x16x16x4xf32, #tpu.memory_space<vmem>>, vector<1x16x16x4xf32>,
    %cst_72 = arith.constant 0.000000e+00 : f32
    %84 = vector.broadcast %cst_72 : f32 to vector<8x4xf32>
    %c0_73 = arith.constant 0 : index
    %c0_74 = arith.constant 0 : index
    %85 = vector.load %arg5[%c0_73, %c0_74] : memref<8x4xf32, #tpu.memory_space<vmem>>, vector<8x4xf32>
    tpu.vector_store %arg5[%c0_73, %c0_74], %84 {strides = array<i32>} : memref<8x4xf32, #tpu.memory_space<vmem>>, vector<8x4xf32>,
    %cst_75 = arith.constant dense<0.000000e+00> : vector<4xf32>
    %86 = vector.multi_reduction <add>, %79, %cst_75 [0] : vector<256x4xf32> to vector<4xf32>
    %87 = vector.shape_cast %86 : vector<4xf32> to vector<1x4xf32>
    %c0_76 = arith.constant 0 : index
    %c0_77 = arith.constant 0 : index
    %88 = vector.load %arg5[%c0_76, %c0_77] : memref<8x4xf32, #tpu.memory_space<vmem>>, vector<1x4xf32>
    tpu.vector_store %arg5[%c0_76, %c0_77], %87 {strides = array<i32>} : memref<8x4xf32, #tpu.memory_space<vmem>>, vector<1x4xf32>,
    %89 = arith.mulf %79, %79 : vector<256x4xf32>
    %cst_78 = arith.constant dense<0.000000e+00> : vector<4xf32>
    %90 = vector.multi_reduction <add>, %89, %cst_78 [0] : vector<256x4xf32> to vector<4xf32>
    %91 = vector.shape_cast %90 : vector<4xf32> to vector<1x4xf32>
    %c1_79 = arith.constant 1 : index
    %c0_80 = arith.constant 0 : index
    %92 = vector.load %arg5[%c1_79, %c0_80] : memref<8x4xf32, #tpu.memory_space<vmem>>, vector<1x4xf32>
    tpu.vector_store %arg5[%c1_79, %c0_80], %91 {strides = array<i32>} : memref<8x4xf32, #tpu.memory_space<vmem>>, vector<1x4xf32>,
    return
  }
  func.func @transform_0(%arg0: i32) -> (i32, i32) {
    %c0_i32 = arith.constant 0 : i32
    %c0_i32_0 = arith.constant 0 : i32
    %c0_i32_1 = arith.constant 0 : i32
    return %c0_i32, %c0_i32_0 : i32, i32
  }
  func.func @transform_1(%arg0: i32) -> (i32, i32, i32, i32) {
    %c0_i32 = arith.constant 0 : i32
    %c0_i32_0 = arith.constant 0 : i32
    %c0_i32_1 = arith.constant 0 : i32
    %c0_i32_2 = arith.constant 0 : i32
    return %arg0, %c0_i32, %c0_i32_0, %c0_i32_1 : i32, i32, i32, i32
  }
  func.func @transform_2(%arg0: i32) -> (i32, i32, i32) {
    %c0_i32 = arith.constant 0 : i32
    %c0_i32_0 = arith.constant 0 : i32
    %c0_i32_1 = arith.constant 0 : i32
    %c0_i32_2 = arith.constant 0 : i32
    return %c0_i32, %c0_i32_0, %c0_i32_1 : i32, i32, i32
  }
  func.func @transform_3(%arg0: i32) -> (i32, i32, i32, i32) {
    %c0_i32 = arith.constant 0 : i32
    %c0_i32_0 = arith.constant 0 : i32
    %c0_i32_1 = arith.constant 0 : i32
    %c0_i32_2 = arith.constant 0 : i32
    return %arg0, %c0_i32, %c0_i32_0, %c0_i32_1 : i32, i32, i32, i32
  }
  func.func @transform_4(%arg0: i32) -> (i32, i32) {
    %c0_i32 = arith.constant 0 : i32
    %c0_i32_0 = arith.constant 0 : i32
    return %arg0, %c0_i32 : i32, i32
  }
}

module attributes {stable_mosaic.version = 11 : i64} {
  func.func @_stage3_proj_kernel(%arg0: i32, %arg1: memref<128x4xf32, #tpu.memory_space<vmem>>, %arg2: memref<128x4xf32, #tpu.memory_space<vmem>>, %arg3: memref<2x4xf32, #tpu.memory_space<vmem>>, %arg4: memref<4x16xbf16, #tpu.memory_space<vmem>>, %arg5: memref<4x16xbf16, #tpu.memory_space<vmem>>, %arg6: memref<128x16xf32, #tpu.memory_space<vmem>>, %arg7: memref<128x16xf32, #tpu.memory_space<vmem>>, %arg8: memref<8x16xf32, #tpu.memory_space<vmem>>, %arg9: memref<8x16xf32, #tpu.memory_space<vmem>>) attributes {dimension_semantics = [#tpu.dimension_semantics<parallel>], iteration_bounds = array<i64: 4>, scalar_prefetch = 0 : i64, scratch_operands = 0 : i64, tpu.core_type = #tpu.core_type<tc>, window_params = [{transform_indices = @transform_0, window_bounds = array<i64: 128, 4>}, {transform_indices = @transform_1, window_bounds = array<i64: 128, 4>}, {pipeline_mode = #tpu.pipeline_mode<synchronous>, transform_indices = @transform_2, window_bounds = array<i64: 2, 4>}, {pipeline_mode = #tpu.pipeline_mode<synchronous>, transform_indices = @transform_3, window_bounds = array<i64: 4, 16>}, {pipeline_mode = #tpu.pipeline_mode<synchronous>, transform_indices = @transform_4, window_bounds = array<i64: 4, 16>}, {transform_indices = @transform_5, window_bounds = array<i64: 128, 16>}, {transform_indices = @transform_6, window_bounds = array<i64: 128, 16>}, {transform_indices = @transform_7, window_bounds = array<i64: 8, 16>}, {transform_indices = @transform_8, window_bounds = array<i64: 8, 16>}]} {
    %c0 = arith.constant 0 : index
    %c0_0 = arith.constant 0 : index
    %0 = vector.load %arg3[%c0, %c0_0] : memref<2x4xf32, #tpu.memory_space<vmem>>, vector<2x4xf32>
    %c0_1 = arith.constant 0 : index
    %c0_2 = arith.constant 0 : index
    %1 = vector.load %arg1[%c0_1, %c0_2] : memref<128x4xf32, #tpu.memory_space<vmem>>, vector<128x4xf32>
    %2 = vector.extract_strided_slice %0 {offsets = [0, 0], sizes = [1, 4], strides = [1, 1]} : vector<2x4xf32> to vector<1x4xf32>
    %3 = vector.broadcast %2 : vector<1x4xf32> to vector<128x4xf32>
    %4 = arith.mulf %1, %3 : vector<128x4xf32>
    %5 = vector.extract_strided_slice %0 {offsets = [1, 0], sizes = [1, 4], strides = [1, 1]} : vector<2x4xf32> to vector<1x4xf32>
    %6 = vector.broadcast %5 : vector<1x4xf32> to vector<128x4xf32>
    %7 = arith.addf %4, %6 : vector<128x4xf32>
    %cst = arith.constant 0.000000e+00 : f32
    %8 = vector.broadcast %cst : f32 to vector<128x4xf32>
    %9 = arith.maximumf %7, %8 : vector<128x4xf32>
    %10 = arith.truncf %9 : vector<128x4xf32> to vector<128x4xbf16>
    %c0_3 = arith.constant 0 : index
    %c0_4 = arith.constant 0 : index
    %11 = vector.load %arg4[%c0_3, %c0_4] : memref<4x16xbf16, #tpu.memory_space<vmem>>, vector<4x16xbf16>
    %cst_5 = arith.constant dense<0.000000e+00> : vector<128x16xf32>
    %12 = tpu.matmul %10, %11, %cst_5 {dimension_numbers = #tpu.dot_dimension_numbers<[1], [0], [0], [1], [0, 0, 1, 1], [], []>} : vector<128x4xbf16>, vector<4x16xbf16>, vector<128x16xf32> -> vector<128x16xf32>
    %c0_6 = arith.constant 0 : index
    %c0_7 = arith.constant 0 : index
    %13 = vector.load %arg2[%c0_6, %c0_7] : memref<128x4xf32, #tpu.memory_space<vmem>>, vector<128x4xf32>
    %14 = arith.truncf %13 : vector<128x4xf32> to vector<128x4xbf16>
    %c0_8 = arith.constant 0 : index
    %c0_9 = arith.constant 0 : index
    %15 = vector.load %arg5[%c0_8, %c0_9] : memref<4x16xbf16, #tpu.memory_space<vmem>>, vector<4x16xbf16>
    %cst_10 = arith.constant dense<0.000000e+00> : vector<128x16xf32>
    %16 = tpu.matmul %14, %15, %cst_10 {dimension_numbers = #tpu.dot_dimension_numbers<[1], [0], [0], [1], [0, 0, 1, 1], [], []>} : vector<128x4xbf16>, vector<4x16xbf16>, vector<128x16xf32> -> vector<128x16xf32>
    %c0_11 = arith.constant 0 : index
    %c0_12 = arith.constant 0 : index
    %17 = vector.load %arg6[%c0_11, %c0_12] : memref<128x16xf32, #tpu.memory_space<vmem>>, vector<128x16xf32>
    tpu.vector_store %arg6[%c0_11, %c0_12], %12 {strides = array<i32>} : memref<128x16xf32, #tpu.memory_space<vmem>>, vector<128x16xf32>,
    %c0_13 = arith.constant 0 : index
    %c0_14 = arith.constant 0 : index
    %18 = vector.load %arg7[%c0_13, %c0_14] : memref<128x16xf32, #tpu.memory_space<vmem>>, vector<128x16xf32>
    tpu.vector_store %arg7[%c0_13, %c0_14], %16 {strides = array<i32>} : memref<128x16xf32, #tpu.memory_space<vmem>>, vector<128x16xf32>,
    %cst_15 = arith.constant 0.000000e+00 : f32
    %19 = vector.broadcast %cst_15 : f32 to vector<8x16xf32>
    %c0_16 = arith.constant 0 : index
    %c0_17 = arith.constant 0 : index
    %20 = vector.load %arg8[%c0_16, %c0_17] : memref<8x16xf32, #tpu.memory_space<vmem>>, vector<8x16xf32>
    tpu.vector_store %arg8[%c0_16, %c0_17], %19 {strides = array<i32>} : memref<8x16xf32, #tpu.memory_space<vmem>>, vector<8x16xf32>,
    %cst_18 = arith.constant dense<0.000000e+00> : vector<16xf32>
    %21 = vector.multi_reduction <add>, %12, %cst_18 [0] : vector<128x16xf32> to vector<16xf32>
    %22 = vector.shape_cast %21 : vector<16xf32> to vector<1x16xf32>
    %c0_19 = arith.constant 0 : index
    %c0_20 = arith.constant 0 : index
    %23 = vector.load %arg8[%c0_19, %c0_20] : memref<8x16xf32, #tpu.memory_space<vmem>>, vector<1x16xf32>
    tpu.vector_store %arg8[%c0_19, %c0_20], %22 {strides = array<i32>} : memref<8x16xf32, #tpu.memory_space<vmem>>, vector<1x16xf32>,
    %24 = arith.mulf %12, %12 : vector<128x16xf32>
    %cst_21 = arith.constant dense<0.000000e+00> : vector<16xf32>
    %25 = vector.multi_reduction <add>, %24, %cst_21 [0] : vector<128x16xf32> to vector<16xf32>
    %26 = vector.shape_cast %25 : vector<16xf32> to vector<1x16xf32>
    %c1 = arith.constant 1 : index
    %c0_22 = arith.constant 0 : index
    %27 = vector.load %arg8[%c1, %c0_22] : memref<8x16xf32, #tpu.memory_space<vmem>>, vector<1x16xf32>
    tpu.vector_store %arg8[%c1, %c0_22], %26 {strides = array<i32>} : memref<8x16xf32, #tpu.memory_space<vmem>>, vector<1x16xf32>,
    %cst_23 = arith.constant 0.000000e+00 : f32
    %28 = vector.broadcast %cst_23 : f32 to vector<8x16xf32>
    %c0_24 = arith.constant 0 : index
    %c0_25 = arith.constant 0 : index
    %29 = vector.load %arg9[%c0_24, %c0_25] : memref<8x16xf32, #tpu.memory_space<vmem>>, vector<8x16xf32>
    tpu.vector_store %arg9[%c0_24, %c0_25], %28 {strides = array<i32>} : memref<8x16xf32, #tpu.memory_space<vmem>>, vector<8x16xf32>,
    %cst_26 = arith.constant dense<0.000000e+00> : vector<16xf32>
    %30 = vector.multi_reduction <add>, %16, %cst_26 [0] : vector<128x16xf32> to vector<16xf32>
    %31 = vector.shape_cast %30 : vector<16xf32> to vector<1x16xf32>
    %c0_27 = arith.constant 0 : index
    %c0_28 = arith.constant 0 : index
    %32 = vector.load %arg9[%c0_27, %c0_28] : memref<8x16xf32, #tpu.memory_space<vmem>>, vector<1x16xf32>
    tpu.vector_store %arg9[%c0_27, %c0_28], %31 {strides = array<i32>} : memref<8x16xf32, #tpu.memory_space<vmem>>, vector<1x16xf32>,
    %33 = arith.mulf %16, %16 : vector<128x16xf32>
    %cst_29 = arith.constant dense<0.000000e+00> : vector<16xf32>
    %34 = vector.multi_reduction <add>, %33, %cst_29 [0] : vector<128x16xf32> to vector<16xf32>
    %35 = vector.shape_cast %34 : vector<16xf32> to vector<1x16xf32>
    %c1_30 = arith.constant 1 : index
    %c0_31 = arith.constant 0 : index
    %36 = vector.load %arg9[%c1_30, %c0_31] : memref<8x16xf32, #tpu.memory_space<vmem>>, vector<1x16xf32>
    tpu.vector_store %arg9[%c1_30, %c0_31], %35 {strides = array<i32>} : memref<8x16xf32, #tpu.memory_space<vmem>>, vector<1x16xf32>,
    return
  }
  func.func @transform_0(%arg0: i32) -> (i32, i32) {
    %c0_i32 = arith.constant 0 : i32
    %c0_i32_0 = arith.constant 0 : i32
    return %arg0, %c0_i32 : i32, i32
  }
  func.func @transform_1(%arg0: i32) -> (i32, i32) {
    %c0_i32 = arith.constant 0 : i32
    %c0_i32_0 = arith.constant 0 : i32
    return %arg0, %c0_i32 : i32, i32
  }
  func.func @transform_2(%arg0: i32) -> (i32, i32) {
    %c0_i32 = arith.constant 0 : i32
    %c0_i32_0 = arith.constant 0 : i32
    %c0_i32_1 = arith.constant 0 : i32
    return %c0_i32, %c0_i32_0 : i32, i32
  }
  func.func @transform_3(%arg0: i32) -> (i32, i32) {
    %c0_i32 = arith.constant 0 : i32
    %c0_i32_0 = arith.constant 0 : i32
    %c0_i32_1 = arith.constant 0 : i32
    return %c0_i32, %c0_i32_0 : i32, i32
  }
  func.func @transform_4(%arg0: i32) -> (i32, i32) {
    %c0_i32 = arith.constant 0 : i32
    %c0_i32_0 = arith.constant 0 : i32
    %c0_i32_1 = arith.constant 0 : i32
    return %c0_i32, %c0_i32_0 : i32, i32
  }
  func.func @transform_5(%arg0: i32) -> (i32, i32) {
    %c0_i32 = arith.constant 0 : i32
    %c0_i32_0 = arith.constant 0 : i32
    return %arg0, %c0_i32 : i32, i32
  }
  func.func @transform_6(%arg0: i32) -> (i32, i32) {
    %c0_i32 = arith.constant 0 : i32
    %c0_i32_0 = arith.constant 0 : i32
    return %arg0, %c0_i32 : i32, i32
  }
  func.func @transform_7(%arg0: i32) -> (i32, i32) {
    %c0_i32 = arith.constant 0 : i32
    %c0_i32_0 = arith.constant 0 : i32
    return %arg0, %c0_i32 : i32, i32
  }
  func.func @transform_8(%arg0: i32) -> (i32, i32) {
    %c0_i32 = arith.constant 0 : i32
    %c0_i32_0 = arith.constant 0 : i32
    return %arg0, %c0_i32 : i32, i32
  }
}

module attributes {stable_mosaic.version = 11 : i64} {
  func.func @_stage4_proj_kernel(%arg0: i32, %arg1: memref<128x16xf32, #tpu.memory_space<vmem>>, %arg2: memref<128x16xf32, #tpu.memory_space<vmem>>, %arg3: memref<2x16xf32, #tpu.memory_space<vmem>>, %arg4: memref<2x16xf32, #tpu.memory_space<vmem>>, %arg5: memref<128x16xf32, #tpu.memory_space<vmem>>) attributes {dimension_semantics = [#tpu.dimension_semantics<parallel>], iteration_bounds = array<i64: 4>, scalar_prefetch = 0 : i64, scratch_operands = 0 : i64, tpu.core_type = #tpu.core_type<tc>, window_params = [{transform_indices = @transform_0, window_bounds = array<i64: 128, 16>}, {transform_indices = @transform_1, window_bounds = array<i64: 128, 16>}, {pipeline_mode = #tpu.pipeline_mode<synchronous>, transform_indices = @transform_2, window_bounds = array<i64: 2, 16>}, {pipeline_mode = #tpu.pipeline_mode<synchronous>, transform_indices = @transform_3, window_bounds = array<i64: 2, 16>}, {transform_indices = @transform_4, window_bounds = array<i64: 128, 16>}]} {
    %c0 = arith.constant 0 : index
    %c0_0 = arith.constant 0 : index
    %0 = vector.load %arg3[%c0, %c0_0] : memref<2x16xf32, #tpu.memory_space<vmem>>, vector<2x16xf32>
    %c0_1 = arith.constant 0 : index
    %c0_2 = arith.constant 0 : index
    %1 = vector.load %arg4[%c0_1, %c0_2] : memref<2x16xf32, #tpu.memory_space<vmem>>, vector<2x16xf32>
    %c0_3 = arith.constant 0 : index
    %c0_4 = arith.constant 0 : index
    %2 = vector.load %arg1[%c0_3, %c0_4] : memref<128x16xf32, #tpu.memory_space<vmem>>, vector<128x16xf32>
    %3 = vector.extract_strided_slice %0 {offsets = [0, 0], sizes = [1, 16], strides = [1, 1]} : vector<2x16xf32> to vector<1x16xf32>
    %4 = vector.broadcast %3 : vector<1x16xf32> to vector<128x16xf32>
    %5 = arith.mulf %2, %4 : vector<128x16xf32>
    %6 = vector.extract_strided_slice %0 {offsets = [1, 0], sizes = [1, 16], strides = [1, 1]} : vector<2x16xf32> to vector<1x16xf32>
    %7 = vector.broadcast %6 : vector<1x16xf32> to vector<128x16xf32>
    %8 = arith.addf %5, %7 : vector<128x16xf32>
    %c0_5 = arith.constant 0 : index
    %c0_6 = arith.constant 0 : index
    %9 = vector.load %arg2[%c0_5, %c0_6] : memref<128x16xf32, #tpu.memory_space<vmem>>, vector<128x16xf32>
    %10 = vector.extract_strided_slice %1 {offsets = [0, 0], sizes = [1, 16], strides = [1, 1]} : vector<2x16xf32> to vector<1x16xf32>
    %11 = vector.broadcast %10 : vector<1x16xf32> to vector<128x16xf32>
    %12 = arith.mulf %9, %11 : vector<128x16xf32>
    %13 = vector.extract_strided_slice %1 {offsets = [1, 0], sizes = [1, 16], strides = [1, 1]} : vector<2x16xf32> to vector<1x16xf32>
    %14 = vector.broadcast %13 : vector<1x16xf32> to vector<128x16xf32>
    %15 = arith.addf %12, %14 : vector<128x16xf32>
    %16 = arith.addf %8, %15 : vector<128x16xf32>
    %cst = arith.constant 0.000000e+00 : f32
    %17 = vector.broadcast %cst : f32 to vector<128x16xf32>
    %18 = arith.maximumf %16, %17 : vector<128x16xf32>
    %c0_7 = arith.constant 0 : index
    %c0_8 = arith.constant 0 : index
    %19 = vector.load %arg5[%c0_7, %c0_8] : memref<128x16xf32, #tpu.memory_space<vmem>>, vector<128x16xf32>
    tpu.vector_store %arg5[%c0_7, %c0_8], %18 {strides = array<i32>} : memref<128x16xf32, #tpu.memory_space<vmem>>, vector<128x16xf32>,
    return
  }
  func.func @transform_0(%arg0: i32) -> (i32, i32) {
    %c0_i32 = arith.constant 0 : i32
    %c0_i32_0 = arith.constant 0 : i32
    return %arg0, %c0_i32 : i32, i32
  }
  func.func @transform_1(%arg0: i32) -> (i32, i32) {
    %c0_i32 = arith.constant 0 : i32
    %c0_i32_0 = arith.constant 0 : i32
    return %arg0, %c0_i32 : i32, i32
  }
  func.func @transform_2(%arg0: i32) -> (i32, i32) {
    %c0_i32 = arith.constant 0 : i32
    %c0_i32_0 = arith.constant 0 : i32
    %c0_i32_1 = arith.constant 0 : i32
    return %c0_i32, %c0_i32_0 : i32, i32
  }
  func.func @transform_3(%arg0: i32) -> (i32, i32) {
    %c0_i32 = arith.constant 0 : i32
    %c0_i32_0 = arith.constant 0 : i32
    %c0_i32_1 = arith.constant 0 : i32
    return %c0_i32, %c0_i32_0 : i32, i32
  }
  func.func @transform_4(%arg0: i32) -> (i32, i32) {
    %c0_i32 = arith.constant 0 : i32
    %c0_i32_0 = arith.constant 0 : i32
    return %arg0, %c0_i32 : i32, i32
  }
}

</mosaic_0001>

<bundles_post_ra>
// kernel: bottleneck_forward.4
= control target key start
LH: loop header
LB: loop body
LE: loop exit
PB: predicated region body
PF: predicated region fallthrough
CT: control target
= control target key end

     0   :  { %s547_s12 = smov 0   ;;  %s692_s0 = inlined_call_operand.vmem [shape: f32[512,4], index: 0, kind: input, shape index: {}]   ;;  %s693_s1 = inlined_call_operand.vmem [shape: bf16[4,4], index: 1, kind: input, shape index: {}]   ;;  %s694_s2 = inlined_call_operand.vmem [shape: f32[512,4], index: 2, kind: output, shape index: {0}]   ;;  %s695_s3 = inlined_call_operand.vmem [shape: f32[32,4], index: 3, kind: output, shape index: {1}]  }
   0x1 LB: > { %s553_s13 = sadd.s32 4294967295, %s524_s12   ;;  %p490_p0 = scmp.ge.s32.totalorder %s524_s12, 1  ;;  %s524_s12 = sphi %s547_s12, %s14_s12  }
   0x2   : > { %p141_p1 = scmp.lt.s32.totalorder %s524_s12, 5 }
   0x4   : > { %p142_p2 = pnand %p490_p0, %p141_p1 }
   0x5   : > { %s491_s16 = sshll.u32 (!%p142_p2), %s553_s13, 4  ;;  %p181_p4 = scmp.lt.s32.totalorder (!%p142_p2), %s553_s13, 3 }
   0x6   : > { %145 = sbr.rel (%p142_p2) target bundleno = 209 (0xd1), region = 28  ;;  %p170_p3 = scmp.lt.s32.totalorder (!%p142_p2), %s491_s16, 63 }
   0xb   : > { %v210_v0 = vld [vmem:[%s693_s1] sm:$0x3]  ;;  %vm236_vm0 = vcmask 1041408   ;;  %s697_s16 = smov (!%p170_p3, %s491_s16), 63  ;;  %vm211_vm1 = vcmask 31744   ;;  %s699_s13 = smov (!%p181_p4, %s553_s13), 3 }
   0xc   : > { %v238_v1 = vsel %vm236_vm0, %v210_v0, 0  ;;  %s492_s17 = sshll.u32 %s697_s16, 3  ;;  %s495_s24 = sshll.u32 %s699_s13, 3  ;;  %v526_v40 = vmov 0.0   ;;  %vm343_vm2 = vcmask 24576  }
   0xd   : > { %247 = vmatpush.bf16.msra.mxu0 %v238_v1  ;;  %506 = vmatpush.bf16.msra.mxu1 %v238_v1  ;;  %s173_s20 = scalar_lea.vmem %s692_s0, %s492_s17  ;;  %s582_s23 = scalar_lea.vmem %s694_s2, %s492_s17 }
   0xe   : > { %507 = vmatpush.bf16.msra.mxu2 %v238_v1  ;;  %508 = vmatpush.bf16.msra.mxu3 %v238_v1  ;;  %v186_v2 = vld [vmem:[%s173_s20] sm:$0xff]  ;;  %v187_v3 = vld [vmem:[%s173_s20 + $0x8] sm:$0xff]  ;;  %v188_v14 = vld [vmem:[%s173_s20 + $0x10] sm:$0xff]  ;;  %s616_s27 = scalar_lea.vmem %s695_s3, %s495_s24 }
   0xf   : > { %v190_v4 = vld [vmem:[%s173_s20 + $0x20] sm:$0xff]  ;;  %v202_v5 = vpack.c.bf16 %v187_v3, %v186_v2  ;;  %v191_v6 = vld [vmem:[%s173_s20 + $0x28] sm:$0xff]  ;;  %v189_v15 = vld [vmem:[%s173_s20 + $0x18] sm:$0xff]  ;;  %305 = vst.msk [vmem:[%s616_s27] sm:$0xff] %vm211_vm1, %v526_v40 }
  0x10   : > { %v194_v7 = vld [vmem:[%s173_s20 + $0x40] sm:$0xff]  ;;  %v195_v8 = vld [vmem:[%s173_s20 + $0x48] sm:$0xff]  ;;  %v204_v9 = vpack.c.bf16 %v191_v6, %v190_v4  ;;  %v192_v16 = vld [vmem:[%s173_s20 + $0x30] sm:$0xff]  ;;  %v203_v22 = vpack.c.bf16 %v189_v15, %v188_v14 }
  0x11   : > { %v206_v10 = vpack.c.bf16 %v195_v8, %v194_v7  ;;  %v198_v11 = vld [vmem:[%s173_s20 + $0x60] sm:$0xff]  ;;  %v199_v12 = vld [vmem:[%s173_s20 + $0x68] sm:$0xff]  ;;  %496 = vmatmul.msk.bf16.vlgmr.msra.gmra.mxu0 %vm211_vm1, %v202_v5  ;;  %v193_v17 = vld [vmem:[%s173_s20 + $0x38] sm:$0xff] }
  0x12   : > { %v208_v13 = vpack.c.bf16 %v199_v12, %v198_v11  ;;  %498 = vmatmul.msk.bf16.vlgmr.msra.gmra.mxu1 %vm211_vm1, %v204_v9  ;;  %v196_v18 = vld [vmem:[%s173_s20 + $0x50] sm:$0xff]  ;;  %v197_v19 = vld [vmem:[%s173_s20 + $0x58] sm:$0xff]  ;;  %v205_v23 = vpack.c.bf16 %v193_v17, %v192_v16 }
  0x13   : > { %500 = vmatmul.msk.bf16.vlgmr.msra.gmra.mxu2 %vm211_vm1, %v206_v10  ;;  %v200_v20 = vld [vmem:[%s173_s20 + $0x70] sm:$0xff]  ;;  %v201_v21 = vld [vmem:[%s173_s20 + $0x78] sm:$0xff]  ;;  %v207_v24 = vpack.c.bf16 %v197_v19, %v196_v18 }
  0x14   : > { %502 = vmatmul.msk.bf16.vlgmr.msra.gmra.mxu3 %vm211_vm1, %v208_v13  ;;  %v209_v25 = vpack.c.bf16 %v201_v21, %v200_v20 }
  0x21   : > { %497 = vmatmul.msk.bf16.gmra.mxu0 %vm211_vm1, %v203_v22 }
  0x22   : > { %499 = vmatmul.msk.bf16.gmra.mxu1 %vm211_vm1, %v205_v23 }
  0x23   : > { %501 = vmatmul.msk.bf16.gmra.mxu2 %vm211_vm1, %v207_v24 }
  0x24   : > { %503 = vmatmul.msk.bf16.gmra.mxu3 %vm211_vm1, %v209_v25 }
  0x8e   : > { %v249_v26 = vpop.f32.mrf.mxu0 }
  0x8f   : > { %289 = vst.msk [vmem:[%s582_s23] sm:$0xff] %vm211_vm1, %v249_v26  ;;  %v259_v27 = vpop.f32.mrf.mxu1  ;;  %v345_v37 = vmul.f32 %v249_v26, %v249_v26  ;;  %v306_v41 = vsel %vm211_vm1, %v249_v26, 0.0 }
  0x90   : > { %293 = vst.msk [vmem:[%s582_s23 + $0x20] sm:$0xff] %vm211_vm1, %v259_v27  ;;  %v349_v52 = vmul.f32 %v259_v27, %v259_v27  ;;  %v313_v58 = vsel %vm211_vm1, %v259_v27, 0.0 }
  0x91   : > { %v361_v45 = vsel %vm211_vm1, %v345_v37, 0.0 }
  0x92   : > { %v368_v63 = vsel %vm211_vm1, %v349_v52, 0.0 }
  0x96   : > { %v589_v28 = vpop.f32.mrf.mxu2  ;;  %v251_v29 = vpop.f32.mrf.mxu0 }
  0x97   : > { %297 = vst.msk [vmem:[%s582_s23 + $0x40] sm:$0xff] %vm211_vm1, %v589_v28  ;;  %v594_v30 = vpop.f32.mrf.mxu3  ;;  %v261_v31 = vpop.f32.mrf.mxu1  ;;  %v346_v35 = vmul.f32 %v251_v29, %v251_v29  ;;  %v307_v38 = vsel %vm211_vm1, %v251_v29, 0.0  ;;  %v353_v11 = vmul.f32 %v589_v28, %v589_v28  ;;  %v321_v16 = vsel %vm211_vm1, %v589_v28, 0.0 }
  0x98   : > { %290 = vst.msk [vmem:[%s582_s23 + $0x8] sm:$0xff] %vm211_vm1, %v251_v29  ;;  %v308_v44 = vadd.f32 %v307_v38, %v306_v41  ;;  %v350_v59 = vmul.f32 %v261_v31, %v261_v31  ;;  %v315_v0 = vsel %vm211_vm1, %v261_v31, 0.0 }
  0x99   : > { %294 = vst.msk [vmem:[%s582_s23 + $0x28] sm:$0xff] %vm211_vm1, %v261_v31  ;;  %v362_v42 = vsel %vm211_vm1, %v346_v35, 0.0  ;;  %v376_v21 = vsel %vm211_vm1, %v353_v11, 0.0 }
  0x9a   : > { %301 = vst.msk [vmem:[%s582_s23 + $0x60] sm:$0xff] %vm211_vm1, %v594_v30  ;;  %v363_v48 = vadd.f32 %v362_v42, %v361_v45  ;;  %v370_v4 = vsel %vm211_vm1, %v350_v59, 0.0 }
  0x9e   : > { %v604_v32 = vpop.f32.mrf.mxu2  ;;  %v254_v33 = vpop.f32.mrf.mxu0 }
  0x9f   : > { %298 = vst.msk [vmem:[%s582_s23 + $0x48] sm:$0xff] %vm211_vm1, %v604_v32  ;;  %v609_v34 = vpop.f32.mrf.mxu3  ;;  %v264_v36 = vpop.f32.mrf.mxu1  ;;  %v347_v39 = vmul.f32 %v254_v33, %v254_v33  ;;  %v309_v43 = vsel %vm211_vm1, %v254_v33, 0.0  ;;  %v354_v17 = vmul.f32 %v604_v32, %v604_v32  ;;  %v323_v22 = vsel %vm211_vm1, %v604_v32, 0.0 }
  0xa0   : > { %291 = vst.msk [vmem:[%s582_s23 + $0x10] sm:$0xff] %vm211_vm1, %v254_v33  ;;  %v310_v49 = vadd.f32 %v309_v43, %v308_v44  ;;  %v351_v1 = vmul.f32 %v264_v36, %v264_v36  ;;  %v317_v5 = vsel %vm211_vm1, %v264_v36, 0.0  ;;  %v357_v33 = vmul.f32 %v594_v30, %v594_v30 }
  0xa1   : > { %295 = vst.msk [vmem:[%s582_s23 + $0x30] sm:$0xff] %vm211_vm1, %v264_v36  ;;  %v364_v46 = vsel %vm211_vm1, %v347_v39, 0.0  ;;  %v378_v26 = vsel %vm211_vm1, %v354_v17, 0.0  ;;  %v329_v32 = vsel %vm211_vm1, %v594_v30, 0.0  ;;  %v358_v39 = vmul.f32 %v609_v34, %v609_v34 }
  0xa2   : > { %302 = vst.msk [vmem:[%s582_s23 + $0x68] sm:$0xff] %vm211_vm1, %v609_v34  ;;  %v365_v56 = vadd.f32 %v364_v46, %v363_v48  ;;  %v372_v12 = vsel %vm211_vm1, %v351_v1, 0.0  ;;  %v384_v43 = vsel %vm211_vm1, %v357_v33, 0.0  ;;  %v331_v44 = vsel %vm211_vm1, %v609_v34, 0.0 }
  0xa3   : > { %v386_v48 = vsel %vm211_vm1, %v358_v39, 0.0 }
  0xa6   : > { %v274_v47 = vpop.f32.mrf.mxu2  ;;  %v256_v50 = vpop.f32.mrf.mxu0 }
  0xa7   : > { %299 = vst.msk [vmem:[%s582_s23 + $0x50] sm:$0xff] %vm211_vm1, %v274_v47  ;;  %v633_v51 = vpop.f32.mrf.mxu3  ;;  %v311_v53 = vsel %vm211_vm1, %v256_v50, 0.0  ;;  %v348_v54 = vmul.f32 %v256_v50, %v256_v50  ;;  %v266_v55 = vpop.f32.mrf.mxu1  ;;  %v355_v23 = vmul.f32 %v274_v47, %v274_v47  ;;  %v325_v27 = vsel %vm211_vm1, %v274_v47, 0.0 }
  0xa8   : > { %292 = vst.msk [vmem:[%s582_s23 + $0x18] sm:$0xff] %vm211_vm1, %v256_v50  ;;  %v312_v57 = vadd.f32 %v311_v53, %v310_v49  ;;  %v352_v6 = vmul.f32 %v266_v55, %v266_v55  ;;  %v319_v13 = vsel %vm211_vm1, %v266_v55, 0.0  ;;  %v359_v45 = vmul.f32 %v633_v51, %v633_v51 }
  0xa9   : > { %296 = vst.msk [vmem:[%s582_s23 + $0x38] sm:$0xff] %vm211_vm1, %v266_v55  ;;  %v366_v60 = vsel %vm211_vm1, %v348_v54, 0.0  ;;  %v380_v35 = vsel %vm211_vm1, %v355_v23, 0.0  ;;  %v333_v30 = vsel %vm211_vm1, %v633_v51, 0.0 }
  0xaa   : > { %303 = vst.msk [vmem:[%s582_s23 + $0x70] sm:$0xff] %vm211_vm1, %v633_v51  ;;  %v314_v61 = vadd.f32 %v313_v58, %v312_v57  ;;  %v367_v62 = vadd.f32 %v366_v60, %v365_v56  ;;  %v374_v18 = vsel %vm211_vm1, %v352_v6, 0.0  ;;  %v388_v53 = vsel %vm211_vm1, %v359_v45, 0.0 }
  0xac   : > { %v369_v2 = vadd.f32 %v368_v63, %v367_v62  ;;  %v316_v3 = vadd.f32 %v315_v0, %v314_v61 }
  0xae   : > { %v276_v7 = vpop.f32.mrf.mxu2  ;;  %v318_v8 = vadd.f32 %v317_v5, %v316_v3  ;;  %v371_v9 = vadd.f32 %v370_v4, %v369_v2 }
  0xaf   : > { %300 = vst.msk [vmem:[%s582_s23 + $0x58] sm:$0xff] %vm211_vm1, %v276_v7  ;;  %v286_v10 = vpop.f32.mrf.mxu3  ;;  %v356_v28 = vmul.f32 %v276_v7, %v276_v7  ;;  %v327_v36 = vsel %vm211_vm1, %v276_v7, 0.0 }
  0xb0   : > { %304 = vst.msk [vmem:[%s582_s23 + $0x78] sm:$0xff] %vm211_vm1, %v286_v10  ;;  %v320_v14 = vadd.f32 %v319_v13, %v318_v8  ;;  %v373_v15 = vadd.f32 %v372_v12, %v371_v9  ;;  %v360_v49 = vmul.f32 %v286_v10, %v286_v10  ;;  %v335_v54 = vsel %vm211_vm1, %v286_v10, 0.0 }
  0xb1   : > { %v382_v40 = vsel %vm211_vm1, %v356_v28, 0.0 }
  0xb2   : > { %v322_v19 = vadd.f32 %v321_v16, %v320_v14  ;;  %v375_v20 = vadd.f32 %v374_v18, %v373_v15  ;;  %v390_v56 = vsel %vm211_vm1, %v360_v49, 0.0 }
  0xb4   : > { %v377_v24 = vadd.f32 %v376_v21, %v375_v20  ;;  %v324_v25 = vadd.f32 %v323_v22, %v322_v19 }
  0xb6   : > { %v326_v29 = vadd.f32 %v325_v27, %v324_v25  ;;  %v379_v31 = vadd.f32 %v378_v26, %v377_v24 }
  0xb8   : > { %v381_v37 = vadd.f32 %v380_v35, %v379_v31  ;;  %v328_v38 = vadd.f32 %v327_v36, %v326_v29 }
  0xba   : > { %v330_v41 = vadd.f32 %v329_v32, %v328_v38  ;;  %v383_v42 = vadd.f32 %v382_v40, %v381_v37 }
  0xbc   : > { %v385_v46 = vadd.f32 %v384_v43, %v383_v42  ;;  %v332_v47 = vadd.f32 %v331_v44, %v330_v41 }
  0xbe   : > { %v334_v50 = vadd.f32 %v333_v30, %v332_v47  ;;  %v387_v52 = vadd.f32 %v386_v48, %v385_v46 }
  0xc0   : > { %v389_v55 = vadd.f32 %v388_v53, %v387_v52  ;;  %v336_v34 = vadd.f32 %v335_v54, %v334_v50 }
  0xc2   : > { %v337_v57 = vrot.slane %v336_v34, 4  ;;  %v391_v58 = vadd.f32 %v390_v56, %v389_v55 }
  0xc4   : > { %v338_v59 = vadd.f32 %v337_v57, %v336_v34  ;;  %v392_v60 = vrot.slane %v391_v58, 4 }
  0xc6   : > { %v339_v61 = vrot.slane %v338_v59, 2  ;;  %v393_v62 = vadd.f32 %v392_v60, %v391_v58 }
  0xc8   : > { %v340_v51 = vadd.f32 %v339_v61, %v338_v59  ;;  %v394_v63 = vrot.slane %v393_v62, 2 }
  0xca   : > { %v341_v0 = vrot.slane %v340_v51, 1  ;;  %v395_v1 = vadd.f32 %v394_v63, %v393_v62 }
  0xcc   : > { %v342_v2 = vadd.f32 %v341_v0, %v340_v51  ;;  %v396_v3 = vrot.slane %v395_v1, 1 }
  0xce   : > { %344 = vst.msk [vmem:[%s616_s27] sm:$0x1] %vm343_vm2, %v342_v2  ;;  %v397_v4 = vadd.f32 %v396_v3, %v395_v1 }
  0xd0   : > { %398 = vst.msk [vmem:[%s616_s27 + $0x1] sm:$0x1] %vm343_vm2, %v397_v4 }
  0xd1 PF: > { %s14_s12 = sadd.s32 1, %s524_s12  }
  0xd2   : > { %p11_p5 = scmp.ge.s32.totalorder %s14_s12, 6  }
  0xd4   :  { %13 = sbr.rel (!%p11_p5) target bundleno = 1 (0x1), region = 70 }

// kernel: bottleneck_forward.6
= control target key start
LH: loop header
LB: loop body
LE: loop exit
PB: predicated region body
PF: predicated region fallthrough
CT: control target
= control target key end

     0   :  { %s1103_s27 = smov 0   ;;  %s1495_s0 = inlined_call_operand.vmem [shape: f32[512,4], index: 0, kind: input, shape index: {}]   ;;  %s1496_s1 = inlined_call_operand.vmem [shape: f32[512,4], index: 1, kind: input, shape index: {}]   ;;  %s1497_s2 = inlined_call_operand.vmem [shape: f32[2,4], index: 2, kind: input, shape index: {}]   ;;  %s1498_s3 = inlined_call_operand.vmem [shape: bf16[4,16], index: 3, kind: input, shape index: {}]   ;;  %s1499_s4 = inlined_call_operand.vmem [shape: bf16[4,16], index: 4, kind: input, shape index: {}]   ;;  %s1500_s5 = inlined_call_operand.vmem [shape: f32[512,16], index: 5, kind: output, shape index: {0}]   ;;  %s1501_s6 = inlined_call_operand.vmem [shape: f32[512,16], index: 6, kind: output, shape index: {1}]   ;;  %s1502_s7 = inlined_call_operand.vmem [shape: f32[32,16], index: 7, kind: output, shape index: {2}]   ;;  %s1503_s8 = inlined_call_operand.vmem [shape: f32[32,16], index: 8, kind: output, shape index: {3}]  }
   0x1 LB: > { %s1109_s28 = sadd.s32 4294967295, %s1055_s27   ;;  %p1009_p0 = scmp.ge.s32.totalorder %s1055_s27, 1  ;;  %s1055_s27 = sphi %s1103_s27, %s19_s27  }
   0x2   : > { %p281_p1 = scmp.lt.s32.totalorder %s1055_s27, 5 }
   0x4   : > { %p282_p2 = pnand %p1009_p0, %p281_p1 }
   0x5   : > { %s1010_s9 = sshll.u32 (!%p282_p2), %s1109_s28, 4  ;;  %p357_p4 = scmp.lt.s32.totalorder (!%p282_p2), %s1109_s28, 3 }
   0x6   : > { %285 = sbr.rel (%p282_p2) target bundleno = 240 (0xf0), region = 40  ;;  %p334_p3 = scmp.lt.s32.totalorder (!%p282_p2), %s1010_s9, 63 }
   0xb   : > { %vm467_vm0 = vcmask 1041408   ;;  %v544_v0 = vld [vmem:[%s1499_s4] sm:$0x3]  ;;  %s1505_s9 = smov (!%p334_p3, %s1010_s9), 63  ;;  %vm442_vm1 = vcmask 31744   ;;  %vm621_vm2 = vcmask 130048  }
   0xc   : > { %v570_v1 = vsel %vm467_vm0, %v544_v0, 0  ;;  %v441_v2 = vld [vmem:[%s1498_s3] sm:$0x3]  ;;  %s1125_s14 = sshll.u32 %s1505_s9, 3  ;;  %s1507_s28 = smov (!%p357_p4, %s1109_s28), 3  ;;  %vm692_vm3 = vcmask 122880  }
   0xd   : > { %v366_v3 = vld [vmem:[%s1497_s2] sm:$0x3]  ;;  %579 = vmatpush.bf16.msra.mxu1 %v570_v1  ;;  %v469_v4 = vsel %vm467_vm0, %v441_v2, 0  ;;  %1039 = vmatpush.bf16.msra.mxu3 %v570_v1  ;;  %s1131_s17 = scalar_lea.vmem %s1496_s1, %s1125_s14  ;;  %s1137_s20 = scalar_lea.vmem %s1495_s0, %s1125_s14 }
   0xe   : > { %478 = vmatpush.bf16.msra.mxu0 %v469_v4  ;;  %1038 = vmatpush.bf16.msra.mxu2 %v469_v4  ;;  %v1123_v5 = vperm.slane %v366_v3, 0  ;;  %v1139_v6 = vperm.slane %v366_v3, 1  ;;  %v520_v7 = vld [vmem:[%s1131_s17] sm:$0xff]  ;;  %v521_v8 = vld [vmem:[%s1131_s17 + $0x8] sm:$0xff]  ;;  %v369_v29 = vld [vmem:[%s1137_s20 + $0x10] sm:$0xff]  ;;  %s1225_s23 = scalar_lea.vmem %s1501_s6, %s1125_s14  ;;  %s1233_s26 = scalar_lea.vmem %s1500_s5, %s1125_s14 }
   0xf   : > { %v367_v9 = vld [vmem:[%s1137_s20] sm:$0xff]  ;;  %v536_v10 = vpack.c.bf16 %v521_v8, %v520_v7  ;;  %v368_v11 = vld [vmem:[%s1137_s20 + $0x8] sm:$0xff]  ;;  %v370_v30 = vld [vmem:[%s1137_s20 + $0x18] sm:$0xff]  ;;  %s1018_s29 = sshll.u32 %s1507_s28, 3 }
  0x10   : > { %v384_v12 = vmul.f32 %v1123_v5, %v367_v9  ;;  %v375_v13 = vld [vmem:[%s1137_s20 + $0x40] sm:$0xff]  ;;  %v376_v14 = vld [vmem:[%s1137_s20 + $0x48] sm:$0xff]  ;;  %v385_v15 = vmul.f32 %v1123_v5, %v368_v11  ;;  %v377_v31 = vld [vmem:[%s1137_s20 + $0x50] sm:$0xff]  ;;  %v386_v35 = vmul.f32 %v1123_v5, %v369_v29  ;;  %v387_v36 = vmul.f32 %v1123_v5, %v370_v30  ;;  %s1347_s9 = scalar_lea.vmem %s1502_s7, %s1018_s29  ;;  %s1358_s12 = scalar_lea.vmem %s1503_s8, %s1018_s29 }
  0x11   : > { %v392_v16 = vmul.f32 %v1123_v5, %v375_v13  ;;  %v393_v17 = vmul.f32 %v1123_v5, %v376_v14  ;;  %v528_v18 = vld [vmem:[%s1131_s17 + $0x40] sm:$0xff]  ;;  %v529_v19 = vld [vmem:[%s1131_s17 + $0x48] sm:$0xff]  ;;  %1028 = vmatmul.msk.bf16.vlgmr.msra.gmra.mxu1 %vm442_vm1, %v536_v10  ;;  %v378_v32 = vld [vmem:[%s1137_s20 + $0x58] sm:$0xff]  ;;  %v394_v37 = vmul.f32 %v1123_v5, %v377_v31 }
  0x12   : > { %v401_v20 = vadd.f32 %v1139_v6, %v384_v12  ;;  %v540_v21 = vpack.c.bf16 %v529_v19, %v528_v18  ;;  %v402_v22 = vadd.f32 %v1139_v6, %v385_v15  ;;  %v395_v38 = vmul.f32 %v1123_v5, %v378_v32  ;;  %v522_v39 = vld [vmem:[%s1131_s17 + $0x10] sm:$0xff]  ;;  %v523_v40 = vld [vmem:[%s1131_s17 + $0x18] sm:$0xff]  ;;  %v371_v55 = vld [vmem:[%s1137_s20 + $0x20] sm:$0xff] }
  0x13   : > { %v409_v23 = vadd.f32 %v1139_v6, %v392_v16  ;;  %v410_v24 = vadd.f32 %v1139_v6, %v393_v17  ;;  %v403_v41 = vadd.f32 %v1139_v6, %v386_v35  ;;  %v404_v42 = vadd.f32 %v1139_v6, %v387_v36  ;;  %v530_v45 = vld [vmem:[%s1131_s17 + $0x50] sm:$0xff]  ;;  %v531_v46 = vld [vmem:[%s1131_s17 + $0x58] sm:$0xff]  ;;  %v372_v56 = vld [vmem:[%s1137_s20 + $0x28] sm:$0xff] }
  0x14   : > { %v417_v25 = vmax.f32 %v401_v20, 0.0  ;;  %1032 = vmatmul.msk.bf16.vlgmr.msra.gmra.mxu3 %vm442_vm1, %v540_v21  ;;  %v418_v26 = vmax.f32 %v402_v22, 0.0  ;;  %v411_v43 = vadd.f32 %v1139_v6, %v394_v37  ;;  %v412_v44 = vadd.f32 %v1139_v6, %v395_v38  ;;  %v379_v57 = vld [vmem:[%s1137_s20 + $0x60] sm:$0xff]  ;;  %v380_v58 = vld [vmem:[%s1137_s20 + $0x68] sm:$0xff]  ;;  %v373_v17 = vld [vmem:[%s1137_s20 + $0x30] sm:$0xff] }
  0x15   : > { %v425_v27 = vmax.f32 %v409_v23, 0.0  ;;  %v426_v28 = vmax.f32 %v410_v24, 0.0  ;;  %v537_v47 = vpack.c.bf16 %v523_v40, %v522_v39  ;;  %v541_v48 = vpack.c.bf16 %v531_v46, %v530_v45  ;;  %v524_v63 = vld [vmem:[%s1131_s17 + $0x20] sm:$0xff]  ;;  %v525_v0 = vld [vmem:[%s1131_s17 + $0x28] sm:$0xff]  ;;  %v374_v18 = vld [vmem:[%s1137_s20 + $0x38] sm:$0xff] }
  0x16   : > { %v433_v33 = vpack.c.bf16 %v418_v26, %v417_v25  ;;  %v419_v49 = vmax.f32 %v403_v41, 0.0  ;;  %v420_v50 = vmax.f32 %v404_v42, 0.0  ;;  %v427_v51 = vmax.f32 %v411_v43, 0.0  ;;  %v532_v7 = vld [vmem:[%s1131_s17 + $0x60] sm:$0xff]  ;;  %v533_v8 = vld [vmem:[%s1131_s17 + $0x68] sm:$0xff]  ;;  %v381_v19 = vld [vmem:[%s1137_s20 + $0x70] sm:$0xff] }
  0x17   : > { %v437_v34 = vpack.c.bf16 %v426_v28, %v425_v27  ;;  %v428_v52 = vmax.f32 %v412_v44, 0.0  ;;  %v388_v59 = vmul.f32 %v1123_v5, %v371_v55  ;;  %v389_v60 = vmul.f32 %v1123_v5, %v372_v56  ;;  %v382_v20 = vld [vmem:[%s1137_s20 + $0x78] sm:$0xff]  ;;  %v526_v25 = vld [vmem:[%s1131_s17 + $0x30] sm:$0xff] }
  0x18   : > { %1020 = vmatmul.msk.bf16.vlgmr.msra.gmra.mxu0 %vm442_vm1, %v433_v33  ;;  %v434_v53 = vpack.c.bf16 %v420_v50, %v419_v49  ;;  %v396_v61 = vmul.f32 %v1123_v5, %v379_v57  ;;  %v397_v62 = vmul.f32 %v1123_v5, %v380_v58  ;;  %v538_v9 = vpack.c.bf16 %v525_v0, %v524_v63  ;;  %v527_v26 = vld [vmem:[%s1131_s17 + $0x38] sm:$0xff]  ;;  %v534_v31 = vld [vmem:[%s1131_s17 + $0x70] sm:$0xff] }
  0x19   : > { %1024 = vmatmul.msk.bf16.vlgmr.msra.gmra.mxu2 %vm442_vm1, %v437_v34  ;;  %v438_v54 = vpack.c.bf16 %v428_v52, %v427_v51  ;;  %v405_v1 = vadd.f32 %v1139_v6, %v388_v59  ;;  %v406_v2 = vadd.f32 %v1139_v6, %v389_v60  ;;  %v542_v10 = vpack.c.bf16 %v533_v8, %v532_v7  ;;  %v535_v32 = vld [vmem:[%s1131_s17 + $0x78] sm:$0xff] }
  0x1a   : > { %v413_v3 = vadd.f32 %v1139_v6, %v396_v61  ;;  %v414_v4 = vadd.f32 %v1139_v6, %v397_v62  ;;  %v390_v21 = vmul.f32 %v1123_v5, %v373_v17  ;;  %v391_v22 = vmul.f32 %v1123_v5, %v374_v18 }
  0x1b   : > { %v421_v11 = vmax.f32 %v405_v1, 0.0  ;;  %v422_v12 = vmax.f32 %v406_v2, 0.0  ;;  %v398_v23 = vmul.f32 %v1123_v5, %v381_v19  ;;  %v399_v24 = vmul.f32 %v1123_v5, %v382_v20 }
  0x1c   : > { %v429_v13 = vmax.f32 %v413_v3, 0.0  ;;  %v430_v14 = vmax.f32 %v414_v4, 0.0  ;;  %v407_v27 = vadd.f32 %v1139_v6, %v390_v21  ;;  %v408_v28 = vadd.f32 %v1139_v6, %v391_v22 }
  0x1d   : > { %v435_v15 = vpack.c.bf16 %v422_v12, %v421_v11  ;;  %v415_v29 = vadd.f32 %v1139_v6, %v398_v23  ;;  %v416_v30 = vadd.f32 %v1139_v6, %v399_v24  ;;  %v539_v33 = vpack.c.bf16 %v527_v26, %v526_v25 }
  0x1e   : > { %v439_v16 = vpack.c.bf16 %v430_v14, %v429_v13  ;;  %v543_v34 = vpack.c.bf16 %v535_v32, %v534_v31  ;;  %v423_v35 = vmax.f32 %v407_v27, 0.0  ;;  %v424_v36 = vmax.f32 %v408_v28, 0.0 }
  0x1f   : > { %v431_v37 = vmax.f32 %v415_v29, 0.0  ;;  %v432_v5 = vmax.f32 %v416_v30, 0.0 }
  0x20   : > { %v436_v38 = vpack.c.bf16 %v424_v36, %v423_v35 }
  0x21   : > { %1029 = vmatmul.msk.bf16.gmra.mxu1 %vm442_vm1, %v537_v47  ;;  %v440_v39 = vpack.c.bf16 %v432_v5, %v431_v37 }
  0x24   : > { %1033 = vmatmul.msk.bf16.gmra.mxu3 %vm442_vm1, %v541_v48 }
  0x28   : > { %1021 = vmatmul.msk.bf16.gmra.mxu0 %vm442_vm1, %v434_v53 }
  0x29   : > { %1025 = vmatmul.msk.bf16.gmra.mxu2 %vm442_vm1, %v438_v54 }
  0x31   : > { %1030 = vmatmul.msk.bf16.gmra.mxu1 %vm442_vm1, %v538_v9 }
  0x34   : > { %1034 = vmatmul.msk.bf16.gmra.mxu3 %vm442_vm1, %v542_v10 }
  0x38   : > { %1022 = vmatmul.msk.bf16.gmra.mxu0 %vm442_vm1, %v435_v15 }
  0x39   : > { %1026 = vmatmul.msk.bf16.gmra.mxu2 %vm442_vm1, %v439_v16 }
  0x41   : > { %1031 = vmatmul.msk.bf16.gmra.mxu1 %vm442_vm1, %v539_v33 }
  0x44   : > { %1035 = vmatmul.msk.bf16.gmra.mxu3 %vm442_vm1, %v543_v34 }
  0x48   : > { %1023 = vmatmul.msk.bf16.gmra.mxu0 %vm442_vm1, %v436_v38 }
  0x49   : > { %1027 = vmatmul.msk.bf16.gmra.mxu2 %vm442_vm1, %v440_v39 }
  0x8e   : > { %v581_v6 = vpop.f32.mrf.mxu1 }
  0x8f   : > { %638 = vst.msk [vmem:[%s1225_s23] sm:$0xff] %vm621_vm2, %v581_v6  ;;  %v787_v56 = vmul.f32 %v581_v6, %v581_v6  ;;  %v749_v2 = vsel %vm621_vm2, %v581_v6, 0.0 }
  0x91   : > { %v803_v4 = vsel %vm621_vm2, %v787_v56, 0.0 }
  0x95   : > { %v480_v40 = vpop.f32.mrf.mxu0 }
  0x96   : > { %622 = vst.msk [vmem:[%s1233_s26] sm:$0xff] %vm621_vm2, %v480_v40  ;;  %v583_v41 = vpop.f32.mrf.mxu1  ;;  %v694_v59 = vmul.f32 %v480_v40, %v480_v40  ;;  %v655_v7 = vsel %vm621_vm2, %v480_v40, 0.0 }
  0x97   : > { %v601_v42 = vpop.f32.mrf.mxu3  ;;  %639 = vst.msk [vmem:[%s1225_s23 + $0x8] sm:$0xff] %vm621_vm2, %v583_v41  ;;  %v788_v57 = vmul.f32 %v583_v41, %v583_v41  ;;  %v750_v63 = vsel %vm621_vm2, %v583_v41, 0.0 }
  0x98   : > { %646 = vst.msk [vmem:[%s1225_s23 + $0x40] sm:$0xff] %vm621_vm2, %v601_v42  ;;  %v795_v60 = vmul.f32 %v601_v42, %v601_v42  ;;  %v1312_v9 = vsel %vm621_vm2, %v601_v42, 0.0  ;;  %v710_v10 = vsel %vm621_vm2, %v694_v59, 0.0  ;;  %v751_v11 = vadd.f32 %v750_v63, %v749_v2 }
  0x99   : > { %v804_v8 = vsel %vm621_vm2, %v788_v57, 0.0 }
  0x9a   : > { %v1317_v13 = vsel %vm621_vm2, %v795_v60, 0.0  ;;  %v805_v19 = vadd.f32 %v804_v8, %v803_v4 }
  0x9c   : > { %v500_v43 = vpop.f32.mrf.mxu2 }
  0x9d   : > { %630 = vst.msk [vmem:[%s1233_s26 + $0x40] sm:$0xff] %vm621_vm2, %v500_v43  ;;  %v482_v44 = vpop.f32.mrf.mxu0  ;;  %v702_v3 = vmul.f32 %v500_v43, %v500_v43  ;;  %v1325_v20 = vsel %vm621_vm2, %v500_v43, 0.0  ;;  %v1057_v43 = vmov 0.0  }
  0x9e   : > { %623 = vst.msk [vmem:[%s1233_s26 + $0x8] sm:$0xff] %vm621_vm2, %v482_v44  ;;  %v586_v45 = vpop.f32.mrf.mxu1  ;;  %v695_v0 = vmul.f32 %v482_v44, %v482_v44  ;;  %v656_v12 = vsel %vm621_vm2, %v482_v44, 0.0 }
  0x9f   : > { %v603_v46 = vpop.f32.mrf.mxu3  ;;  %640 = vst.msk [vmem:[%s1225_s23 + $0x10] sm:$0xff] %vm621_vm2, %v586_v45  ;;  %v789_v1 = vmul.f32 %v586_v45, %v586_v45  ;;  %v752_v15 = vsel %vm621_vm2, %v586_v45, 0.0  ;;  %v1328_v21 = vsel %vm621_vm2, %v702_v3, 0.0  ;;  %v657_v23 = vadd.f32 %v656_v12, %v655_v7 }
  0xa0   : > { %647 = vst.msk [vmem:[%s1225_s23 + $0x48] sm:$0xff] %vm621_vm2, %v603_v46  ;;  %v711_v14 = vsel %vm621_vm2, %v695_v0, 0.0  ;;  %v796_v22 = vmul.f32 %v603_v46, %v603_v46  ;;  %v1335_v24 = vsel %vm621_vm2, %v603_v46, 0.0  ;;  %v753_v29 = vadd.f32 %v752_v15, %v751_v11 }
  0xa1   : > { %v806_v16 = vsel %vm621_vm2, %v789_v1, 0.0  ;;  %v712_v28 = vadd.f32 %v711_v14, %v710_v10  ;;  %654 = vst.msk [vmem:[%s1347_s9] sm:$0xff] %vm621_vm2, %v1057_v43 }
  0xa2   : > { %v807_v30 = vadd.f32 %v806_v16, %v805_v19  ;;  %v1363_v38 = vsel %vm621_vm2, %v796_v22, 0.0  ;;  %748 = vst.msk [vmem:[%s1358_s12] sm:$0xff] %vm621_vm2, %v1057_v43 }
  0xa4   : > { %v1249_v47 = vpop.f32.mrf.mxu2 }
  0xa5   : > { %631 = vst.msk [vmem:[%s1233_s26 + $0x48] sm:$0xff] %vm621_vm2, %v1249_v47  ;;  %v1254_v48 = vpop.f32.mrf.mxu0  ;;  %v703_v34 = vmul.f32 %v1249_v47, %v1249_v47  ;;  %v1377_v45 = vsel %vm621_vm2, %v1249_v47, 0.0 }
  0xa6   : > { %624 = vst.msk [vmem:[%s1233_s26 + $0x10] sm:$0xff] %vm621_vm2, %v1254_v48  ;;  %v588_v49 = vpop.f32.mrf.mxu1  ;;  %v696_v31 = vmul.f32 %v1254_v48, %v1254_v48  ;;  %v658_v5 = vsel %vm621_vm2, %v1254_v48, 0.0 }
  0xa7   : > { %v1259_v50 = vpop.f32.mrf.mxu3  ;;  %641 = vst.msk [vmem:[%s1225_s23 + $0x18] sm:$0xff] %vm621_vm2, %v588_v49  ;;  %v790_v17 = vmul.f32 %v588_v49, %v588_v49  ;;  %v754_v25 = vsel %vm621_vm2, %v588_v49, 0.0  ;;  %v1382_v49 = vsel %vm621_vm2, %v703_v34, 0.0  ;;  %v659_v60 = vadd.f32 %v658_v5, %v657_v23 }
  0xa8   : > { %648 = vst.msk [vmem:[%s1225_s23 + $0x50] sm:$0xff] %vm621_vm2, %v1259_v50  ;;  %v755_v39 = vadd.f32 %v754_v25, %v753_v29  ;;  %v713_v44 = vsel %vm621_vm2, %v696_v31, 0.0  ;;  %v797_v2 = vmul.f32 %v1259_v50, %v1259_v50 }
  0xa9   : > { %v808_v35 = vsel %vm621_vm2, %v790_v17, 0.0  ;;  %v714_v0 = vadd.f32 %v713_v44, %v712_v28 }
  0xaa   : > { %v809_v46 = vadd.f32 %v808_v35, %v807_v30  ;;  %v822_v34 = vsel %vm621_vm2, %v797_v2, 0.0 }
  0xac   : > { %v1266_v51 = vpop.f32.mrf.mxu2 }
  0xad   : > { %632 = vst.msk [vmem:[%s1233_s26 + $0x50] sm:$0xff] %vm621_vm2, %v1266_v51  ;;  %v1271_v52 = vpop.f32.mrf.mxu0  ;;  %v674_v5 = vsel %vm621_vm2, %v1266_v51, 0.0 }
  0xae   : > { %625 = vst.msk [vmem:[%s1233_s26 + $0x18] sm:$0xff] %vm621_vm2, %v1271_v52  ;;  %v591_v53 = vpop.f32.mrf.mxu1  ;;  %v697_v6 = vmul.f32 %v1271_v52, %v1271_v52  ;;  %v660_v47 = vsel %vm621_vm2, %v1271_v52, 0.0 }
  0xaf   : > { %v1276_v54 = vpop.f32.mrf.mxu3  ;;  %642 = vst.msk [vmem:[%s1225_s23 + $0x20] sm:$0xff] %vm621_vm2, %v591_v53  ;;  %v791_v26 = vmul.f32 %v591_v53, %v591_v53  ;;  %v756_v36 = vsel %vm621_vm2, %v591_v53, 0.0  ;;  %v661_v14 = vadd.f32 %v660_v47, %v659_v60 }
  0xb0   : > { %649 = vst.msk [vmem:[%s1225_s23 + $0x58] sm:$0xff] %vm621_vm2, %v1276_v54  ;;  %v757_v48 = vadd.f32 %v756_v36, %v755_v39  ;;  %v715_v1 = vsel %vm621_vm2, %v697_v6, 0.0  ;;  %v798_v36 = vmul.f32 %v1276_v54, %v1276_v54 }
  0xb1   : > { %v810_v40 = vsel %vm621_vm2, %v791_v26, 0.0  ;;  %v716_v25 = vadd.f32 %v715_v1, %v714_v0  ;;  %v768_v26 = vsel %vm621_vm2, %v1259_v50, 0.0 }
  0xb4   : > { %v1283_v55 = vpop.f32.mrf.mxu2 }
  0xb5   : > { %633 = vst.msk [vmem:[%s1233_s26 + $0x58] sm:$0xff] %vm621_vm2, %v1283_v55  ;;  %v1289_v58 = vpop.f32.mrf.mxu0 }
  0xb6   : > { %626 = vst.msk [vmem:[%s1233_s26 + $0x20] sm:$0xff] %vm621_vm2, %v1289_v58  ;;  %v593_v61 = vpop.f32.mrf.mxu1  ;;  %v698_v53 = vmul.f32 %v1289_v58, %v1289_v58  ;;  %v662_v7 = vsel %vm621_vm2, %v1289_v58, 0.0 }
  0xb7   : > { %v1294_v62 = vpop.f32.mrf.mxu3  ;;  %643 = vst.msk [vmem:[%s1225_s23 + $0x28] sm:$0xff] %vm621_vm2, %v593_v61  ;;  %v792_v37 = vmul.f32 %v593_v61, %v593_v61  ;;  %v758_v41 = vsel %vm621_vm2, %v593_v61, 0.0  ;;  %v811_v61 = vadd.f32 %v810_v40, %v809_v46  ;;  %v663_v28 = vadd.f32 %v662_v7, %v661_v14 }
  0xb8   : > { %650 = vst.msk [vmem:[%s1225_s23 + $0x60] sm:$0xff] %vm621_vm2, %v1294_v62  ;;  %v759_v63 = vadd.f32 %v758_v41, %v757_v48  ;;  %v717_v15 = vsel %vm621_vm2, %v698_v53, 0.0  ;;  %v704_v40 = vmul.f32 %v1266_v51, %v1266_v51  ;;  %v824_v51 = vsel %vm621_vm2, %v798_v36, 0.0 }
  0xb9   : > { %v812_v56 = vsel %vm621_vm2, %v792_v37, 0.0  ;;  %v718_v35 = vadd.f32 %v717_v15, %v716_v25  ;;  %v772_v0 = vsel %vm621_vm2, %v1294_v62, 0.0 }
  0xba   : > { %v813_v52 = vadd.f32 %v812_v56, %v811_v61  ;;  %v770_v56 = vsel %vm621_vm2, %v1276_v54, 0.0 }
  0xbc   : > { %v1322_v18 = vpop.f32.mrf.mxu2 }
  0xbd   : > { %634 = vst.msk [vmem:[%s1233_s26 + $0x60] sm:$0xff] %vm621_vm2, %v1322_v18  ;;  %v492_v27 = vpop.f32.mrf.mxu0  ;;  %v706_v14 = vmul.f32 %v1322_v18, %v1322_v18 }
  0xbe   : > { %627 = vst.msk [vmem:[%s1233_s26 + $0x28] sm:$0xff] %vm621_vm2, %v492_v27  ;;  %v596_v32 = vpop.f32.mrf.mxu1  ;;  %v699_v8 = vmul.f32 %v492_v27, %v492_v27  ;;  %v664_v19 = vsel %vm621_vm2, %v492_v27, 0.0 }
  0xbf   : > { %v1342_v33 = vpop.f32.mrf.mxu3  ;;  %644 = vst.msk [vmem:[%s1225_s23 + $0x30] sm:$0xff] %vm621_vm2, %v596_v32  ;;  %v793_v42 = vmul.f32 %v596_v32, %v596_v32  ;;  %v760_v57 = vsel %vm621_vm2, %v596_v32, 0.0  ;;  %v665_v37 = vadd.f32 %v664_v19, %v663_v28 }
  0xc0   : > { %651 = vst.msk [vmem:[%s1225_s23 + $0x68] sm:$0xff] %vm621_vm2, %v1342_v33  ;;  %v761_v10 = vadd.f32 %v760_v57, %v759_v63  ;;  %v719_v30 = vsel %vm621_vm2, %v699_v8, 0.0  ;;  %v800_v47 = vmul.f32 %v1342_v33, %v1342_v33  ;;  %v774_v8 = vsel %vm621_vm2, %v1342_v33, 0.0 }
  0xc1   : > { %v814_v3 = vsel %vm621_vm2, %v793_v42, 0.0  ;;  %v720_v41 = vadd.f32 %v719_v30, %v718_v35  ;;  %v799_v42 = vmul.f32 %v1294_v62, %v1294_v62 }
  0xc2   : > { %v815_v22 = vadd.f32 %v814_v3, %v813_v52  ;;  %v705_v3 = vmul.f32 %v1283_v55, %v1283_v55  ;;  %v828_v15 = vsel %vm621_vm2, %v800_v47, 0.0 }
  0xc4   : > { %v1388_v59 = vpop.f32.mrf.mxu2  ;;  %v731_v30 = vsel %vm621_vm2, %v705_v3, 0.0 }
  0xc5   : > { %635 = vst.msk [vmem:[%s1233_s26 + $0x68] sm:$0xff] %vm621_vm2, %v1388_v59  ;;  %v495_v4 = vpop.f32.mrf.mxu0  ;;  %v707_v25 = vmul.f32 %v1388_v59, %v1388_v59  ;;  %v680_v36 = vsel %vm621_vm2, %v1388_v59, 0.0 }
  0xc6   : > { %628 = vst.msk [vmem:[%s1233_s26 + $0x30] sm:$0xff] %vm621_vm2, %v495_v4  ;;  %v598_v11 = vpop.f32.mrf.mxu1  ;;  %v700_v58 = vmul.f32 %v495_v4, %v495_v4  ;;  %v666_v31 = vsel %vm621_vm2, %v495_v4, 0.0  ;;  %v826_v4 = vsel %vm621_vm2, %v799_v42, 0.0 }
  0xc7   : > { %v616_v12 = vpop.f32.mrf.mxu3  ;;  %645 = vst.msk [vmem:[%s1225_s23 + $0x38] sm:$0xff] %vm621_vm2, %v598_v11  ;;  %v762_v16 = vsel %vm621_vm2, %v598_v11, 0.0  ;;  %v794_v17 = vmul.f32 %v598_v11, %v598_v11  ;;  %v667_v43 = vadd.f32 %v666_v31, %v665_v37 }
  0xc8   : > { %v763_v23 = vadd.f32 %v762_v16, %v761_v10  ;;  %652 = vst.msk [vmem:[%s1225_s23 + $0x70] sm:$0xff] %vm621_vm2, %v616_v12  ;;  %v721_v39 = vsel %vm621_vm2, %v700_v58, 0.0  ;;  %v801_v2 = vmul.f32 %v616_v12, %v616_v12  ;;  %v776_v62 = vsel %vm621_vm2, %v616_v12, 0.0 }
  0xc9   : > { %v816_v29 = vsel %vm621_vm2, %v794_v17, 0.0  ;;  %v722_v57 = vadd.f32 %v721_v39, %v720_v41  ;;  %v676_v12 = vsel %vm621_vm2, %v1283_v55, 0.0 }
  0xca   : > { %v765_v32 = vadd.f32 %v1312_v9, %v763_v23  ;;  %v817_v27 = vadd.f32 %v816_v29, %v815_v22  ;;  %v830_v33 = vsel %vm621_vm2, %v801_v2, 0.0 }
  0xcc   : > { %v1419_v50 = vpop.f32.mrf.mxu2  ;;  %v767_v6 = vadd.f32 %v1335_v24, %v765_v32  ;;  %v819_v9 = vadd.f32 %v1317_v13, %v817_v27  ;;  %v733_v27 = vsel %vm621_vm2, %v706_v14, 0.0 }
  0xcd   : > { %636 = vst.msk [vmem:[%s1233_s26 + $0x70] sm:$0xff] %vm621_vm2, %v1419_v50  ;;  %v497_v44 = vpop.f32.mrf.mxu0  ;;  %v708_v37 = vmul.f32 %v1419_v50, %v1419_v50 }
  0xce   : > { %v769_v46 = vadd.f32 %v768_v26, %v767_v6  ;;  %v821_v48 = vadd.f32 %v1363_v38, %v819_v9  ;;  %629 = vst.msk [vmem:[%s1233_s26 + $0x38] sm:$0xff] %vm621_vm2, %v497_v44  ;;  %v668_v13 = vsel %vm621_vm2, %v497_v44, 0.0  ;;  %v701_v24 = vmul.f32 %v497_v44, %v497_v44 }
  0xcf   : > { %v618_v53 = vpop.f32.mrf.mxu3  ;;  %v669_v60 = vadd.f32 %v668_v13, %v667_v43  ;;  %v735_v6 = vsel %vm621_vm2, %v707_v25, 0.0 }
  0xd0   : > { %653 = vst.msk [vmem:[%s1225_s23 + $0x78] sm:$0xff] %vm621_vm2, %v618_v53  ;;  %v823_v61 = vadd.f32 %v822_v34, %v821_v48  ;;  %v723_v38 = vsel %vm621_vm2, %v701_v24, 0.0  ;;  %v771_v63 = vadd.f32 %v770_v56, %v769_v46  ;;  %v778_v29 = vsel %vm621_vm2, %v618_v53, 0.0 }
  0xd1   : > { %v671_v1 = vadd.f32 %v1325_v20, %v669_v60  ;;  %v724_v54 = vadd.f32 %v723_v38, %v722_v57  ;;  %v737_v48 = vsel %vm621_vm2, %v708_v37, 0.0 }
  0xd2   : > { %v773_v7 = vadd.f32 %v772_v0, %v771_v63  ;;  %v825_v52 = vadd.f32 %v824_v51, %v823_v61 }
  0xd3   : > { %v673_v10 = vadd.f32 %v1377_v45, %v671_v1  ;;  %v726_v11 = vadd.f32 %v1328_v21, %v724_v54  ;;  %v802_v45 = vmul.f32 %v618_v53, %v618_v53  ;;  %v729_v21 = vsel %vm621_vm2, %v704_v40, 0.0 }
  0xd4   : > { %v517_v20 = vpop.f32.mrf.mxu2  ;;  %v775_v16 = vadd.f32 %v774_v8, %v773_v7  ;;  %v827_v17 = vadd.f32 %v826_v4, %v825_v52  ;;  %v682_v40 = vsel %vm621_vm2, %v1419_v50, 0.0 }
  0xd5   : > { %637 = vst.msk [vmem:[%s1233_s26 + $0x78] sm:$0xff] %vm621_vm2, %v517_v20  ;;  %v675_v19 = vadd.f32 %v674_v5, %v673_v10  ;;  %v728_v22 = vadd.f32 %v1382_v49, %v726_v11  ;;  %v678_v49 = vsel %vm621_vm2, %v1322_v18, 0.0  ;;  %v832_v35 = vsel %vm621_vm2, %v802_v45, 0.0 }
  0xd6   : > { %v777_v58 = vadd.f32 %v776_v62, %v775_v16  ;;  %v829_v23 = vadd.f32 %v828_v15, %v827_v17  ;;  %v709_v41 = vmul.f32 %v517_v20, %v517_v20  ;;  %v684_v59 = vsel %vm621_vm2, %v517_v20, 0.0 }
  0xd7   : > { %v730_v26 = vadd.f32 %v729_v21, %v728_v22  ;;  %v677_v28 = vadd.f32 %v676_v12, %v675_v19 }
  0xd8   : > { %v831_v31 = vadd.f32 %v830_v33, %v829_v23  ;;  %v779_v32 = vadd.f32 %v778_v29, %v777_v58  ;;  %v739_v51 = vsel %vm621_vm2, %v709_v41, 0.0 }
  0xd9   : > { %v679_v34 = vadd.f32 %v678_v49, %v677_v28  ;;  %v732_v55 = vadd.f32 %v731_v30, %v730_v26 }
  0xda   : > { %v780_v5 = vrot.slane %v779_v32, 4  ;;  %v833_v39 = vadd.f32 %v832_v35, %v831_v31 }
  0xdb   : > { %v681_v9 = vadd.f32 %v680_v36, %v679_v34  ;;  %v734_v18 = vadd.f32 %v733_v27, %v732_v55 }
  0xdc   : > { %v781_v42 = vadd.f32 %v780_v5, %v779_v32  ;;  %v834_v43 = vrot.slane %v833_v39, 4 }
  0xdd   : > { %v683_v44 = vadd.f32 %v682_v40, %v681_v9  ;;  %v736_v46 = vadd.f32 %v735_v6, %v734_v18 }
  0xde   : > { %v782_v13 = vrot.slane %v781_v42, 2  ;;  %v835_v24 = vadd.f32 %v834_v43, %v833_v39 }
  0xdf   : > { %v738_v53 = vadd.f32 %v737_v48, %v736_v46  ;;  %v685_v56 = vadd.f32 %v684_v59, %v683_v44 }
  0xe0   : > { %v783_v57 = vadd.f32 %v782_v13, %v781_v42  ;;  %v836_v60 = vrot.slane %v835_v24, 2 }
  0xe1   : > { %v686_v50 = vrot.slane %v685_v56, 4  ;;  %v740_v47 = vadd.f32 %v739_v51, %v738_v53 }
  0xe2   : > { %v784_v61 = vrot.slane %v783_v57, 1  ;;  %v837_v38 = vadd.f32 %v836_v60, %v835_v24 }
  0xe3   : > { %v687_v63 = vadd.f32 %v686_v50, %v685_v56  ;;  %v741_v0 = vrot.slane %v740_v47, 4 }
  0xe4   : > { %v785_v1 = vadd.f32 %v784_v61, %v783_v57  ;;  %v838_v54 = vrot.slane %v837_v38, 1 }
  0xe5   : > { %v688_v2 = vrot.slane %v687_v63, 2  ;;  %v742_v3 = vadd.f32 %v741_v0, %v740_v47 }
  0xe6   : > { %786 = vst.msk [vmem:[%s1358_s12] sm:$0x1] %vm692_vm3, %v785_v1  ;;  %v839_v4 = vadd.f32 %v838_v54, %v837_v38 }
  0xe7   : > { %v689_v7 = vadd.f32 %v688_v2, %v687_v63  ;;  %v743_v52 = vrot.slane %v742_v3, 2 }
  0xe8   : > { %840 = vst.msk [vmem:[%s1358_s12 + $0x1] sm:$0x1] %vm692_vm3, %v839_v4 }
  0xe9   : > { %v690_v8 = vrot.slane %v689_v7, 1  ;;  %v744_v10 = vadd.f32 %v743_v52, %v742_v3 }
  0xeb   : > { %v691_v11 = vadd.f32 %v690_v8, %v689_v7  ;;  %v745_v62 = vrot.slane %v744_v10, 1 }
  0xed   : > { %693 = vst.msk [vmem:[%s1347_s9] sm:$0x1] %vm692_vm3, %v691_v11  ;;  %v746_v20 = vadd.f32 %v745_v62, %v744_v10 }
  0xef   : > { %747 = vst.msk [vmem:[%s1347_s9 + $0x1] sm:$0x1] %vm692_vm3, %v746_v20 }
  0xf0 PF: > { %s19_s27 = sadd.s32 1, %s1055_s27  }
  0xf1   : > { %p16_p5 = scmp.ge.s32.totalorder %s19_s27, 6  }
  0xf3   :  { %18 = sbr.rel (!%p16_p5) target bundleno = 1 (0x1), region = 109 }

// kernel: bottleneck_forward.7
= control target key start
LH: loop header
LB: loop body
LE: loop exit
PB: predicated region body
PF: predicated region fallthrough
CT: control target
= control target key end

     0   :  { %s496_s15 = smov 0   ;;  %s669_s0 = inlined_call_operand.vmem [shape: f32[512,16], index: 0, kind: input, shape index: {}]   ;;  %s670_s1 = inlined_call_operand.vmem [shape: f32[512,16], index: 1, kind: input, shape index: {}]   ;;  %s671_s2 = inlined_call_operand.vmem [shape: f32[2,16], index: 2, kind: input, shape index: {}]   ;;  %s672_s3 = inlined_call_operand.vmem [shape: f32[2,16], index: 3, kind: input, shape index: {}]   ;;  %s673_s4 = inlined_call_operand.vmem [shape: f32[512,16], index: 4, kind: output, shape index: {}]  }
   0x1 LB: > { %s442_s16 = sadd.s32 4294967295, %s469_s15   ;;  %p446_p0 = scmp.ge.s32.totalorder %s469_s15, 1  ;;  %s469_s15 = sphi %s496_s15, %s14_s15  }
   0x2   : > { %p174_p1 = scmp.lt.s32.totalorder %s469_s15, 5 }
   0x4   : > { %p175_p2 = pnand %p446_p0, %p174_p1 }
   0x5   : > { %s447_s17 = sshll.u32 (!%p175_p2), %s442_s16, 4 }
   0x6   : > { %178 = sbr.rel (%p175_p2) target bundleno = 45 (0x2d), region = 36  ;;  %p206_p3 = scmp.lt.s32.totalorder (!%p175_p2), %s447_s17, 63 }
   0xb   : > { %v223_v0 = vld [vmem:[%s671_s2] sm:$0x3]  ;;  %s675_s17 = smov (!%p206_p3, %s447_s17), 63  ;;  %vm357_vm0 = vcmask 130048  }
   0xc   : > { %v224_v1 = vld [vmem:[%s672_s3] sm:$0x3]  ;;  %v510_v2 = vperm.slane %v223_v0, 0  ;;  %s514_s22 = sshll.u32 %s675_s17, 3  ;;  %v528_v4 = vperm.slane %v223_v0, 1 }
   0xd   : > { %v512_v3 = vperm.slane %v224_v1, 0  ;;  %s520_s25 = scalar_lea.vmem %s669_s0, %s514_s22  ;;  %s526_s28 = scalar_lea.vmem %s670_s1, %s514_s22  ;;  %v530_v5 = vperm.slane %v224_v1, 1 }
   0xe   : > { %v225_v6 = vld [vmem:[%s520_s25] sm:$0xff]  ;;  %v226_v8 = vld [vmem:[%s520_s25 + $0x8] sm:$0xff]  ;;  %v227_v13 = vld [vmem:[%s520_s25 + $0x10] sm:$0xff]  ;;  %s565_s5 = scalar_lea.vmem %s673_s4, %s514_s22 }
   0xf   : > { %v275_v7 = vld [vmem:[%s526_s28] sm:$0xff]  ;;  %v242_v9 = vmul.f32 %v510_v2, %v225_v6  ;;  %v243_v11 = vmul.f32 %v510_v2, %v226_v8  ;;  %v276_v12 = vld [vmem:[%s526_s28 + $0x8] sm:$0xff]  ;;  %v277_v14 = vld [vmem:[%s526_s28 + $0x10] sm:$0xff]  ;;  %v244_v16 = vmul.f32 %v510_v2, %v227_v13 }
  0x10   : > { %v292_v10 = vmul.f32 %v512_v3, %v275_v7  ;;  %v293_v15 = vmul.f32 %v512_v3, %v276_v12  ;;  %v294_v17 = vmul.f32 %v512_v3, %v277_v14  ;;  %v228_v18 = vld [vmem:[%s520_s25 + $0x18] sm:$0xff]  ;;  %v229_v20 = vld [vmem:[%s520_s25 + $0x20] sm:$0xff]  ;;  %v230_v26 = vld [vmem:[%s520_s25 + $0x28] sm:$0xff] }
  0x11   : > { %v278_v19 = vld [vmem:[%s526_s28 + $0x18] sm:$0xff]  ;;  %v259_v21 = vadd.f32 %v528_v4, %v242_v9  ;;  %v260_v23 = vadd.f32 %v528_v4, %v243_v11  ;;  %v245_v24 = vmul.f32 %v510_v2, %v228_v18  ;;  %v279_v25 = vld [vmem:[%s526_s28 + $0x20] sm:$0xff]  ;;  %v261_v28 = vadd.f32 %v528_v4, %v244_v16  ;;  %v280_v31 = vld [vmem:[%s526_s28 + $0x28] sm:$0xff] }
  0x12   : > { %v309_v22 = vadd.f32 %v530_v5, %v292_v10  ;;  %v310_v27 = vadd.f32 %v530_v5, %v293_v15  ;;  %v311_v29 = vadd.f32 %v530_v5, %v294_v17  ;;  %v295_v30 = vmul.f32 %v512_v3, %v278_v19  ;;  %v231_v40 = vld [vmem:[%s520_s25 + $0x30] sm:$0xff]  ;;  %v232_v46 = vld [vmem:[%s520_s25 + $0x38] sm:$0xff]  ;;  %v233_v48 = vld [vmem:[%s520_s25 + $0x40] sm:$0xff] }
  0x13   : > { %v262_v33 = vadd.f32 %v528_v4, %v245_v24  ;;  %v246_v34 = vmul.f32 %v510_v2, %v229_v20  ;;  %v296_v35 = vmul.f32 %v512_v3, %v279_v25  ;;  %v247_v39 = vmul.f32 %v510_v2, %v230_v26  ;;  %v281_v41 = vld [vmem:[%s526_s28 + $0x30] sm:$0xff]  ;;  %v282_v47 = vld [vmem:[%s526_s28 + $0x38] sm:$0xff]  ;;  %v283_v57 = vld [vmem:[%s526_s28 + $0x40] sm:$0xff] }
  0x14   : > { %v325_v32 = vadd.f32 %v309_v22, %v259_v21  ;;  %v326_v36 = vadd.f32 %v310_v27, %v260_v23  ;;  %v327_v37 = vadd.f32 %v311_v29, %v261_v28  ;;  %v312_v38 = vadd.f32 %v530_v5, %v295_v30  ;;  %v234_v62 = vld [vmem:[%s520_s25 + $0x48] sm:$0xff]  ;;  %v235_v8 = vld [vmem:[%s520_s25 + $0x50] sm:$0xff]  ;;  %v236_v14 = vld [vmem:[%s520_s25 + $0x58] sm:$0xff] }
  0x15   : > { %v263_v43 = vadd.f32 %v528_v4, %v246_v34  ;;  %v313_v44 = vadd.f32 %v530_v5, %v296_v35  ;;  %v297_v45 = vmul.f32 %v512_v3, %v280_v31  ;;  %v264_v52 = vadd.f32 %v528_v4, %v247_v39  ;;  %v284_v63 = vld [vmem:[%s526_s28 + $0x48] sm:$0xff]  ;;  %v285_v9 = vld [vmem:[%s526_s28 + $0x50] sm:$0xff]  ;;  %v286_v23 = vld [vmem:[%s526_s28 + $0x58] sm:$0xff] }
  0x16   : > { %v341_v42 = vmax.f32 %v325_v32, 0.0  ;;  %v342_v49 = vmax.f32 %v326_v36, 0.0  ;;  %v343_v50 = vmax.f32 %v327_v37, 0.0  ;;  %v328_v51 = vadd.f32 %v312_v38, %v262_v33  ;;  %v237_v24 = vld [vmem:[%s520_s25 + $0x60] sm:$0xff]  ;;  %v238_v30 = vld [vmem:[%s520_s25 + $0x68] sm:$0xff] }
  0x17   : > { %v329_v53 = vadd.f32 %v313_v44, %v263_v43  ;;  %v314_v54 = vadd.f32 %v530_v5, %v297_v45  ;;  %v248_v55 = vmul.f32 %v510_v2, %v231_v40  ;;  %v298_v56 = vmul.f32 %v512_v3, %v281_v41  ;;  %v287_v29 = vld [vmem:[%s526_s28 + $0x60] sm:$0xff]  ;;  %v288_v35 = vld [vmem:[%s526_s28 + $0x68] sm:$0xff]  ;;  %v239_v40 = vld [vmem:[%s520_s25 + $0x70] sm:$0xff] }
  0x18   : > { %358 = vst.msk [vmem:[%s565_s5] sm:$0xff] %vm357_vm0, %v341_v42  ;;  %v344_v58 = vmax.f32 %v328_v51, 0.0  ;;  %v249_v59 = vmul.f32 %v510_v2, %v232_v46  ;;  %v299_v60 = vmul.f32 %v512_v3, %v282_v47  ;;  %v250_v61 = vmul.f32 %v510_v2, %v233_v48  ;;  %v289_v45 = vld [vmem:[%s526_s28 + $0x70] sm:$0xff]  ;;  %v240_v46 = vld [vmem:[%s520_s25 + $0x78] sm:$0xff] }
  0x19   : > { %359 = vst.msk [vmem:[%s565_s5 + $0x8] sm:$0xff] %vm357_vm0, %v342_v49  ;;  %v345_v0 = vmax.f32 %v329_v53, 0.0  ;;  %v330_v1 = vadd.f32 %v314_v54, %v264_v52  ;;  %v265_v6 = vadd.f32 %v528_v4, %v248_v55  ;;  %v315_v7 = vadd.f32 %v530_v5, %v298_v56  ;;  %v290_v51 = vld [vmem:[%s526_s28 + $0x78] sm:$0xff] }
  0x1a   : > { %360 = vst.msk [vmem:[%s565_s5 + $0x10] sm:$0xff] %vm357_vm0, %v343_v50  ;;  %v266_v10 = vadd.f32 %v528_v4, %v249_v59  ;;  %v316_v11 = vadd.f32 %v530_v5, %v299_v60  ;;  %v267_v12 = vadd.f32 %v528_v4, %v250_v61  ;;  %v300_v13 = vmul.f32 %v512_v3, %v283_v57 }
  0x1b   : > { %361 = vst.msk [vmem:[%s565_s5 + $0x18] sm:$0xff] %vm357_vm0, %v344_v58  ;;  %v346_v15 = vmax.f32 %v330_v1, 0.0  ;;  %v331_v16 = vadd.f32 %v315_v7, %v265_v6  ;;  %v251_v17 = vmul.f32 %v510_v2, %v234_v62  ;;  %v301_v18 = vmul.f32 %v512_v3, %v284_v63 }
  0x1c   : > { %362 = vst.msk [vmem:[%s565_s5 + $0x20] sm:$0xff] %vm357_vm0, %v345_v0  ;;  %v332_v19 = vadd.f32 %v316_v11, %v266_v10  ;;  %v317_v20 = vadd.f32 %v530_v5, %v300_v13  ;;  %v252_v21 = vmul.f32 %v510_v2, %v235_v8  ;;  %v302_v22 = vmul.f32 %v512_v3, %v285_v9 }
  0x1d   : > { %363 = vst.msk [vmem:[%s565_s5 + $0x28] sm:$0xff] %vm357_vm0, %v346_v15  ;;  %v347_v25 = vmax.f32 %v331_v16, 0.0  ;;  %v268_v26 = vadd.f32 %v528_v4, %v251_v17  ;;  %v318_v27 = vadd.f32 %v530_v5, %v301_v18  ;;  %v253_v28 = vmul.f32 %v510_v2, %v236_v14 }
  0x1e   : > { %v348_v31 = vmax.f32 %v332_v19, 0.0  ;;  %v333_v32 = vadd.f32 %v317_v20, %v267_v12  ;;  %v269_v33 = vadd.f32 %v528_v4, %v252_v21  ;;  %v319_v34 = vadd.f32 %v530_v5, %v302_v22 }
  0x1f   : > { %364 = vst.msk [vmem:[%s565_s5 + $0x30] sm:$0xff] %vm357_vm0, %v347_v25  ;;  %v334_v36 = vadd.f32 %v318_v27, %v268_v26  ;;  %v270_v37 = vadd.f32 %v528_v4, %v253_v28  ;;  %v303_v38 = vmul.f32 %v512_v3, %v286_v23  ;;  %v254_v39 = vmul.f32 %v510_v2, %v237_v24 }
  0x20   : > { %365 = vst.msk [vmem:[%s565_s5 + $0x38] sm:$0xff] %vm357_vm0, %v348_v31  ;;  %v349_v41 = vmax.f32 %v333_v32, 0.0  ;;  %v335_v42 = vadd.f32 %v319_v34, %v269_v33  ;;  %v304_v43 = vmul.f32 %v512_v3, %v287_v29  ;;  %v255_v44 = vmul.f32 %v510_v2, %v238_v30 }
  0x21   : > { %v350_v47 = vmax.f32 %v334_v36, 0.0  ;;  %v320_v48 = vadd.f32 %v530_v5, %v303_v38  ;;  %v271_v49 = vadd.f32 %v528_v4, %v254_v39  ;;  %v305_v50 = vmul.f32 %v512_v3, %v288_v35 }
  0x22   : > { %366 = vst.msk [vmem:[%s565_s5 + $0x40] sm:$0xff] %vm357_vm0, %v349_v41  ;;  %v351_v52 = vmax.f32 %v335_v42, 0.0  ;;  %v321_v53 = vadd.f32 %v530_v5, %v304_v43  ;;  %v272_v54 = vadd.f32 %v528_v4, %v255_v44  ;;  %v256_v55 = vmul.f32 %v510_v2, %v239_v40 }
  0x23   : > { %367 = vst.msk [vmem:[%s565_s5 + $0x48] sm:$0xff] %vm357_vm0, %v350_v47  ;;  %v336_v56 = vadd.f32 %v320_v48, %v270_v37  ;;  %v322_v57 = vadd.f32 %v530_v5, %v305_v50  ;;  %v306_v58 = vmul.f32 %v512_v3, %v289_v45  ;;  %v257_v59 = vmul.f32 %v510_v2, %v240_v46 }
  0x24   : > { %368 = vst.msk [vmem:[%s565_s5 + $0x50] sm:$0xff] %vm357_vm0, %v351_v52  ;;  %v337_v60 = vadd.f32 %v321_v53, %v271_v49  ;;  %v273_v61 = vadd.f32 %v528_v4, %v256_v55  ;;  %v307_v62 = vmul.f32 %v512_v3, %v290_v51 }
  0x25   : > { %v352_v63 = vmax.f32 %v336_v56, 0.0  ;;  %v338_v0 = vadd.f32 %v322_v57, %v272_v54  ;;  %v323_v1 = vadd.f32 %v530_v5, %v306_v58  ;;  %v274_v6 = vadd.f32 %v528_v4, %v257_v59 }
  0x26   : > { %v353_v7 = vmax.f32 %v337_v60, 0.0  ;;  %v324_v8 = vadd.f32 %v530_v5, %v307_v62 }
  0x27   : > { %369 = vst.msk [vmem:[%s565_s5 + $0x58] sm:$0xff] %vm357_vm0, %v352_v63  ;;  %v354_v2 = vmax.f32 %v338_v0, 0.0  ;;  %v339_v9 = vadd.f32 %v323_v1, %v273_v61 }
  0x28   : > { %370 = vst.msk [vmem:[%s565_s5 + $0x60] sm:$0xff] %vm357_vm0, %v353_v7  ;;  %v340_v10 = vadd.f32 %v324_v8, %v274_v6 }
  0x29   : > { %371 = vst.msk [vmem:[%s565_s5 + $0x68] sm:$0xff] %vm357_vm0, %v354_v2  ;;  %v355_v3 = vmax.f32 %v339_v9, 0.0 }
  0x2a   : > { %v356_v11 = vmax.f32 %v340_v10, 0.0 }
  0x2b   : > { %372 = vst.msk [vmem:[%s565_s5 + $0x70] sm:$0xff] %vm357_vm0, %v355_v3 }
  0x2c   : > { %373 = vst.msk [vmem:[%s565_s5 + $0x78] sm:$0xff] %vm357_vm0, %v356_v11 }
  0x2d PF: > { %s14_s15 = sadd.s32 1, %s469_s15  }
  0x2e   : > { %p11_p4 = scmp.ge.s32.totalorder %s14_s15, 6  }
  0x30   :  { %13 = sbr.rel (!%p11_p4) target bundleno = 1 (0x1), region = 69 }

// kernel: bottleneck_forward.5
= control target key start
LH: loop header
LB: loop body
LE: loop exit
PB: predicated region body
PF: predicated region fallthrough
CT: control target
= control target key end

     0   :  { %s2869_s15 = smov 0   ;;  %s3840_s0 = inlined_call_operand.vmem [shape: f32[2,4], index: 0, kind: input, shape index: {}]   ;;  %s3841_s1 = inlined_call_operand.vmem [shape: f32[2,16,16,4], index: 1, kind: input, shape index: {}]   ;;  %s3842_s2 = inlined_call_operand.vmem [shape: bf16[9,4,4], index: 2, kind: input, shape index: {}]   ;;  %s3843_s3 = inlined_call_operand.vmem [shape: f32[2,16,16,4], index: 3, kind: output, shape index: {0}]   ;;  %s3844_s4 = inlined_call_operand.vmem [shape: f32[16,4], index: 4, kind: output, shape index: {1}]  }
   0x1 LB: > { %s2657_s16 = sadd.s32 4294967295, %s2841_s15   ;;  %p2661_p0 = scmp.ge.s32.totalorder %s2841_s15, 1  ;;  %s2841_s15 = sphi %s2869_s15, %s15_s15  }
   0x2   : > { %p165_p1 = scmp.lt.s32.totalorder %s2841_s15, 3 }
   0x4   : > { %p166_p2 = pnand %p2661_p0, %p165_p1 }
   0x6   : > { %169 = sbr.rel (%p166_p2) target bundleno = 805 (0x325), region = 32 }
   0xb   : > { %v2667_v0 = vld [vmem:[%s3842_s2 + $0x2] sm:$0x3]  ;;  %vm577_vm0 = vcmask 1041408   ;;  %p195_p3 = scmp.lt.s32.totalorder %s2657_s16, 1  ;;  %v210_v1 = vld [vmem:[%s3840_s0] sm:$0x3] }
   0xc   : > { %v579_v2 = vsel %vm577_vm0, %v2667_v0, 0  ;;  %vm341_vm1 = vcmask 31744   ;;  %vm344_vm2 = vcmask 25600   ;;  %v2886_v3 = vperm.slane %v210_v1, 0  ;;  %v2700_v19 = vld [vmem:[%s3842_s2 + $0x4] sm:$0x3] }
   0xd   : > { %2823 = vmatpush.bf16.msra.mxu1 %v579_v2  ;;  %2824 = vmatpush.bf16.msra.mxu2 %v579_v2  ;;  %s3893_s16 = smov (!%p195_p3, %s2657_s16), 1  ;;  %v3845_v4 = vmov 0.0   ;;  %v2900_v5 = vperm.slane %v210_v1, 1  ;;  %v2717_v21 = vld [vmem:[%s3842_s2 + $0x6] sm:$0x3]  ;;  %v909_v22 = vsel %vm577_vm0, %v2700_v19, 0 }
   0xe   : > { %2825 = vmatpush.bf16.msra.mxu3 %v579_v2  ;;  %588 = vmatpush.bf16.msra.mxu0 %v579_v2  ;;  %355 = vst.msk [vmem:[#allocation2 + $0x60] sm:$0xff] %vm341_vm1, %v3845_v4  ;;  %s2821_s21 = sshll.u32 %s3893_s16, 8  ;;  %v1131_v23 = vsel %vm577_vm0, %v2717_v21, 0  ;;  %v478_v24 = vld [vmem:[%s3842_s2] sm:$0x3]  ;;  %s2666_s20 = sshll.u32 %s3893_s16, 3 }
   0xf   : > { %356 = vst.msk [vmem:[#allocation2 + $0x68] sm:$0xff] %vm341_vm1, %v3845_v4  ;;  %s2898_s24 = scalar_lea.vmem %s3841_s1, %s2821_s21  ;;  %v719_v25 = vsel %vm577_vm0, %v478_v24, 0  ;;  %v2734_v26 = vld [vmem:[%s3842_s2 + $0x8] sm:$0x3]  ;;  %s3629_s19 = scalar_lea.vmem %s3843_s3, %s2821_s21  ;;  %vm2467_vm3 = vcmask 24576  }
  0x10   : > { %357 = vst.msk [vmem:[#allocation2 + $0x70] sm:$0x3] %vm344_vm2, %v3845_v4  ;;  %v217_v6 = vld [vmem:[%s2898_s24 + $0x30] sm:$0xff]  ;;  %v218_v7 = vld [vmem:[%s2898_s24 + $0x38] sm:$0xff]  ;;  %v1353_v27 = vsel %vm577_vm0, %v2734_v26, 0  ;;  %v219_v34 = vld [vmem:[%s2898_s24 + $0x40] sm:$0xff]  ;;  %s3746_s23 = scalar_lea.vmem %s3844_s4, %s2666_s20 }
  0x11   : > { %342 = vst.msk [vmem:[#allocation2] sm:$0xff] %vm341_vm1, %v3845_v4  ;;  %v250_v8 = vmul.f32 %v2886_v3, %v217_v6  ;;  %v251_v9 = vmul.f32 %v2886_v3, %v218_v7  ;;  %918 = vmatpush.bf16.msrb.mxu2 %v909_v22  ;;  %728 = vmatpush.bf16.msrb.mxu1 %v719_v25  ;;  %v225_v28 = vld [vmem:[%s2898_s24 + $0x70] sm:$0xff]  ;;  %v226_v29 = vld [vmem:[%s2898_s24 + $0x78] sm:$0xff]  ;;  %v220_v36 = vld [vmem:[%s2898_s24 + $0x48] sm:$0xff] }
  0x12   : > { %343 = vst.msk [vmem:[#allocation2 + $0x8] sm:$0xff] %vm341_vm1, %v3845_v4  ;;  %1140 = vmatpush.bf16.msrb.mxu3 %v1131_v23  ;;  %1362 = vmatpush.bf16.msrb.mxu0 %v1353_v27  ;;  %v233_v30 = vld [vmem:[%s2898_s24 + $0xb0] sm:$0xff]  ;;  %v258_v31 = vmul.f32 %v2886_v3, %v225_v28  ;;  %v234_v32 = vld [vmem:[%s2898_s24 + $0xb8] sm:$0xff]  ;;  %v259_v33 = vmul.f32 %v2886_v3, %v226_v29  ;;  %v227_v38 = vld [vmem:[%s2898_s24 + $0x80] sm:$0xff] }
  0x13   : > { %345 = vst.msk [vmem:[#allocation2 + $0x10] sm:$0x3] %vm344_vm2, %v3845_v4  ;;  %v283_v10 = vadd.f32 %v2900_v5, %v250_v8  ;;  %v284_v11 = vadd.f32 %v2900_v5, %v251_v9  ;;  %v266_v35 = vmul.f32 %v2886_v3, %v233_v30  ;;  %v267_v37 = vmul.f32 %v2886_v3, %v234_v32  ;;  %v228_v41 = vld [vmem:[%s2898_s24 + $0x88] sm:$0xff]  ;;  %v235_v44 = vld [vmem:[%s2898_s24 + $0xc0] sm:$0xff]  ;;  %v221_v58 = vld [vmem:[%s2898_s24 + $0x50] sm:$0xff] }
  0x14   : > { %346 = vst.msk [vmem:[#allocation2 + $0x18] sm:$0xff] %vm341_vm1, %v3845_v4  ;;  %v291_v39 = vadd.f32 %v2900_v5, %v258_v31  ;;  %v252_v40 = vmul.f32 %v2886_v3, %v219_v34  ;;  %v292_v42 = vadd.f32 %v2900_v5, %v259_v33  ;;  %v253_v43 = vmul.f32 %v2886_v3, %v220_v36  ;;  %v236_v47 = vld [vmem:[%s2898_s24 + $0xc8] sm:$0xff]  ;;  %v211_v50 = vld [vmem:[%s2898_s24] sm:$0xff]  ;;  %v222_v62 = vld [vmem:[%s2898_s24 + $0x58] sm:$0xff] }
  0x15   : > { %347 = vst.msk [vmem:[#allocation2 + $0x20] sm:$0xff] %vm341_vm1, %v3845_v4  ;;  %v315_v12 = vmax.f32 %v283_v10, 0.0  ;;  %v316_v13 = vmax.f32 %v284_v11, 0.0  ;;  %v299_v45 = vadd.f32 %v2900_v5, %v266_v35  ;;  %v260_v46 = vmul.f32 %v2886_v3, %v227_v38  ;;  %v212_v54 = vld [vmem:[%s2898_s24 + $0x8] sm:$0xff]  ;;  %v229_v2 = vld [vmem:[%s2898_s24 + $0x90] sm:$0xff]  ;;  %v230_v9 = vld [vmem:[%s2898_s24 + $0x98] sm:$0xff] }
  0x16   : > { %348 = vst.msk [vmem:[#allocation2 + $0x28] sm:$0x3] %vm344_vm2, %v3845_v4  ;;  %v300_v48 = vadd.f32 %v2900_v5, %v267_v37  ;;  %v261_v49 = vmul.f32 %v2886_v3, %v228_v41  ;;  %v323_v51 = vmax.f32 %v291_v39, 0.0  ;;  %v285_v52 = vadd.f32 %v2900_v5, %v252_v40  ;;  %v213_v22 = vld [vmem:[%s2898_s24 + $0x10] sm:$0xff]  ;;  %v214_v26 = vld [vmem:[%s2898_s24 + $0x18] sm:$0xff] }
  0x17   : > { %349 = vst.msk [vmem:[#allocation2 + $0x30] sm:$0xff] %vm341_vm1, %v3845_v4  ;;  %v268_v53 = vmul.f32 %v2886_v3, %v235_v44  ;;  %v324_v55 = vmax.f32 %v292_v42, 0.0  ;;  %v286_v56 = vadd.f32 %v2900_v5, %v253_v43  ;;  %v269_v57 = vmul.f32 %v2886_v3, %v236_v47 }
  0x18   : > { %404 = vst.msk [vmem:[#allocation2 + $0x61] sm:$0xff] %vm341_vm1, %v315_v12  ;;  %v331_v59 = vmax.f32 %v299_v45, 0.0  ;;  %v293_v60 = vadd.f32 %v2900_v5, %v260_v46  ;;  %v244_v61 = vmul.f32 %v2886_v3, %v211_v50  ;;  %v332_v63 = vmax.f32 %v300_v48, 0.0 }
  0x19   : > { %405 = vst.msk [vmem:[#allocation2 + $0x69] sm:$0xff] %vm341_vm1, %v316_v13  ;;  %v479_v17 = vld [vmem:[#allocation2 + $0x1] sm:$0xff]  ;;  %v294_v0 = vadd.f32 %v2900_v5, %v261_v49  ;;  %v245_v1 = vmul.f32 %v2886_v3, %v212_v54  ;;  %v317_v6 = vmax.f32 %v285_v52, 0.0  ;;  %v301_v7 = vadd.f32 %v2900_v5, %v268_v53  ;;  %v237_v13 = vld [vmem:[%s2898_s24 + $0xd0] sm:$0xff] }
  0x1a   : > { %350 = vst.msk [vmem:[#allocation2 + $0x38] sm:$0xff] %vm341_vm1, %v3845_v4  ;;  %v480_v18 = vld [vmem:[#allocation2 + $0x9] sm:$0xff]  ;;  %v254_v8 = vmul.f32 %v2886_v3, %v221_v58  ;;  %v318_v10 = vmax.f32 %v286_v56, 0.0  ;;  %v302_v11 = vadd.f32 %v2900_v5, %v269_v57  ;;  %v255_v12 = vmul.f32 %v2886_v3, %v222_v62  ;;  %v223_v53 = vld [vmem:[%s2898_s24 + $0x60] sm:$0xff] }
  0x1b   : > { %351 = vst.msk [vmem:[#allocation2 + $0x40] sm:$0x3] %vm344_vm2, %v3845_v4  ;;  %v511_v20 = vpack.c.bf16 %v480_v18, %v479_v17  ;;  %v262_v17 = vmul.f32 %v2886_v3, %v229_v2  ;;  %v238_v18 = vld [vmem:[%s2898_s24 + $0xd8] sm:$0xff]  ;;  %v326_v19 = vmax.f32 %v294_v0, 0.0  ;;  %v263_v21 = vmul.f32 %v2886_v3, %v230_v9  ;;  %v224_v54 = vld [vmem:[%s2898_s24 + $0x68] sm:$0xff]  ;;  %v239_v0 = vld [vmem:[%s2898_s24 + $0xe0] sm:$0xff] }
  0x1c   : > { %352 = vst.msk [vmem:[#allocation2 + $0x48] sm:$0xff] %vm341_vm1, %v3845_v4  ;;  %v333_v23 = vmax.f32 %v301_v7, 0.0  ;;  %v287_v24 = vadd.f32 %v2900_v5, %v254_v8  ;;  %v270_v25 = vmul.f32 %v2886_v3, %v237_v13  ;;  %v334_v27 = vmax.f32 %v302_v11, 0.0  ;;  %v215_v8 = vld [vmem:[%s2898_s24 + $0x20] sm:$0xff]  ;;  %v216_v13 = vld [vmem:[%s2898_s24 + $0x28] sm:$0xff] }
  0x1d   : > { %353 = vst.msk [vmem:[#allocation2 + $0x50] sm:$0xff] %vm341_vm1, %v3845_v4  ;;  %2668 = vmatmul.msk.bf16.vlgmr.msra.gmra.mxu0 %vm341_vm1, %v511_v20  ;;  %v278_v20 = vadd.f32 %v2900_v5, %v245_v1  ;;  %v288_v28 = vadd.f32 %v2900_v5, %v255_v12  ;;  %v271_v29 = vmul.f32 %v2886_v3, %v238_v18  ;;  %v240_v1 = vld [vmem:[%s2898_s24 + $0xe8] sm:$0xff] }
  0x1e   : > { %354 = vst.msk [vmem:[#allocation2 + $0x58] sm:$0x3] %vm344_vm2, %v3845_v4  ;;  %v295_v31 = vadd.f32 %v2900_v5, %v262_v17  ;;  %v246_v32 = vmul.f32 %v2886_v3, %v213_v22  ;;  %v296_v35 = vadd.f32 %v2900_v5, %v263_v21  ;;  %v247_v36 = vmul.f32 %v2886_v3, %v214_v26 }
  0x1f   : > { %v487_v14 = vld [vmem:[#allocation2 + $0x61] sm:$0xff]  ;;  %358 = vst.msk [vmem:[#allocation2 + $0x78] sm:$0xff] %vm341_vm1, %v3845_v4  ;;  %v310_v34 = vmax.f32 %v278_v20, 0.0  ;;  %v319_v38 = vmax.f32 %v287_v24, 0.0  ;;  %v303_v39 = vadd.f32 %v2900_v5, %v270_v25  ;;  %v320_v42 = vmax.f32 %v288_v28, 0.0 }
  0x20   : > { %v488_v15 = vld [vmem:[#allocation2 + $0x69] sm:$0xff]  ;;  %359 = vst.msk [vmem:[#allocation2 + $0x80] sm:$0xff] %vm341_vm1, %v3845_v4  ;;  %v304_v43 = vadd.f32 %v2900_v5, %v271_v29  ;;  %v327_v45 = vmax.f32 %v295_v31, 0.0  ;;  %v279_v46 = vadd.f32 %v2900_v5, %v246_v32  ;;  %v328_v49 = vmax.f32 %v296_v35, 0.0 }
  0x21   : > { %v2940_v16 = vpack.c.bf16 %v488_v15, %v487_v14  ;;  %360 = vst.msk [vmem:[#allocation2 + $0x88] sm:$0x3] %vm344_vm2, %v3845_v4  ;;  %v325_v14 = vmax.f32 %v293_v60, 0.0  ;;  %v277_v15 = vadd.f32 %v2900_v5, %v244_v61  ;;  %v280_v50 = vadd.f32 %v2900_v5, %v247_v36  ;;  %v232_v60 = vld [vmem:[%s2898_s24 + $0xa8] sm:$0xff] }
  0x22   : > { %361 = vst.msk [vmem:[#allocation2 + $0x90] sm:$0xff] %vm341_vm1, %v3845_v4  ;;  %v335_v52 = vmax.f32 %v303_v39, 0.0  ;;  %v336_v56 = vmax.f32 %v304_v43, 0.0  ;;  %v256_v57 = vmul.f32 %v2886_v3, %v223_v53  ;;  %v257_v58 = vmul.f32 %v2886_v3, %v224_v54 }
  0x23   : > { %2672 = vmatmul.msk.bf16.vlgmr.msra.gmra.mxu1 %vm341_vm1, %v2940_v16  ;;  %362 = vst.msk [vmem:[#allocation2 + $0x98] sm:$0xff] %vm341_vm1, %v3845_v4  ;;  %v309_v30 = vmax.f32 %v277_v15, 0.0  ;;  %v311_v61 = vmax.f32 %v279_v46, 0.0  ;;  %v312_v2 = vmax.f32 %v280_v50, 0.0  ;;  %v272_v11 = vmul.f32 %v2886_v3, %v239_v0  ;;  %v2802_v0 = vld [vmem:[%s3842_s2 + $0x10] sm:$0x3] }
  0x24   : > { %363 = vst.msk [vmem:[#allocation2 + $0xa0] sm:$0x3] %vm344_vm2, %v3845_v4  ;;  %v290_v7 = vadd.f32 %v2900_v5, %v257_v58  ;;  %v273_v12 = vmul.f32 %v2886_v3, %v240_v1  ;;  %v248_v18 = vmul.f32 %v2886_v3, %v215_v8  ;;  %v249_v25 = vmul.f32 %v2886_v3, %v216_v13  ;;  %v2785_v58 = vld [vmem:[%s3842_s2 + $0xe] sm:$0x3] }
  0x25   : > { %364 = vst.msk [vmem:[#allocation2 + $0xa8] sm:$0xff] %vm341_vm1, %v3845_v4  ;;  %v305_v21 = vadd.f32 %v2900_v5, %v272_v11  ;;  %v2242_v1 = vsel %vm577_vm0, %v2802_v0, 0  ;;  %v430_v11 = vld [vmem:[#allocation2] sm:$0xff] }
  0x26   : > { %365 = vst.msk [vmem:[#allocation2 + $0xb0] sm:$0xff] %vm341_vm1, %v3845_v4  ;;  %v322_v17 = vmax.f32 %v290_v7, 0.0  ;;  %v306_v22 = vadd.f32 %v2900_v5, %v273_v12  ;;  %v281_v26 = vadd.f32 %v2900_v5, %v248_v18  ;;  %v282_v31 = vadd.f32 %v2900_v5, %v249_v25  ;;  %2251 = vmatpush.bf16.msra.mxu0 %v2242_v1  ;;  %v431_v12 = vld [vmem:[#allocation2 + $0x8] sm:$0xff] }
  0x27   : > { %366 = vst.msk [vmem:[#allocation2 + $0xb8] sm:$0x3] %vm344_vm2, %v3845_v4  ;;  %v337_v29 = vmax.f32 %v305_v21, 0.0 }
  0x28   : > { %367 = vst.msk [vmem:[#allocation2 + $0xc0] sm:$0xff] %vm341_vm1, %v3845_v4  ;;  %v314_v36 = vmax.f32 %v282_v31, 0.0 }
  0x29   : > { %368 = vst.msk [vmem:[#allocation2 + $0xc8] sm:$0xff] %vm341_vm1, %v3845_v4 }
  0x2a   : > { %369 = vst.msk [vmem:[#allocation2 + $0xd0] sm:$0x3] %vm344_vm2, %v3845_v4 }
  0x2b   : > { %370 = vst.msk [vmem:[#allocation2 + $0xd8] sm:$0xff] %vm341_vm1, %v3845_v4 }
  0x2c   : > { %371 = vst.msk [vmem:[#allocation2 + $0xe0] sm:$0xff] %vm341_vm1, %v3845_v4 }
  0x2d   : > { %372 = vst.msk [vmem:[#allocation2 + $0xe8] sm:$0x3] %vm344_vm2, %v3845_v4 }
  0x2e   : > { %373 = vst.msk [vmem:[#allocation2 + $0xf0] sm:$0xff] %vm341_vm1, %v3845_v4 }
  0x2f   : > { %374 = vst.msk [vmem:[#allocation2 + $0xf8] sm:$0xff] %vm341_vm1, %v3845_v4 }
  0x30   : > { %375 = vst.msk [vmem:[#allocation2 + $0x100] sm:$0x3] %vm344_vm2, %v3845_v4 }
  0x31   : > { %376 = vst.msk [vmem:[#allocation2 + $0x108] sm:$0xff] %vm341_vm1, %v3845_v4 }
  0x32   : > { %377 = vst.msk [vmem:[#allocation2 + $0x110] sm:$0xff] %vm341_vm1, %v3845_v4 }
  0x33   : > { %378 = vst.msk [vmem:[#allocation2 + $0x118] sm:$0x3] %vm344_vm2, %v3845_v4 }
  0x34   : > { %379 = vst.msk [vmem:[#allocation2 + $0x120] sm:$0xff] %vm341_vm1, %v3845_v4 }
  0x35   : > { %380 = vst.msk [vmem:[#allocation2 + $0x128] sm:$0xff] %vm341_vm1, %v3845_v4 }
  0x36   : > { %381 = vst.msk [vmem:[#allocation2 + $0x130] sm:$0x3] %vm344_vm2, %v3845_v4 }
  0x37   : > { %382 = vst.msk [vmem:[#allocation2 + $0x138] sm:$0xff] %vm341_vm1, %v3845_v4 }
  0x38   : > { %383 = vst.msk [vmem:[#allocation2 + $0x140] sm:$0xff] %vm341_vm1, %v3845_v4 }
  0x39   : > { %384 = vst.msk [vmem:[#allocation2 + $0x148] sm:$0x3] %vm344_vm2, %v3845_v4 }
  0x3a   : > { %385 = vst.msk [vmem:[#allocation2 + $0x150] sm:$0xff] %vm341_vm1, %v3845_v4 }
  0x3b   : > { %386 = vst.msk [vmem:[#allocation2 + $0x158] sm:$0xff] %vm341_vm1, %v3845_v4 }
  0x3c   : > { %387 = vst.msk [vmem:[#allocation2 + $0x160] sm:$0x3] %vm344_vm2, %v3845_v4 }
  0x3d   : > { %388 = vst.msk [vmem:[#allocation2 + $0x168] sm:$0xff] %vm341_vm1, %v3845_v4 }
  0x3e   : > { %389 = vst.msk [vmem:[#allocation2 + $0x170] sm:$0xff] %vm341_vm1, %v3845_v4 }
  0x3f   : > { %390 = vst.msk [vmem:[#allocation2 + $0x178] sm:$0x3] %vm344_vm2, %v3845_v4 }
  0x40   : > { %391 = vst.msk [vmem:[#allocation2 + $0x180] sm:$0xff] %vm341_vm1, %v3845_v4 }
  0x41   : > { %392 = vst.msk [vmem:[#allocation2 + $0x188] sm:$0xff] %vm341_vm1, %v3845_v4 }
  0x42   : > { %393 = vst.msk [vmem:[#allocation2 + $0x190] sm:$0x3] %vm344_vm2, %v3845_v4 }
  0x43   : > { %394 = vst.msk [vmem:[#allocation2 + $0x198] sm:$0xff] %vm341_vm1, %v3845_v4 }
  0x44   : > { %395 = vst.msk [vmem:[#allocation2 + $0x1a0] sm:$0xff] %vm341_vm1, %v3845_v4 }
  0x45   : > { %396 = vst.msk [vmem:[#allocation2 + $0x1a8] sm:$0x3] %vm344_vm2, %v3845_v4 }
  0x46   : > { %412 = vst.msk [vmem:[#allocation2 + $0xc1] sm:$0xff] %vm341_vm1, %v323_v51 }
  0x47   : > { %413 = vst.msk [vmem:[#allocation2 + $0xc9] sm:$0xff] %vm341_vm1, %v324_v55 }
  0x48   : > { %420 = vst.msk [vmem:[#allocation2 + $0x121] sm:$0xff] %vm341_vm1, %v331_v59  ;;  %v231_v59 = vld [vmem:[%s2898_s24 + $0xa0] sm:$0xff] }
  0x49   : > { %421 = vst.msk [vmem:[#allocation2 + $0x129] sm:$0xff] %vm341_vm1, %v332_v63  ;;  %v264_v62 = vmul.f32 %v2886_v3, %v231_v59  ;;  %v265_v63 = vmul.f32 %v2886_v3, %v232_v60  ;;  %v2751_v59 = vld [vmem:[%s3842_s2 + $0xa] sm:$0x3] }
  0x4a   : > { %406 = vst.msk [vmem:[#allocation2 + $0x79] sm:$0xff] %vm341_vm1, %v317_v6  ;;  %v289_v6 = vadd.f32 %v2900_v5, %v256_v57  ;;  %v2768_v57 = vld [vmem:[%s3842_s2 + $0xc] sm:$0x3] }
  0x4b   : > { %407 = vst.msk [vmem:[#allocation2 + $0x81] sm:$0xff] %vm341_vm1, %v318_v10  ;;  %v297_v9 = vadd.f32 %v2900_v5, %v264_v62  ;;  %v298_v10 = vadd.f32 %v2900_v5, %v265_v63  ;;  %v2020_v62 = vsel %vm577_vm0, %v2785_v58, 0  ;;  %v1575_v63 = vsel %vm577_vm0, %v2751_v59, 0 }
  0x4c   : > { %414 = vst.msk [vmem:[#allocation2 + $0xd9] sm:$0xff] %vm341_vm1, %v325_v14  ;;  %v321_v15 = vmax.f32 %v289_v6, 0.0  ;;  %1584 = vmatpush.bf16.msra.mxu1 %v1575_v63 }
  0x4d   : > { %v495_v33 = vld [vmem:[#allocation2 + $0xc1] sm:$0xff]  ;;  %415 = vst.msk [vmem:[#allocation2 + $0xe1] sm:$0xff] %vm341_vm1, %v326_v19  ;;  %v329_v20 = vmax.f32 %v297_v9, 0.0  ;;  %v330_v24 = vmax.f32 %v298_v10, 0.0 }
  0x4e   : > { %v496_v37 = vld [vmem:[#allocation2 + $0xc9] sm:$0xff]  ;;  %422 = vst.msk [vmem:[#allocation2 + $0x139] sm:$0xff] %vm341_vm1, %v333_v23 }
  0x4f   : > { %v3101_v40 = vpack.c.bf16 %v496_v37, %v495_v33  ;;  %v503_v41 = vld [vmem:[#allocation2 + $0x121] sm:$0xff]  ;;  %423 = vst.msk [vmem:[#allocation2 + $0x141] sm:$0xff] %vm341_vm1, %v334_v27 }
  0x50   : > { %v504_v44 = vld [vmem:[#allocation2 + $0x129] sm:$0xff]  ;;  %398 = vst.msk [vmem:[#allocation2 + $0x19] sm:$0xff] %vm341_vm1, %v309_v30  ;;  %v338_v30 = vmax.f32 %v306_v22, 0.0 }
  0x51   : > { %2676 = vmatmul.msk.bf16.vlgmr.msra.gmra.mxu2 %vm341_vm1, %v3101_v40  ;;  %v3109_v47 = vpack.c.bf16 %v504_v44, %v503_v41  ;;  %v489_v48 = vld [vmem:[#allocation2 + $0x79] sm:$0xff]  ;;  %399 = vst.msk [vmem:[#allocation2 + $0x21] sm:$0xff] %vm341_vm1, %v310_v34  ;;  %v313_v34 = vmax.f32 %v281_v26, 0.0 }
  0x52   : > { %v490_v51 = vld [vmem:[#allocation2 + $0x81] sm:$0xff]  ;;  %408 = vst.msk [vmem:[#allocation2 + $0x91] sm:$0xff] %vm341_vm1, %v319_v38 }
  0x53   : > { %2680 = vmatmul.msk.bf16.vlgmr.msra.gmra.mxu3 %vm341_vm1, %v3109_v47  ;;  %v3118_v55 = vpack.c.bf16 %v490_v51, %v489_v48  ;;  %409 = vst.msk [vmem:[#allocation2 + $0x99] sm:$0xff] %vm341_vm1, %v320_v42  ;;  %v497_v27 = vld [vmem:[#allocation2 + $0xd9] sm:$0xff]  ;;  %v821_v63 = vld [vmem:[#allocation2 + $0x82] sm:$0xff] }
  0x54   : > { %416 = vst.msk [vmem:[#allocation2 + $0xf1] sm:$0xff] %vm341_vm1, %v327_v45  ;;  %v498_v28 = vld [vmem:[#allocation2 + $0xe1] sm:$0xff]  ;;  %2029 = vmatpush.bf16.msra.mxu3 %v2020_v62 }
  0x55   : > { %2673 = vmatmul.msk.bf16.gmra.mxu1 %vm341_vm1, %v3118_v55  ;;  %417 = vst.msk [vmem:[#allocation2 + $0xf9] sm:$0xff] %vm341_vm1, %v328_v49  ;;  %v505_v32 = vld [vmem:[#allocation2 + $0x139] sm:$0xff]  ;;  %v3158_v35 = vpack.c.bf16 %v498_v28, %v497_v27 }
  0x56   : > { %424 = vst.msk [vmem:[#allocation2 + $0x151] sm:$0xff] %vm341_vm1, %v335_v52  ;;  %v506_v33 = vld [vmem:[#allocation2 + $0x141] sm:$0xff] }
  0x57   : > { %v481_v14 = vld [vmem:[#allocation2 + $0x19] sm:$0xff]  ;;  %425 = vst.msk [vmem:[#allocation2 + $0x159] sm:$0xff] %vm341_vm1, %v336_v56  ;;  %v3162_v39 = vpack.c.bf16 %v506_v33, %v505_v32 }
  0x58   : > { %v482_v19 = vld [vmem:[#allocation2 + $0x21] sm:$0xff]  ;;  %400 = vst.msk [vmem:[#allocation2 + $0x31] sm:$0xff] %vm341_vm1, %v311_v61  ;;  %v1798_v61 = vsel %vm577_vm0, %v2768_v57, 0  ;;  %v1032_v18 = vld [vmem:[#allocation2 + $0x18] sm:$0xff] }
  0x59   : > { %v3147_v23 = vpack.c.bf16 %v482_v19, %v481_v14  ;;  %401 = vst.msk [vmem:[#allocation2 + $0x39] sm:$0xff] %vm341_vm1, %v312_v2  ;;  %v491_v37 = vld [vmem:[#allocation2 + $0x91] sm:$0xff]  ;;  %1807 = vmatpush.bf16.msra.mxu2 %v1798_v61  ;;  %v462_v14 = vpack.c.bf16 %v431_v12, %v430_v11  ;;  %v1033_v19 = vld [vmem:[#allocation2 + $0x20] sm:$0xff] }
  0x5a   : > { %410 = vst.msk [vmem:[#allocation2 + $0xa9] sm:$0xff] %vm341_vm1, %v321_v15  ;;  %v492_v38 = vld [vmem:[#allocation2 + $0x99] sm:$0xff]  ;;  %v810_v15 = vld [vmem:[#allocation2 + $0x2] sm:$0xff]  ;;  %v1064_v21 = vpack.c.bf16 %v1033_v19, %v1032_v18 }
  0x5b   : > { %2669 = vmatmul.msk.bf16.gmra.mxu0 %vm341_vm1, %v3147_v23  ;;  %411 = vst.msk [vmem:[#allocation2 + $0xb1] sm:$0xff] %vm341_vm1, %v322_v17  ;;  %v3168_v41 = vpack.c.bf16 %v492_v38, %v491_v37  ;;  %v499_v45 = vld [vmem:[#allocation2 + $0xf1] sm:$0xff]  ;;  %v812_v22 = vld [vmem:[#allocation2 + $0x1a] sm:$0xff]  ;;  %v1039_v38 = vld [vmem:[#allocation2 + $0x68] sm:$0xff] }
  0x5c   : > { %418 = vst.msk [vmem:[#allocation2 + $0x109] sm:$0xff] %vm341_vm1, %v329_v20  ;;  %v500_v46 = vld [vmem:[#allocation2 + $0xf9] sm:$0xff]  ;;  %v811_v17 = vld [vmem:[#allocation2 + $0xa] sm:$0xff] }
  0x5d   : > { %419 = vst.msk [vmem:[#allocation2 + $0x111] sm:$0xff] %vm341_vm1, %v330_v24  ;;  %v507_v48 = vld [vmem:[#allocation2 + $0x151] sm:$0xff]  ;;  %v3179_v50 = vpack.c.bf16 %v500_v46, %v499_v45  ;;  %v842_v20 = vpack.c.bf16 %v811_v17, %v810_v15  ;;  %v813_v24 = vld [vmem:[#allocation2 + $0x22] sm:$0xff]  ;;  %v820_v62 = vld [vmem:[#allocation2 + $0x7a] sm:$0xff] }
  0x5e   : > { %426 = vst.msk [vmem:[#allocation2 + $0x169] sm:$0xff] %vm341_vm1, %v337_v29  ;;  %v508_v49 = vld [vmem:[#allocation2 + $0x159] sm:$0xff]  ;;  %v3227_v27 = vpack.c.bf16 %v813_v24, %v812_v22 }
  0x5f   : > { %427 = vst.msk [vmem:[#allocation2 + $0x171] sm:$0xff] %vm341_vm1, %v338_v30  ;;  %v483_v42 = vld [vmem:[#allocation2 + $0x31] sm:$0xff]  ;;  %v3181_v53 = vpack.c.bf16 %v508_v49, %v507_v48  ;;  %v1038_v37 = vld [vmem:[#allocation2 + $0x60] sm:$0xff] }
  0x60   : > { %402 = vst.msk [vmem:[#allocation2 + $0x49] sm:$0xff] %vm341_vm1, %v313_v34  ;;  %v484_v43 = vld [vmem:[#allocation2 + $0x39] sm:$0xff]  ;;  %v1034_v25 = vld [vmem:[#allocation2 + $0x30] sm:$0xff]  ;;  %v3255_v45 = vpack.c.bf16 %v1039_v38, %v1038_v37  ;;  %v818_v48 = vld [vmem:[#allocation2 + $0x62] sm:$0xff] }
  0x61   : > { %2677 = vmatmul.msk.bf16.gmra.mxu2 %vm341_vm1, %v3158_v35  ;;  %403 = vst.msk [vmem:[#allocation2 + $0x51] sm:$0xff] %vm341_vm1, %v314_v36  ;;  %v3175_v44 = vpack.c.bf16 %v484_v43, %v483_v42  ;;  %v493_v51 = vld [vmem:[#allocation2 + $0xa9] sm:$0xff]  ;;  %v1035_v26 = vld [vmem:[#allocation2 + $0x38] sm:$0xff]  ;;  %v1049_v4 = vld [vmem:[#allocation2 + $0xe0] sm:$0xff] }
  0x62   : > { %v494_v52 = vld [vmem:[#allocation2 + $0xb1] sm:$0xff]  ;;  %v815_v29 = vld [vmem:[#allocation2 + $0x3a] sm:$0xff]  ;;  %v1044_v22 = vld [vmem:[#allocation2 + $0xa8] sm:$0xff] }
  0x63   : > { %2681 = vmatmul.msk.bf16.gmra.mxu3 %vm341_vm1, %v3162_v39  ;;  %v3185_v54 = vpack.c.bf16 %v494_v52, %v493_v51  ;;  %v501_v6 = vld [vmem:[#allocation2 + $0x109] sm:$0xff]  ;;  %v814_v28 = vld [vmem:[#allocation2 + $0x32] sm:$0xff]  ;;  %v1041_v52 = vld [vmem:[#allocation2 + $0x80] sm:$0xff] }
  0x64   : > { %v502_v7 = vld [vmem:[#allocation2 + $0x111] sm:$0xff]  ;;  %v3239_v32 = vpack.c.bf16 %v815_v29, %v814_v28  ;;  %v823_v19 = vld [vmem:[#allocation2 + $0x9a] sm:$0xff] }
  0x65   : > { %2674 = vmatmul.msk.bf16.gmra.mxu1 %vm341_vm1, %v3168_v41  ;;  %v509_v8 = vld [vmem:[#allocation2 + $0x169] sm:$0xff]  ;;  %v3211_v10 = vpack.c.bf16 %v502_v7, %v501_v6  ;;  %v1040_v51 = vld [vmem:[#allocation2 + $0x78] sm:$0xff] }
  0x66   : > { %v510_v9 = vld [vmem:[#allocation2 + $0x171] sm:$0xff]  ;;  %v3273_v58 = vpack.c.bf16 %v1041_v52, %v1040_v51  ;;  %v1047_v51 = vld [vmem:[#allocation2 + $0xc8] sm:$0xff] }
  0x67   : > { %v485_v56 = vld [vmem:[#allocation2 + $0x49] sm:$0xff]  ;;  %v3213_v13 = vpack.c.bf16 %v510_v9, %v509_v8  ;;  %v1043_v7 = vld [vmem:[#allocation2 + $0x98] sm:$0xff]  ;;  %v3295_v8 = vpack.c.bf16 %v821_v63, %v820_v62 }
  0x68   : > { %v486_v60 = vld [vmem:[#allocation2 + $0x51] sm:$0xff]  ;;  %v1036_v30 = vld [vmem:[#allocation2 + $0x48] sm:$0xff] }
  0x69   : > { %v3207_v2 = vpack.c.bf16 %v486_v60, %v485_v56  ;;  %v1037_v31 = vld [vmem:[#allocation2 + $0x50] sm:$0xff] }
  0x6a   : > { %v3241_v33 = vpack.c.bf16 %v1037_v31, %v1036_v30  ;;  %v816_v34 = vld [vmem:[#allocation2 + $0x4a] sm:$0xff]  ;;  %v817_v36 = vld [vmem:[#allocation2 + $0x52] sm:$0xff] }
  0x6b   : > { %2670 = vmatmul.msk.bf16.gmra.mxu0 %vm341_vm1, %v3175_v44  ;;  %v3251_v42 = vpack.c.bf16 %v817_v36, %v816_v34  ;;  %v819_v49 = vld [vmem:[#allocation2 + $0x6a] sm:$0xff]  ;;  %v822_v18 = vld [vmem:[#allocation2 + $0x92] sm:$0xff] }
  0x6c   : > { %v3269_v56 = vpack.c.bf16 %v819_v49, %v818_v48  ;;  %v1042_v6 = vld [vmem:[#allocation2 + $0x90] sm:$0xff]  ;;  %v1046_v49 = vld [vmem:[#allocation2 + $0xc0] sm:$0xff] }
  0x6d   : > { %v3299_v11 = vpack.c.bf16 %v1043_v7, %v1042_v6  ;;  %v1045_v24 = vld [vmem:[#allocation2 + $0xb0] sm:$0xff]  ;;  %v3355_v63 = vpack.c.bf16 %v1047_v51, %v1046_v49  ;;  %v1048_v51 = vld [vmem:[#allocation2 + $0xd8] sm:$0xff] }
  0x6e   : > { %v3327_v28 = vpack.c.bf16 %v1045_v24, %v1044_v22  ;;  %v824_v36 = vld [vmem:[#allocation2 + $0xaa] sm:$0xff]  ;;  %v825_v37 = vld [vmem:[#allocation2 + $0xb2] sm:$0xff]  ;;  %v826_v22 = vld [vmem:[#allocation2 + $0xc2] sm:$0xff] }
  0x6f   : > { %v3351_v52 = vpack.c.bf16 %v825_v37, %v824_v36  ;;  %3859 = vst [vmem:[#allocation9_spill] sm:$0xff] %v3355_v63  ;;  %v827_v24 = vld [vmem:[#allocation2 + $0xca] sm:$0xff] }
  0x70   : > { %3855 = vst [vmem:[#allocation5_spill] sm:$0xff] %v3327_v28 }
  0x71   : > { %2678 = vmatmul.msk.bf16.gmra.mxu2 %vm341_vm1, %v3179_v50  ;;  %3857 = vst [vmem:[#allocation7_spill] sm:$0xff] %v3351_v52 }
  0x73   : > { %2682 = vmatmul.msk.bf16.gmra.mxu3 %vm341_vm1, %v3181_v53 }
  0x75   : > { %2675 = vmatmul.msk.bf16.gmra.mxu1 %vm341_vm1, %v3185_v54 }
  0x7b   : > { %2671 = vmatmul.msk.bf16.gmra.mxu0 %vm341_vm1, %v3207_v2 }
  0x81   : > { %2679 = vmatmul.msk.bf16.gmra.mxu2 %vm341_vm1, %v3211_v10 }
  0x83   : > { %2683 = vmatmul.msk.bf16.gmra.mxu3 %vm341_vm1, %v3213_v13 }
  0x85   : > { %2684 = vmatmul.msk.bf16.vlgmr.msrb.gmra.mxu1 %vm341_vm1, %v462_v14 }
  0x8b   : > { %2735 = vmatmul.msk.bf16.vlgmr.msrb.gmra.mxu0 %vm341_vm1, %v3147_v23  ;;  %v3229_v23 = vpack.c.bf16 %v1035_v26, %v1034_v25  ;;  %v3323_v25 = vpack.c.bf16 %v823_v19, %v822_v18 }
  0x91   : > { %2701 = vmatmul.msk.bf16.vlgmr.msrb.gmra.mxu2 %vm341_vm1, %v842_v20 }
  0x93   : > { %2718 = vmatmul.msk.bf16.vlgmr.msrb.gmra.mxu3 %vm341_vm1, %v1064_v21 }
  0x95   : > { %2685 = vmatmul.msk.bf16.gmra.mxu1 %vm341_vm1, %v1064_v21 }
  0x9a   : > { %v3261_v46 = vpop.f32.mrf.mxu0 }
  0x9b   : > { %2736 = vmatmul.msk.bf16.gmra.mxu0 %vm341_vm1, %v3175_v44 }
  0xa0   : > { %v3253_v43 = vpop.f32.mrf.mxu1 }
  0xa1   : > { %2702 = vmatmul.msk.bf16.gmra.mxu2 %vm341_vm1, %v3227_v27 }
  0xa2   : > { %v3271_v57 = vpop.f32.mrf.mxu0 }
  0xa3   : > { %2719 = vmatmul.msk.bf16.gmra.mxu3 %vm341_vm1, %v3229_v23 }
  0xa5   : > { %2686 = vmatmul.msk.bf16.gmra.mxu1 %vm341_vm1, %v3229_v23 }
  0xab   : > { %2737 = vmatmul.msk.bf16.gmra.mxu0 %vm341_vm1, %v3207_v2 }
  0xb1   : > { %2703 = vmatmul.msk.bf16.gmra.mxu2 %vm341_vm1, %v3239_v32 }
  0xb3   : > { %2720 = vmatmul.msk.bf16.gmra.mxu3 %vm341_vm1, %v3241_v33 }
  0xb5   : > { %2687 = vmatmul.msk.bf16.gmra.mxu1 %vm341_vm1, %v3241_v33 }
  0xbb   : > { %2738 = vmatmul.msk.bf16.gmra.mxu0 %vm341_vm1, %v2940_v16  ;;  %v3265_v16 = vpop.f32.mrf.mxu1 }
  0xc1   : > { %2704 = vmatmul.msk.bf16.gmra.mxu2 %vm341_vm1, %v3251_v42 }
  0xc3   : > { %2721 = vmatmul.msk.bf16.gmra.mxu3 %vm341_vm1, %v3255_v45 }
  0xc5   : > { %2688 = vmatmul.msk.bf16.gmra.mxu1 %vm341_vm1, %v3255_v45 }
  0xcb   : > { %2739 = vmatmul.msk.bf16.gmra.mxu0 %vm341_vm1, %v3118_v55 }
  0xd1   : > { %2705 = vmatmul.msk.bf16.gmra.mxu2 %vm341_vm1, %v3269_v56 }
  0xd2   : > { %v3277_v59 = vpop.f32.mrf.mxu1 }
  0xd3   : > { %2722 = vmatmul.msk.bf16.gmra.mxu3 %vm341_vm1, %v3273_v58 }
  0xd4   : > { %v3281_v60 = vpop.f32.mrf.mxu2 }
  0xd5   : > { %2689 = vmatmul.msk.bf16.gmra.mxu1 %vm341_vm1, %v3273_v58 }
  0xd6   : > { %v3285_v55 = vpop.f32.mrf.mxu3 }
  0xd8   : > { %v3287_v61 = vpop.f32.mrf.mxu0 }
  0xda   : > { %v3289_v0 = vpop.f32.mrf.mxu1 }
  0xdb   : > { %2740 = vmatmul.msk.bf16.gmra.mxu0 %vm341_vm1, %v3168_v41 }
  0xdc   : > { %v3293_v1 = vpop.f32.mrf.mxu2 }
  0xde   : > { %v3297_v9 = vpop.f32.mrf.mxu3 }
  0xe0   : > { %v3301_v12 = vpop.f32.mrf.mxu0 }
  0xe1   : > { %2706 = vmatmul.msk.bf16.gmra.mxu2 %vm341_vm1, %v3295_v8 }
  0xe2   : > { %v3305_v14 = vpop.f32.mrf.mxu1 }
  0xe3   : > { %2723 = vmatmul.msk.bf16.gmra.mxu3 %vm341_vm1, %v3299_v11 }
  0xe4   : > { %v3309_v41 = vpop.f32.mrf.mxu2 }
  0xe5   : > { %2690 = vmatmul.msk.bf16.gmra.mxu1 %vm341_vm1, %v3299_v11 }
  0xe6   : > { %v3313_v15 = vpop.f32.mrf.mxu3 }
  0xe7   : > { %3853 = vst [vmem:[#allocation3_spill] sm:$0xff] %v3313_v15 }
  0xe8   : > { %v3315_v17 = vpop.f32.mrf.mxu0 }
  0xea   : > { %v3317_v20 = vpop.f32.mrf.mxu1 }
  0xeb   : > { %2741 = vmatmul.msk.bf16.gmra.mxu0 %vm341_vm1, %v3185_v54 }
  0xec   : > { %v3321_v21 = vpop.f32.mrf.mxu2 }
  0xee   : > { %v3325_v26 = vpop.f32.mrf.mxu3 }
  0xef   : > { %3854 = vst [vmem:[#allocation4_spill] sm:$0xff] %v3325_v26 }
  0xf0   : > { %v3329_v29 = vpop.f32.mrf.mxu0 }
  0xf1   : > { %2707 = vmatmul.msk.bf16.gmra.mxu2 %vm341_vm1, %v3323_v25 }
  0xf2   : > { %v3333_v30 = vpop.f32.mrf.mxu1 }
  0xf3   : > { %2724 = vmatmul.msk.bf16.gmra.mxu3 %vm341_vm1, %v3327_v28 }
  0xf4   : > { %v3337_v54 = vpop.f32.mrf.mxu2 }
  0xf5   : > { %2691 = vmatmul.msk.bf16.gmra.mxu1 %vm341_vm1, %v3327_v28 }
  0xf6   : > { %v3341_v31 = vpop.f32.mrf.mxu3 }
  0xf7   : > { %3856 = vst [vmem:[#allocation6_spill] sm:$0xff] %v3341_v31 }
  0xf8   : > { %v3343_v34 = vpop.f32.mrf.mxu0 }
  0xfa   : > { %v3345_v38 = vpop.f32.mrf.mxu1 }
  0xfb   : > { %2742 = vmatmul.msk.bf16.gmra.mxu0 %vm341_vm1, %v3101_v40 }
  0xfc   : > { %v3349_v48 = vpop.f32.mrf.mxu2 }
  0xfe   : > { %v3353_v62 = vpop.f32.mrf.mxu3 }
  0xff   : > { %3858 = vst [vmem:[#allocation8_spill] sm:$0xff] %v3353_v62  ;;  %v3374_v62 = vpack.c.bf16 %v827_v24, %v826_v22 }
 0x100   : > { %v3357_v6 = vpop.f32.mrf.mxu0 }
 0x101   : > { %2708 = vmatmul.msk.bf16.gmra.mxu2 %vm341_vm1, %v3351_v52  ;;  %3861 = vst [vmem:[#allocation11_spill] sm:$0xff] %v3374_v62 }
 0x102   : > { %v730_v7 = vpop.f32.mrf.mxu1 }
 0x103   : > { %2725 = vmatmul.msk.bf16.gmra.mxu3 %vm341_vm1, %v3355_v63  ;;  %v731_v15 = vadd.f32 %v730_v7, %v3261_v46 }
 0x104   : > { %v3363_v40 = vpop.f32.mrf.mxu2 }
 0x105   : > { %2692 = vmatmul.msk.bf16.gmra.mxu1 %vm341_vm1, %v3355_v63  ;;  %v3378_v63 = vpack.c.bf16 %v1049_v4, %v1048_v51 }
 0x106   : > { %v3367_v18 = vpop.f32.mrf.mxu3 }
 0x107   : > { %3860 = vst [vmem:[#allocation10_spill] sm:$0xff] %v3367_v18 }
 0x108   : > { %v1364_v19 = vpop.f32.mrf.mxu0  ;;  %3863 = vst [vmem:[#allocation13_spill] sm:$0xff] %v3378_v63 }
 0x10a   : > { %v732_v36 = vpop.f32.mrf.mxu1 }
 0x10b   : > { %2743 = vmatmul.msk.bf16.gmra.mxu0 %vm341_vm1, %v3158_v35  ;;  %v733_v37 = vadd.f32 %v732_v36, %v3271_v57 }
 0x10c   : > { %v3372_v49 = vpop.f32.mrf.mxu2 }
 0x10e   : > { %v3376_v31 = vpop.f32.mrf.mxu3 }
 0x10f   : > { %3862 = vst [vmem:[#allocation12_spill] sm:$0xff] %v3376_v31  ;;  %v828_v31 = vld [vmem:[#allocation2 + $0xda] sm:$0xff] }
 0x110   : > { %v1366_v18 = vpop.f32.mrf.mxu0 }
 0x111   : > { %2709 = vmatmul.msk.bf16.gmra.mxu2 %vm341_vm1, %v3374_v62  ;;  %v829_v62 = vld [vmem:[#allocation2 + $0xe2] sm:$0xff] }
 0x112   : > { %v735_v26 = vpop.f32.mrf.mxu1 }
 0x113   : > { %2726 = vmatmul.msk.bf16.gmra.mxu3 %vm341_vm1, %v3378_v63  ;;  %v736_v35 = vadd.f32 %v735_v26, %v3287_v61  ;;  %v1050_v61 = vld [vmem:[#allocation2 + $0xf0] sm:$0xff]  ;;  %v1051_v26 = vld [vmem:[#allocation2 + $0xf8] sm:$0xff] }
 0x114   : > { %v920_v57 = vpop.f32.mrf.mxu2 }
 0x115   : > { %v1000_v36 = vadd.f32 %v920_v57, %v731_v15  ;;  %2693 = vmatmul.msk.bf16.gmra.mxu1 %vm341_vm1, %v3378_v63  ;;  %v3393_v57 = vpack.c.bf16 %v829_v62, %v828_v31 }
 0x116   : > { %v1142_v22 = vpop.f32.mrf.mxu3 }
 0x117   : > { %v1222_v4 = vadd.f32 %v1142_v22, %v1000_v36  ;;  %v3395_v36 = vpack.c.bf16 %v1051_v26, %v1050_v61  ;;  %v831_v61 = vld [vmem:[#allocation2 + $0xfa] sm:$0xff] }
 0x118   : > { %v1369_v24 = vpop.f32.mrf.mxu0 }
 0x119   : > { %v3388_v51 = vadd.f32 %v1364_v19, %v1222_v4 }
 0x11a   : > { %v737_v28 = vpop.f32.mrf.mxu1 }
 0x11b   : > { %2744 = vmatmul.msk.bf16.gmra.mxu0 %vm341_vm1, %v3179_v50  ;;  %v738_v46 = vadd.f32 %v737_v28, %v3301_v12 }
 0x11c   : > { %v922_v7 = vpop.f32.mrf.mxu2 }
 0x11d   : > { %v1001_v15 = vadd.f32 %v922_v7, %v733_v37  ;;  %v830_v7 = vld [vmem:[#allocation2 + $0xf2] sm:$0xff] }
 0x11e   : > { %v1144_v63 = vpop.f32.mrf.mxu3 }
 0x11f   : > { %v1223_v52 = vadd.f32 %v1144_v63, %v1001_v15  ;;  %v1053_v15 = vld [vmem:[#allocation2 + $0x110] sm:$0xff] }
 0x120   : > { %v1371_v19 = vpop.f32.mrf.mxu0 }
 0x121   : > { %2710 = vmatmul.msk.bf16.gmra.mxu2 %vm341_vm1, %v3393_v57  ;;  %v3399_v22 = vadd.f32 %v1366_v18, %v1223_v52 }
 0x122   : > { %v740_v4 = vpop.f32.mrf.mxu1 }
 0x123   : > { %3864 = vst [vmem:[#allocation14_spill] sm:$0xff] %v3399_v22  ;;  %2727 = vmatmul.msk.bf16.gmra.mxu3 %vm341_vm1, %v3395_v36  ;;  %v741_v50 = vadd.f32 %v740_v4, %v3315_v17  ;;  %v1052_v17 = vld [vmem:[#allocation2 + $0x108] sm:$0xff]  ;;  %v3411_v4 = vpack.c.bf16 %v831_v61, %v830_v7 }
 0x124   : > { %v925_v12 = vpop.f32.mrf.mxu2 }
 0x125   : > { %v1002_v28 = vadd.f32 %v925_v12, %v736_v35  ;;  %2694 = vmatmul.msk.bf16.gmra.mxu1 %vm341_vm1, %v3395_v36 }
 0x126   : > { %v1147_v31 = vpop.f32.mrf.mxu3 }
 0x127   : > { %v1224_v62 = vadd.f32 %v1147_v31, %v1002_v28  ;;  %v3413_v28 = vpack.c.bf16 %v1053_v15, %v1052_v17  ;;  %v832_v17 = vld [vmem:[#allocation2 + $0x10a] sm:$0xff]  ;;  %v833_v15 = vld [vmem:[#allocation2 + $0x112] sm:$0xff] }
 0x128   : > { %v1374_v63 = vpop.f32.mrf.mxu0 }
 0x129   : > { %v3406_v37 = vadd.f32 %v1369_v24, %v1224_v62 }
 0x12a   : > { %v742_v52 = vpop.f32.mrf.mxu1 }
 0x12b   : > { %2745 = vmatmul.msk.bf16.gmra.mxu0 %vm341_vm1, %v3211_v10  ;;  %v743_v18 = vadd.f32 %v742_v52, %v3329_v29 }
 0x12c   : > { %v927_v26 = vpop.f32.mrf.mxu2 }
 0x12d   : > { %v1003_v35 = vadd.f32 %v927_v26, %v738_v46 }
 0x12e   : > { %v1149_v12 = vpop.f32.mrf.mxu3 }
 0x12f   : > { %v1225_v22 = vadd.f32 %v1149_v12, %v1003_v35  ;;  %v1055_v12 = vld [vmem:[#allocation2 + $0x128] sm:$0xff] }
 0x130   : > { %v1376_v24 = vpop.f32.mrf.mxu0 }
 0x131   : > { %2711 = vmatmul.msk.bf16.gmra.mxu2 %vm341_vm1, %v3411_v4  ;;  %v3417_v31 = vadd.f32 %v1371_v19, %v1225_v22 }
 0x132   : > { %v745_v62 = vpop.f32.mrf.mxu1 }
 0x133   : > { %3865 = vst [vmem:[#allocation15_spill] sm:$0xff] %v3417_v31  ;;  %2728 = vmatmul.msk.bf16.gmra.mxu3 %vm341_vm1, %v3413_v28  ;;  %v746_v10 = vadd.f32 %v745_v62, %v3343_v34  ;;  %v1054_v34 = vld [vmem:[#allocation2 + $0x120] sm:$0xff]  ;;  %v3429_v62 = vpack.c.bf16 %v833_v15, %v832_v17 }
 0x134   : > { %v930_v29 = vpop.f32.mrf.mxu2 }
 0x135   : > { %v1004_v46 = vadd.f32 %v930_v29, %v741_v50  ;;  %2695 = vmatmul.msk.bf16.gmra.mxu1 %vm341_vm1, %v3413_v28 }
 0x136   : > { %v1152_v7 = vpop.f32.mrf.mxu3 }
 0x137   : > { %v1226_v61 = vadd.f32 %v1152_v7, %v1004_v46  ;;  %v3431_v46 = vpack.c.bf16 %v1055_v12, %v1054_v34  ;;  %v835_v34 = vld [vmem:[#allocation2 + $0x12a] sm:$0xff]  ;;  %v1056_v12 = vld [vmem:[#allocation2 + $0x138] sm:$0xff] }
 0x138   : > { %v1379_v52 = vpop.f32.mrf.mxu0 }
 0x139   : > { %v3424_v26 = vadd.f32 %v1374_v63, %v1226_v61 }
 0x13a   : > { %v747_v19 = vpop.f32.mrf.mxu1 }
 0x13b   : > { %3866 = vst [vmem:[#allocation16_spill] sm:$0xff] %v3424_v26  ;;  %2746 = vmatmul.msk.bf16.gmra.mxu0 %vm341_vm1, %v3109_v47  ;;  %v748_v22 = vadd.f32 %v747_v19, %v3357_v6  ;;  %v242_v26 = vld [vmem:[%s2898_s24 + $0xf8] sm:$0xff] }
 0x13c   : > { %v932_v35 = vpop.f32.mrf.mxu2 }
 0x13d   : > { %v1005_v50 = vadd.f32 %v932_v35, %v743_v18  ;;  %v834_v35 = vld [vmem:[#allocation2 + $0x122] sm:$0xff] }
 0x13e   : > { %v1154_v29 = vpop.f32.mrf.mxu3 }
 0x13f   : > { %v1227_v31 = vadd.f32 %v1154_v29, %v1005_v50  ;;  %v1057_v50 = vld [vmem:[#allocation2 + $0x140] sm:$0xff]  ;;  %v3445_v29 = vpack.c.bf16 %v835_v34, %v834_v35  ;;  %v275_v35 = vmul.f32 %v2886_v3, %v242_v26 }
 0x140   : > { %v1381_v63 = vpop.f32.mrf.mxu0 }
 0x141   : > { %2712 = vmatmul.msk.bf16.gmra.mxu2 %vm341_vm1, %v3429_v62  ;;  %v3435_v7 = vadd.f32 %v1376_v24, %v1227_v31 }
 0x142   : > { %v750_v61 = vpop.f32.mrf.mxu1 }
 0x143   : > { %3867 = vst [vmem:[#allocation17_spill] sm:$0xff] %v3435_v7  ;;  %2729 = vmatmul.msk.bf16.gmra.mxu3 %vm341_vm1, %v3431_v46 }
 0x144   : > { %v935_v47 = vpop.f32.mrf.mxu2 }
 0x145   : > { %v1006_v6 = vadd.f32 %v935_v47, %v746_v10  ;;  %2696 = vmatmul.msk.bf16.gmra.mxu1 %vm341_vm1, %v3431_v46 }
 0x146   : > { %v1157_v18 = vpop.f32.mrf.mxu3 }
 0x147   : > { %v1228_v17 = vadd.f32 %v1157_v18, %v1006_v6  ;;  %v3447_v6 = vpack.c.bf16 %v1057_v50, %v1056_v12 }
 0x148   : > { %v1384_v15 = vpop.f32.mrf.mxu0 }
 0x149   : > { %v3441_v19 = vadd.f32 %v1379_v52, %v1228_v17 }
 0x14a   : > { %v752_v24 = vpop.f32.mrf.mxu1 }
 0x14b   : > { %3868 = vst [vmem:[#allocation18_spill] sm:$0xff] %v3441_v19  ;;  %2747 = vmatmul.msk.bf16.gmra.mxu0 %vm341_vm1, %v3162_v39  ;;  %v241_v19 = vld [vmem:[%s2898_s24 + $0xf0] sm:$0xff]  ;;  %v751_v39 = vadd.f32 %v750_v61, %v3253_v43 }
 0x14c   : > { %v937_v31 = vpop.f32.mrf.mxu2 }
 0x14d   : > { %v1007_v10 = vadd.f32 %v937_v31, %v748_v22  ;;  %v274_v22 = vmul.f32 %v2886_v3, %v241_v19  ;;  %v836_v19 = vld [vmem:[#allocation2 + $0x13a] sm:$0xff]  ;;  %v837_v3 = vld [vmem:[#allocation2 + $0x142] sm:$0xff] }
 0x14e   : > { %v1159_v47 = vpop.f32.mrf.mxu3 }
 0x14f   : > { %v1229_v7 = vadd.f32 %v1159_v47, %v1007_v10 }
 0x150   : > { %v1386_v52 = vpop.f32.mrf.mxu0 }
 0x151   : > { %2713 = vmatmul.msk.bf16.gmra.mxu2 %vm341_vm1, %v3445_v29  ;;  %v3451_v18 = vadd.f32 %v1381_v63, %v1229_v7  ;;  %v307_v63 = vadd.f32 %v2900_v5, %v274_v22  ;;  %v308_v7 = vadd.f32 %v2900_v5, %v275_v35  ;;  %v1058_v22 = vld [vmem:[#allocation2 + $0x150] sm:$0xff]  ;;  %v1059_v35 = vld [vmem:[#allocation2 + $0x158] sm:$0xff] }
 0x152   : > { %v755_v17 = vpop.f32.mrf.mxu1 }
 0x153   : > { %2730 = vmatmul.msk.bf16.gmra.mxu3 %vm341_vm1, %v3447_v6  ;;  %v339_v10 = vmax.f32 %v307_v63, 0.0  ;;  %v340_v43 = vmax.f32 %v308_v7, 0.0 }
 0x154   : > { %v940_v34 = vpop.f32.mrf.mxu2 }
 0x155   : > { %v1008_v31 = vadd.f32 %v940_v34, %v751_v39  ;;  %2697 = vmatmul.msk.bf16.gmra.mxu1 %vm341_vm1, %v3447_v6  ;;  %428 = vst.msk [vmem:[#allocation2 + $0x181] sm:$0xff] %vm341_vm1, %v339_v10  ;;  %v753_v39 = vadd.f32 %v752_v24, %v3265_v16  ;;  %v756_v16 = vadd.f32 %v755_v17, %v3277_v59  ;;  %v1060_v17 = vld [vmem:[#allocation2 + $0x168] sm:$0xff] }
 0x156   : > { %v1162_v12 = vpop.f32.mrf.mxu3  ;;  %429 = vst.msk [vmem:[#allocation2 + $0x189] sm:$0xff] %vm341_vm1, %v340_v43 }
 0x157   : > { %v1230_v50 = vadd.f32 %v1162_v12, %v1008_v31  ;;  %v3471_v31 = vpack.c.bf16 %v837_v3, %v836_v19 }
 0x158   : > { %v1389_v61 = vpop.f32.mrf.mxu0 }
 0x159   : > { %v3465_v47 = vadd.f32 %v1384_v15, %v1230_v50  ;;  %v1077_v15 = vpack.c.bf16 %v1059_v35, %v1058_v22  ;;  %v839_v22 = vld [vmem:[#allocation2 + $0x15a] sm:$0xff] }
 0x15a   : > { %v757_v26 = vpop.f32.mrf.mxu1 }
 0x15b   : > { %2748 = vmatmul.msk.bf16.gmra.mxu0 %vm341_vm1, %v3181_v53 }
 0x15c   : > { %v942_v5 = vpop.f32.mrf.mxu2 }
 0x15d   : > { %v1009_v34 = vadd.f32 %v942_v5, %v753_v39  ;;  %v838_v5 = vld [vmem:[#allocation2 + $0x152] sm:$0xff] }
 0x15e   : > { %v1164_v63 = vpop.f32.mrf.mxu3 }
 0x15f   : > { %v1231_v7 = vadd.f32 %v1164_v63, %v1009_v34  ;;  %v1061_v34 = vld [vmem:[#allocation2 + $0x170] sm:$0xff] }
 0x160   : > { %v1391_v12 = vpop.f32.mrf.mxu0 }
 0x161   : > { %2714 = vmatmul.msk.bf16.gmra.mxu2 %vm341_vm1, %v3471_v31  ;;  %v3475_v50 = vadd.f32 %v1386_v52, %v1231_v7  ;;  %v758_v52 = vadd.f32 %v757_v26, %v3289_v0  ;;  %v3485_v7 = vpack.c.bf16 %v839_v22, %v838_v5  ;;  %v1284_v26 = vld [vmem:[#allocation2 + $0x181] sm:$0xff] }
 0x162   : > { %v760_v10 = vpop.f32.mrf.mxu1 }
 0x163   : > { %3869 = vst [vmem:[#allocation19_spill] sm:$0xff] %v3475_v50  ;;  %2731 = vmatmul.msk.bf16.gmra.mxu3 %vm341_vm1, %v1077_v15  ;;  %v761_v0 = vadd.f32 %v760_v10, %v3305_v14  ;;  %v1062_v10 = vld [vmem:[#allocation2 + $0x180] sm:$0xff] }
 0x164   : > { %v945_v53 = vpop.f32.mrf.mxu2 }
 0x165   : > { %v1010_v24 = vadd.f32 %v945_v53, %v756_v16  ;;  %2698 = vmatmul.msk.bf16.gmra.mxu1 %vm341_vm1, %v1077_v15  ;;  %v1078_v53 = vpack.c.bf16 %v1061_v34, %v1060_v17 }
 0x166   : > { %v1167_v43 = vpop.f32.mrf.mxu3 }
 0x167   : > { %v1232_v19 = vadd.f32 %v1167_v43, %v1010_v24 }
 0x168   : > { %v1394_v3 = vpop.f32.mrf.mxu0 }
 0x169   : > { %v3480_v39 = vadd.f32 %v1389_v61, %v1232_v19  ;;  %v1285_v19 = vld [vmem:[#allocation2 + $0x189] sm:$0xff] }
 0x16a   : > { %v762_v35 = vpop.f32.mrf.mxu1 }
 0x16b   : > { %3870 = vst [vmem:[#allocation20_spill] sm:$0xff] %v3480_v39  ;;  %2749 = vmatmul.msk.bf16.gmra.mxu0 %vm341_vm1, %v3213_v13 }
 0x16c   : > { %v947_v59 = vpop.f32.mrf.mxu2 }
 0x16d   : > { %v1011_v63 = vadd.f32 %v947_v59, %v758_v52  ;;  %v1301_v59 = vpack.c.bf16 %v1285_v19, %v1284_v26 }
 0x16e   : > { %v1169_v15 = vpop.f32.mrf.mxu3 }
 0x16f   : > { %v1233_v16 = vadd.f32 %v1169_v15, %v1011_v63  ;;  %v840_v63 = vld [vmem:[#allocation2 + $0x16a] sm:$0xff] }
 0x170   : > { %v1396_v24 = vpop.f32.mrf.mxu0 }
 0x171   : > { %2715 = vmatmul.msk.bf16.gmra.mxu2 %vm341_vm1, %v3485_v7  ;;  %v3489_v61 = vadd.f32 %v1391_v12, %v1233_v16  ;;  %v841_v12 = vld [vmem:[#allocation2 + $0x172] sm:$0xff]  ;;  %v763_v16 = vadd.f32 %v762_v35, %v3317_v20 }
 0x172   : > { %v765_v43 = vpop.f32.mrf.mxu1 }
 0x173   : > { %3871 = vst [vmem:[#allocation21_spill] sm:$0xff] %v3489_v61  ;;  %2732 = vmatmul.msk.bf16.gmra.mxu3 %vm341_vm1, %v1078_v53  ;;  %v1063_v61 = vld [vmem:[#allocation2 + $0x188] sm:$0xff]  ;;  %v766_v19 = vadd.f32 %v765_v43, %v3333_v30 }
 0x174   : > { %v950_v13 = vpop.f32.mrf.mxu2  ;;  %v1079_v50 = vpack.c.bf16 %v1063_v61, %v1062_v10 }
 0x175   : > { %v1012_v52 = vadd.f32 %v950_v13, %v761_v0  ;;  %2699 = vmatmul.msk.bf16.gmra.mxu1 %vm341_vm1, %v1078_v53  ;;  %v857_v0 = vpack.c.bf16 %v841_v12, %v840_v63 }
 0x176   : > { %v1172_v5 = vpop.f32.mrf.mxu3 }
 0x177   : > { %v1234_v22 = vadd.f32 %v1172_v5, %v1012_v52 }
 0x178   : > { %v1399_v17 = vpop.f32.mrf.mxu0 }
 0x179   : > { %v3494_v34 = vadd.f32 %v1394_v3, %v1234_v22 }
 0x17a   : > { %v767_v15 = vpop.f32.mrf.mxu1 }
 0x17b   : > { %2750 = vmatmul.msk.bf16.gmra.mxu0 %vm341_vm1, %v1301_v59  ;;  %v768_v63 = vadd.f32 %v767_v15, %v3345_v38 }
 0x17c   : > { %v952_v14 = vpop.f32.mrf.mxu2 }
 0x17d   : > { %v1013_v39 = vadd.f32 %v952_v14, %v763_v16 }
 0x17e   : > { %v1174_v13 = vpop.f32.mrf.mxu3 }
 0x17f   : > { %v1235_v53 = vadd.f32 %v1174_v13, %v1013_v39 }
 0x180   : > { %v1401_v52 = vpop.f32.mrf.mxu0 }
 0x181   : > { %2716 = vmatmul.msk.bf16.gmra.mxu2 %vm341_vm1, %v857_v0  ;;  %v3499_v3 = vadd.f32 %v1396_v24, %v1235_v53 }
 0x182   : > { %v770_v26 = vpop.f32.mrf.mxu1 }
 0x183   : > { %2733 = vmatmul.msk.bf16.gmra.mxu3 %vm341_vm1, %v1079_v50 }
 0x184   : > { %v955_v20 = vpop.f32.mrf.mxu2 }
 0x185   : > { %v1014_v35 = vadd.f32 %v955_v20, %v766_v19  ;;  %2752 = vmatmul.msk.bf16.vlgmr.msra.gmra.mxu1 %vm341_vm1, %v3227_v27 }
 0x186   : > { %v1177_v5 = vpop.f32.mrf.mxu3 }
 0x187   : > { %v1236_v22 = vadd.f32 %v1177_v5, %v1014_v35 }
 0x188   : > { %v1404_v59 = vpop.f32.mrf.mxu0 }
 0x189   : > { %v3505_v39 = vadd.f32 %v1399_v17, %v1236_v22  ;;  %v771_v17 = vadd.f32 %v770_v26, %v3281_v60 }
 0x18a   : > { %v772_v61 = vpop.f32.mrf.mxu1 }
 0x18b   : > { %2803 = vmatmul.msk.bf16.vlgmr.msra.gmra.mxu0 %vm341_vm1, %v3239_v32 }
 0x18c   : > { %v957_v24 = vpop.f32.mrf.mxu2 }
 0x18d   : > { %v1015_v30 = vadd.f32 %v957_v24, %v768_v63 }
 0x18e   : > { %v1179_v43 = vpop.f32.mrf.mxu3 }
 0x18f   : > { %v1237_v50 = vadd.f32 %v1179_v43, %v1015_v30  ;;  %v1925_v30 = vld [vmem:[#allocation2 + $0x61] sm:$0xff]  ;;  %v1926_v43 = vld [vmem:[#allocation2 + $0x69] sm:$0xff] }
 0x190   : > { %v1406_v12 = vpop.f32.mrf.mxu0 }
 0x191   : > { %2769 = vmatmul.msk.bf16.vlgmr.msra.gmra.mxu2 %vm341_vm1, %v3229_v23  ;;  %v3512_v27 = vadd.f32 %v1401_v52, %v1237_v50  ;;  %v773_v23 = vadd.f32 %v772_v61, %v3293_v1 }
 0x192   : > { %v775_v16 = vpop.f32.mrf.mxu1 }
 0x193   : > { %2786 = vmatmul.msk.bf16.vlgmr.msra.gmra.mxu3 %vm341_vm1, %v3175_v44  ;;  %v776_v35 = vadd.f32 %v775_v16, %v3309_v41  ;;  %v1955_v16 = vpack.c.bf16 %v1926_v43, %v1925_v30 }
 0x194   : > { %v960_v38 = vpop.f32.mrf.mxu2 }
 0x195   : > { %v1016_v15 = vadd.f32 %v960_v38, %v771_v17  ;;  %2753 = vmatmul.msk.bf16.gmra.mxu1 %vm341_vm1, %v3239_v32 }
 0x196   : > { %v1182_v14 = vpop.f32.mrf.mxu3 }
 0x197   : > { %v1238_v10 = vadd.f32 %v1182_v14, %v1016_v15 }
 0x198   : > { %v1409_v0 = vpop.f32.mrf.mxu0 }
 0x199   : > { %v3519_v13 = vadd.f32 %v1404_v59, %v1238_v10 }
 0x19a   : > { %v777_v53 = vpop.f32.mrf.mxu1 }
 0x19b   : > { %2804 = vmatmul.msk.bf16.gmra.mxu0 %vm341_vm1, %v3251_v42 }
 0x19c   : > { %v962_v60 = vpop.f32.mrf.mxu2 }
 0x19d   : > { %v1017_v52 = vadd.f32 %v962_v60, %v773_v23 }
 0x19e   : > { %v1184_v26 = vpop.f32.mrf.mxu3 }
 0x19f   : > { %v1239_v44 = vadd.f32 %v1184_v26, %v1017_v52  ;;  %v1928_v26 = vld [vmem:[#allocation2 + $0x81] sm:$0xff] }
 0x1a0   : > { %v1411_v19 = vpop.f32.mrf.mxu0 }
 0x1a1   : > { %2770 = vmatmul.msk.bf16.gmra.mxu2 %vm341_vm1, %v3241_v33  ;;  %v3526_v32 = vadd.f32 %v1406_v12, %v1239_v44  ;;  %v778_v33 = vadd.f32 %v777_v53, %v3321_v21 }
 0x1a2   : > { %v780_v20 = vpop.f32.mrf.mxu1 }
 0x1a3   : > { %2787 = vmatmul.msk.bf16.gmra.mxu3 %vm341_vm1, %v3207_v2  ;;  %v781_v15 = vadd.f32 %v780_v20, %v3337_v54  ;;  %v1927_v54 = vld [vmem:[#allocation2 + $0x79] sm:$0xff] }
 0x1a4   : > { %v965_v1 = vpop.f32.mrf.mxu2 }
 0x1a5   : > { %v1018_v5 = vadd.f32 %v965_v1, %v776_v35  ;;  %2754 = vmatmul.msk.bf16.gmra.mxu1 %vm341_vm1, %v3251_v42  ;;  %v1956_v35 = vpack.c.bf16 %v1928_v26, %v1927_v54  ;;  %v1932_v26 = vld [vmem:[#allocation2 + $0xb1] sm:$0xff] }
 0x1a6   : > { %v1187_v22 = vpop.f32.mrf.mxu3 }
 0x1a7   : > { %v1240_v59 = vadd.f32 %v1187_v22, %v1018_v5 }
 0x1a8   : > { %v1414_v61 = vpop.f32.mrf.mxu0 }
 0x1a9   : > { %v3533_v63 = vadd.f32 %v1409_v0, %v1240_v59 }
 0x1aa   : > { %v782_v24 = vpop.f32.mrf.mxu1 }
 0x1ab   : > { %2805 = vmatmul.msk.bf16.gmra.mxu0 %vm341_vm1, %v3269_v56 }
 0x1ac   : > { %v967_v41 = vpop.f32.mrf.mxu2 }
 0x1ad   : > { %v1019_v2 = vadd.f32 %v967_v41, %v778_v33 }
 0x1ae   : > { %v1189_v50 = vpop.f32.mrf.mxu3 }
 0x1af   : > { %v1241_v12 = vadd.f32 %v1189_v50, %v1019_v2  ;;  %v1930_v2 = vld [vmem:[#allocation2 + $0x99] sm:$0xff] }
 0x1b0   : > { %v1416_v17 = vpop.f32.mrf.mxu0 }
 0x1b1   : > { %2771 = vmatmul.msk.bf16.gmra.mxu2 %vm341_vm1, %v3255_v45  ;;  %v3540_v42 = vadd.f32 %v1411_v19, %v1241_v12  ;;  %v783_v45 = vadd.f32 %v782_v24, %v3349_v48 }
 0x1b2   : > { %v785_v38 = vpop.f32.mrf.mxu1 }
 0x1b3   : > { %2788 = vmatmul.msk.bf16.gmra.mxu3 %vm341_vm1, %v1955_v16  ;;  %v786_v22 = vadd.f32 %v785_v38, %v3363_v40  ;;  %v1929_v40 = vld [vmem:[#allocation2 + $0x91] sm:$0xff] }
 0x1b4   : > { %v970_v21 = vpop.f32.mrf.mxu2 }
 0x1b5   : > { %v1020_v14 = vadd.f32 %v970_v21, %v781_v15  ;;  %2755 = vmatmul.msk.bf16.gmra.mxu1 %vm341_vm1, %v3269_v56 }
 0x1b6   : > { %v1192_v10 = vpop.f32.mrf.mxu3 }
 0x1b7   : > { %v1242_v0 = vadd.f32 %v1192_v10, %v1020_v14 }
 0x1b8   : > { %v1419_v53 = vpop.f32.mrf.mxu0 }
 0x1b9   : > { %v3546_v23 = vadd.f32 %v1414_v61, %v1242_v0 }
 0x1ba   : > { %v787_v60 = vpop.f32.mrf.mxu1 }
 0x1bb   : > { %2806 = vmatmul.msk.bf16.gmra.mxu0 %vm341_vm1, %v3295_v8 }
 0x1bc   : > { %v972_v52 = vpop.f32.mrf.mxu2 }
 0x1bd   : > { %v1021_v44 = vadd.f32 %v972_v52, %v783_v45  ;;  %v3872_v52 = vld [vmem:[#allocation7_spill] sm:$0xff] }
 0x1be   : > { %v1194_v19 = vpop.f32.mrf.mxu3 }
 0x1bf   : > { %v1243_v20 = vadd.f32 %v1194_v19, %v1021_v44 }
 0x1c0   : > { %v1421_v1 = vpop.f32.mrf.mxu0 }
 0x1c1   : > { %2772 = vmatmul.msk.bf16.gmra.mxu2 %vm341_vm1, %v3273_v58  ;;  %v3553_v56 = vadd.f32 %v1416_v17, %v1243_v20  ;;  %v788_v58 = vadd.f32 %v787_v60, %v3372_v49  ;;  %v1957_v17 = vpack.c.bf16 %v1930_v2, %v1929_v40  ;;  %v3875_v40 = vld [vmem:[#allocation4_spill] sm:$0xff] }
 0x1c2   : > { %v790_v5 = vpop.f32.mrf.mxu1 }
 0x1c3   : > { %2789 = vmatmul.msk.bf16.gmra.mxu3 %vm341_vm1, %v1956_v35  ;;  %v791_v21 = vadd.f32 %v790_v5, %v3285_v55  ;;  %v1931_v55 = vld [vmem:[#allocation2 + $0xa9] sm:$0xff] }
 0x1c4   : > { %v975_v48 = vpop.f32.mrf.mxu2  ;;  %v1958_v35 = vpack.c.bf16 %v1932_v26, %v1931_v55 }
 0x1c5   : > { %v1022_v59 = vadd.f32 %v975_v48, %v786_v22  ;;  %2756 = vmatmul.msk.bf16.gmra.mxu1 %vm341_vm1, %v3295_v8  ;;  %v3874_v48 = vld [vmem:[#allocation3_spill] sm:$0xff] }
 0x1c6   : > { %v1197_v61 = vpop.f32.mrf.mxu3 }
 0x1c7   : > { %v1244_v24 = vadd.f32 %v1197_v61, %v1022_v59 }
 0x1c8   : > { %v1424_v33 = vpop.f32.mrf.mxu0 }
 0x1c9   : > { %v3559_v41 = vadd.f32 %v1419_v53, %v1244_v24 }
 0x1ca   : > { %v792_v30 = vpop.f32.mrf.mxu1 }
 0x1cb   : > { %2807 = vmatmul.msk.bf16.gmra.mxu0 %vm341_vm1, %v3323_v25 }
 0x1cc   : > { %v977_v43 = vpop.f32.mrf.mxu2 }
 0x1cd   : > { %v1023_v50 = vadd.f32 %v977_v43, %v788_v58 }
 0x1ce   : > { %v1199_v12 = vpop.f32.mrf.mxu3 }
 0x1cf   : > { %v1245_v16 = vadd.f32 %v1199_v12, %v1023_v50  ;;  %v3876_v50 = vld [vmem:[#allocation11_spill] sm:$0xff] }
 0x1d0   : > { %v1426_v38 = vpop.f32.mrf.mxu0 }
 0x1d1   : > { %2773 = vmatmul.msk.bf16.gmra.mxu2 %vm341_vm1, %v3299_v11  ;;  %v3566_v8 = vadd.f32 %v1421_v1, %v1245_v16  ;;  %v793_v11 = vadd.f32 %v792_v30, %v3297_v9  ;;  %v1933_v16 = vld [vmem:[#allocation2 + $0xc1] sm:$0xff] }
 0x1d2   : > { %v795_v15 = vpop.f32.mrf.mxu1 }
 0x1d3   : > { %2790 = vmatmul.msk.bf16.gmra.mxu3 %vm341_vm1, %v1957_v17  ;;  %v796_v59 = vadd.f32 %v795_v15, %v3874_v48  ;;  %v1934_v17 = vld [vmem:[#allocation2 + $0xc9] sm:$0xff]  ;;  %v1936_v48 = vld [vmem:[#allocation2 + $0xe1] sm:$0xff] }
 0x1d4   : > { %v980_v49 = vpop.f32.mrf.mxu2 }
 0x1d5   : > { %v1024_v14 = vadd.f32 %v980_v49, %v791_v21  ;;  %2757 = vmatmul.msk.bf16.gmra.mxu1 %vm341_vm1, %v3323_v25  ;;  %v3873_v25 = vld [vmem:[#allocation5_spill] sm:$0xff]  ;;  %v1959_v49 = vpack.c.bf16 %v1934_v17, %v1933_v16 }
 0x1d6   : > { %v1202_v10 = vpop.f32.mrf.mxu3 }
 0x1d7   : > { %v1246_v0 = vadd.f32 %v1202_v10, %v1024_v14  ;;  %v3877_v10 = vld [vmem:[#allocation9_spill] sm:$0xff] }
 0x1d8   : > { %v1429_v53 = vpop.f32.mrf.mxu0 }
 0x1d9   : > { %v3572_v60 = vadd.f32 %v1424_v33, %v1246_v0 }
 0x1da   : > { %v797_v45 = vpop.f32.mrf.mxu1 }
 0x1db   : > { %2808 = vmatmul.msk.bf16.gmra.mxu0 %vm341_vm1, %v3872_v52  ;;  %v798_v2 = vadd.f32 %v797_v45, %v3875_v40  ;;  %v3880_v40 = vld [vmem:[#allocation13_spill] sm:$0xff] }
 0x1dc   : > { %v982_v54 = vpop.f32.mrf.mxu2 }
 0x1dd   : > { %v1025_v44 = vadd.f32 %v982_v54, %v793_v11  ;;  %v3878_v11 = vld [vmem:[#allocation6_spill] sm:$0xff] }
 0x1de   : > { %v1204_v19 = vpop.f32.mrf.mxu3 }
 0x1df   : > { %v1247_v20 = vadd.f32 %v1204_v19, %v1025_v44 }
 0x1e0   : > { %v1431_v1 = vpop.f32.mrf.mxu0 }
 0x1e1   : > { %2774 = vmatmul.msk.bf16.gmra.mxu2 %vm341_vm1, %v3873_v25  ;;  %v3579_v5 = vadd.f32 %v1426_v38, %v1247_v20 }
 0x1e2   : > { %v800_v22 = vpop.f32.mrf.mxu1 }
 0x1e3   : > { %2791 = vmatmul.msk.bf16.gmra.mxu3 %vm341_vm1, %v1958_v35  ;;  %v3879_v35 = vld [vmem:[#allocation8_spill] sm:$0xff] }
 0x1e4   : > { %v985_v9 = vpop.f32.mrf.mxu2 }
 0x1e5   : > { %v1026_v61 = vadd.f32 %v985_v9, %v796_v59  ;;  %2758 = vmatmul.msk.bf16.gmra.mxu1 %vm341_vm1, %v3872_v52  ;;  %v801_v52 = vadd.f32 %v800_v22, %v3878_v11  ;;  %v1935_v22 = vld [vmem:[#allocation2 + $0xd9] sm:$0xff] }
 0x1e6   : > { %v1207_v24 = vpop.f32.mrf.mxu3 }
 0x1e7   : > { %v1248_v33 = vadd.f32 %v1207_v24, %v1026_v61  ;;  %v1960_v24 = vpack.c.bf16 %v1936_v48, %v1935_v22 }
 0x1e8   : > { %v1434_v30 = vpop.f32.mrf.mxu0 }
 0x1e9   : > { %v3585_v58 = vadd.f32 %v1429_v53, %v1248_v33 }
 0x1ea   : > { %v802_v43 = vpop.f32.mrf.mxu1 }
 0x1eb   : > { %2809 = vmatmul.msk.bf16.gmra.mxu0 %vm341_vm1, %v3876_v50  ;;  %v803_v25 = vadd.f32 %v802_v43, %v3879_v35 }
 0x1ec   : > { %v987_v12 = vpop.f32.mrf.mxu2 }
 0x1ed   : > { %v1027_v38 = vadd.f32 %v987_v12, %v798_v2 }
 0x1ee   : > { %v1209_v15 = vpop.f32.mrf.mxu3 }
 0x1ef   : > { %v1249_v21 = vadd.f32 %v1209_v15, %v1027_v38 }
 0x1f0   : > { %v1436_v14 = vpop.f32.mrf.mxu0 }
 0x1f1   : > { %2775 = vmatmul.msk.bf16.gmra.mxu2 %vm341_vm1, %v3877_v10  ;;  %v3592_v0 = vadd.f32 %v1431_v1, %v1249_v21  ;;  %v3882_v10 = vld [vmem:[#allocation12_spill] sm:$0xff] }
 0x1f2   : > { %v805_v53 = vpop.f32.mrf.mxu1 }
 0x1f3   : > { %2792 = vmatmul.msk.bf16.gmra.mxu3 %vm341_vm1, %v1959_v49 }
 0x1f4   : > { %v990_v45 = vpop.f32.mrf.mxu2 }
 0x1f5   : > { %v1028_v54 = vadd.f32 %v990_v45, %v801_v52  ;;  %2759 = vmatmul.msk.bf16.gmra.mxu1 %vm341_vm1, %v3876_v50  ;;  %v3881_v50 = vld [vmem:[#allocation10_spill] sm:$0xff]  ;;  %v1938_v52 = vld [vmem:[#allocation2 + $0xf9] sm:$0xff] }
 0x1f6   : > { %v1212_v55 = vpop.f32.mrf.mxu3  ;;  %v806_v12 = vadd.f32 %v805_v53, %v3881_v50  ;;  %v1937_v53 = vld [vmem:[#allocation2 + $0xf1] sm:$0xff] }
 0x1f7   : > { %v1250_v26 = vadd.f32 %v1212_v55, %v1028_v54 }
 0x1f8   : > { %v1439_v44 = vpop.f32.mrf.mxu0 }
 0x1f9   : > { %v3598_v19 = vadd.f32 %v1434_v30, %v1250_v26  ;;  %v1961_v26 = vpack.c.bf16 %v1938_v52, %v1937_v53 }
 0x1fa   : > { %v807_v20 = vpop.f32.mrf.mxu1 }
 0x1fb   : > { %2810 = vmatmul.msk.bf16.gmra.mxu0 %vm341_vm1, %v3393_v57  ;;  %v808_v11 = vadd.f32 %v807_v20, %v3882_v10 }
 0x1fc   : > { %v992_v1 = vpop.f32.mrf.mxu2 }
 0x1fd   : > { %v1029_v59 = vadd.f32 %v992_v1, %v803_v25 }
 0x1fe   : > { %v1214_v9 = vpop.f32.mrf.mxu3 }
 0x1ff   : > { %v1251_v61 = vadd.f32 %v1214_v9, %v1029_v59 }
 0x200   : > { %v1441_v33 = vpop.f32.mrf.mxu0 }
 0x201   : > { %2776 = vmatmul.msk.bf16.gmra.mxu2 %vm341_vm1, %v3880_v40  ;;  %v3605_v2 = vadd.f32 %v1436_v14, %v1251_v61 }
 0x202   : > { %v1586_v30 = vpop.f32.mrf.mxu1 }
 0x203   : > { %2793 = vmatmul.msk.bf16.gmra.mxu3 %vm341_vm1, %v1960_v24  ;;  %v1666_v20 = vadd.f32 %v1586_v30, %v3388_v51  ;;  %v3883_v51 = vld [vmem:[#allocation14_spill] sm:$0xff] }
 0x204   : > { %v995_v43 = vpop.f32.mrf.mxu2  ;;  %v1939_v24 = vld [vmem:[#allocation2 + $0x109] sm:$0xff] }
 0x205   : > { %v1030_v16 = vadd.f32 %v995_v43, %v806_v12  ;;  %2760 = vmatmul.msk.bf16.gmra.mxu1 %vm341_vm1, %v3393_v57 }
 0x206   : > { %v1217_v17 = vpop.f32.mrf.mxu3 }
 0x207   : > { %v1252_v38 = vadd.f32 %v1217_v17, %v1030_v16 }
 0x208   : > { %v2253_v15 = vpop.f32.mrf.mxu0 }
 0x209   : > { %v3611_v21 = vadd.f32 %v1439_v44, %v1252_v38 }
 0x20a   : > { %v1588_v49 = vpop.f32.mrf.mxu1 }
 0x20b   : > { %2811 = vmatmul.msk.bf16.gmra.mxu0 %vm341_vm1, %v3411_v4  ;;  %v1667_v61 = vadd.f32 %v1588_v49, %v3883_v51  ;;  %v1942_v51 = vld [vmem:[#allocation2 + $0x129] sm:$0xff] }
 0x20c   : > { %v997_v14 = vpop.f32.mrf.mxu2 }
 0x20d   : > { %v1031_v45 = vadd.f32 %v997_v14, %v808_v11 }
 0x20e   : > { %v1219_v54 = vpop.f32.mrf.mxu3 }
 0x20f   : > { %v1253_v55 = vadd.f32 %v1219_v54, %v1031_v45 }
 0x210   : > { %v2255_v57 = vpop.f32.mrf.mxu0 }
 0x211   : > { %2777 = vmatmul.msk.bf16.gmra.mxu2 %vm341_vm1, %v3395_v36  ;;  %v3618_v44 = vadd.f32 %v1441_v33, %v1253_v55  ;;  %v1940_v33 = vld [vmem:[#allocation2 + $0x111] sm:$0xff] }
 0x212   : > { %v1591_v35 = vpop.f32.mrf.mxu1  ;;  %v1962_v12 = vpack.c.bf16 %v1940_v33, %v1939_v24 }
 0x213   : > { %2794 = vmatmul.msk.bf16.gmra.mxu3 %vm341_vm1, %v1961_v26  ;;  %v1668_v11 = vadd.f32 %v1591_v35, %v3406_v37 }
 0x214   : > { %v1809_v25 = vpop.f32.mrf.mxu2 }
 0x215   : > { %v1889_v1 = vadd.f32 %v1809_v25, %v1666_v20  ;;  %2761 = vmatmul.msk.bf16.gmra.mxu1 %vm341_vm1, %v3411_v4 }
 0x216   : > { %v2031_v22 = vpop.f32.mrf.mxu3 }
 0x217   : > { %v2111_v48 = vadd.f32 %v2031_v22, %v1889_v1  ;;  %v3884_v1 = vld [vmem:[#allocation15_spill] sm:$0xff] }
 0x218   : > { %v2258_v36 = vpop.f32.mrf.mxu0 }
 0x219   : > { %v2333_v59 = vadd.f32 %v2253_v15, %v2111_v48 }
 0x21a   : > { %v1593_v9 = vpop.f32.mrf.mxu1 }
 0x21b   : > { %2365 = vst.msk [vmem:[%s3629_s19] sm:$0xff] %vm341_vm1, %v2333_v59  ;;  %2812 = vmatmul.msk.bf16.gmra.mxu0 %vm341_vm1, %v3429_v62  ;;  %v2469_v16 = vmul.f32 %v2333_v59, %v2333_v59  ;;  %v2398_v15 = vsel %vm341_vm1, %v2333_v59, 0.0  ;;  %v1669_v22 = vadd.f32 %v1593_v9, %v3884_v1 }
 0x21c   : > { %v1811_v4 = vpop.f32.mrf.mxu2 }
 0x21d   : > { %v1890_v40 = vadd.f32 %v1811_v4, %v1667_v61  ;;  %v2501_v52 = vsel %vm341_vm1, %v2469_v16, 0.0 }
 0x21e   : > { %v2033_v30 = vpop.f32.mrf.mxu3 }
 0x21f   : > { %v2112_v50 = vadd.f32 %v2033_v30, %v1890_v40 }
 0x220   : > { %v2260_v43 = vpop.f32.mrf.mxu0 }
 0x221   : > { %v2334_v17 = vadd.f32 %v2255_v57, %v2112_v50  ;;  %2778 = vmatmul.msk.bf16.gmra.mxu2 %vm341_vm1, %v3413_v28 }
 0x222   : > { %v1596_v38 = vpop.f32.mrf.mxu1 }
 0x223   : > { %2366 = vst.msk [vmem:[%s3629_s19 + $0x8] sm:$0xff] %vm341_vm1, %v2334_v17  ;;  %v2399_v49 = vsel %vm341_vm1, %v2334_v17, 0.0  ;;  %v2470_v10 = vmul.f32 %v2334_v17, %v2334_v17  ;;  %2795 = vmatmul.msk.bf16.gmra.mxu3 %vm341_vm1, %v1962_v12  ;;  %v3885_v17 = vld [vmem:[#allocation16_spill] sm:$0xff] }
 0x224   : > { %v2400_v14 = vadd.f32 %v2399_v49, %v2398_v15  ;;  %v1814_v53 = vpop.f32.mrf.mxu2  ;;  %v1670_v15 = vadd.f32 %v1596_v38, %v3885_v17 }
 0x225   : > { %v2502_v45 = vsel %vm341_vm1, %v2470_v10, 0.0  ;;  %v1891_v28 = vadd.f32 %v1814_v53, %v1668_v11  ;;  %2762 = vmatmul.msk.bf16.gmra.mxu1 %vm341_vm1, %v3429_v62  ;;  %v1941_v62 = vld [vmem:[#allocation2 + $0x121] sm:$0xff] }
 0x226   : > { %v2503_v54 = vadd.f32 %v2502_v45, %v2501_v52  ;;  %v2036_v55 = vpop.f32.mrf.mxu3  ;;  %v1963_v40 = vpack.c.bf16 %v1942_v51, %v1941_v62  ;;  %v1501_v62 = vld [vmem:[#allocation2 + $0x142] sm:$0xff] }
 0x227   : > { %v2113_v26 = vadd.f32 %v2036_v55, %v1891_v28  ;;  %v3886_v55 = vld [vmem:[#allocation17_spill] sm:$0xff] }
 0x228   : > { %v2263_v57 = vpop.f32.mrf.mxu0 }
 0x229   : > { %v2335_v20 = vadd.f32 %v2258_v36, %v2113_v26 }
 0x22a   : > { %v1598_v25 = vpop.f32.mrf.mxu1 }
 0x22b   : > { %2367 = vst.msk [vmem:[%s3629_s19 + $0x10] sm:$0xff] %vm341_vm1, %v2335_v20  ;;  %v2401_v37 = vsel %vm341_vm1, %v2335_v20, 0.0  ;;  %v2471_v35 = vmul.f32 %v2335_v20, %v2335_v20  ;;  %2813 = vmatmul.msk.bf16.gmra.mxu0 %vm341_vm1, %v3445_v29  ;;  %v1671_v26 = vadd.f32 %v1598_v25, %v3886_v55  ;;  %v1945_v55 = vld [vmem:[#allocation2 + $0x151] sm:$0xff] }
 0x22c   : > { %v2402_v48 = vadd.f32 %v2401_v37, %v2400_v14  ;;  %v1816_v59 = vpop.f32.mrf.mxu2 }
 0x22d   : > { %v2504_v61 = vsel %vm341_vm1, %v2471_v35, 0.0  ;;  %v1892_v4 = vadd.f32 %v1816_v59, %v1669_v22  ;;  %v1944_v35 = vld [vmem:[#allocation2 + $0x141] sm:$0xff] }
 0x22e   : > { %v2505_v36 = vadd.f32 %v2504_v61, %v2503_v54  ;;  %v2038_v24 = vpop.f32.mrf.mxu3  ;;  %v1500_v59 = vld [vmem:[#allocation2 + $0x13a] sm:$0xff] }
 0x22f   : > { %v2114_v33 = vadd.f32 %v2038_v24, %v1892_v4 }
 0x230   : > { %v2265_v30 = vpop.f32.mrf.mxu0 }
 0x231   : > { %v2336_v50 = vadd.f32 %v2260_v43, %v2114_v33  ;;  %2779 = vmatmul.msk.bf16.gmra.mxu2 %vm341_vm1, %v3431_v46 }
 0x232   : > { %v1601_v9 = vpop.f32.mrf.mxu1 }
 0x233   : > { %2368 = vst.msk [vmem:[%s3629_s19 + $0x18] sm:$0xff] %vm341_vm1, %v2336_v50  ;;  %v2403_v12 = vsel %vm341_vm1, %v2336_v50, 0.0  ;;  %v2472_v16 = vmul.f32 %v2336_v50, %v2336_v50  ;;  %2796 = vmatmul.msk.bf16.gmra.mxu3 %vm341_vm1, %v1963_v40  ;;  %v3887_v40 = vld [vmem:[#allocation18_spill] sm:$0xff] }
 0x234   : > { %v2404_v49 = vadd.f32 %v2403_v12, %v2402_v48  ;;  %v1819_v10 = vpop.f32.mrf.mxu2  ;;  %v1672_v50 = vadd.f32 %v1601_v9, %v3887_v40 }
 0x235   : > { %v2506_v11 = vsel %vm341_vm1, %v2472_v16, 0.0  ;;  %v1893_v14 = vadd.f32 %v1819_v10, %v1670_v15  ;;  %2763 = vmatmul.msk.bf16.gmra.mxu1 %vm341_vm1, %v3445_v29  ;;  %v1943_v29 = vld [vmem:[#allocation2 + $0x139] sm:$0xff] }
 0x236   : > { %v2507_v46 = vadd.f32 %v2506_v11, %v2505_v36  ;;  %v2041_v43 = vpop.f32.mrf.mxu3  ;;  %v1964_v61 = vpack.c.bf16 %v1944_v35, %v1943_v29 }
 0x237   : > { %v2115_v53 = vadd.f32 %v2041_v43, %v1893_v14  ;;  %v1723_v14 = vld [vmem:[#allocation2 + $0x150] sm:$0xff] }
 0x238   : > { %v2268_v52 = vpop.f32.mrf.mxu0 }
 0x239   : > { %v2337_v45 = vadd.f32 %v2263_v57, %v2115_v53 }
 0x23a   : > { %v1603_v28 = vpop.f32.mrf.mxu1 }
 0x23b   : > { %2369 = vst.msk [vmem:[%s3629_s19 + $0x20] sm:$0xff] %vm341_vm1, %v2337_v45  ;;  %v2405_v38 = vsel %vm341_vm1, %v2337_v45, 0.0  ;;  %v2473_v54 = vmul.f32 %v2337_v45, %v2337_v45  ;;  %2814 = vmatmul.msk.bf16.gmra.mxu0 %vm341_vm1, %v3471_v31  ;;  %v1520_v31 = vpack.c.bf16 %v1501_v62, %v1500_v59  ;;  %v1673_v45 = vadd.f32 %v1603_v28, %v3451_v18 }
 0x23c   : > { %v2406_v20 = vadd.f32 %v2405_v38, %v2404_v49  ;;  %v1821_v37 = vpop.f32.mrf.mxu2 }
 0x23d   : > { %v2508_v1 = vsel %vm341_vm1, %v2473_v54, 0.0  ;;  %v1894_v22 = vadd.f32 %v1821_v37, %v1671_v26  ;;  %v1946_v26 = vld [vmem:[#allocation2 + $0x159] sm:$0xff] }
 0x23e   : > { %v2509_v57 = vadd.f32 %v2508_v1, %v2507_v46  ;;  %v2043_v48 = vpop.f32.mrf.mxu3  ;;  %v1724_v46 = vld [vmem:[#allocation2 + $0x158] sm:$0xff] }
 0x23f   : > { %v2116_v51 = vadd.f32 %v2043_v48, %v1894_v22  ;;  %v1743_v37 = vpack.c.bf16 %v1724_v46, %v1723_v14  ;;  %v1502_v1 = vld [vmem:[#allocation2 + $0x152] sm:$0xff]  ;;  %v1503_v22 = vld [vmem:[#allocation2 + $0x15a] sm:$0xff]  ;;  %v1965_v48 = vpack.c.bf16 %v1946_v26, %v1945_v55 }
 0x240   : > { %v2270_v4 = vpop.f32.mrf.mxu0  ;;  %v3888_v14 = vld [vmem:[#allocation19_spill] sm:$0xff] }
 0x241   : > { %v2338_v36 = vadd.f32 %v2265_v30, %v2116_v51  ;;  %2780 = vmatmul.msk.bf16.gmra.mxu2 %vm341_vm1, %v3447_v6 }
 0x242   : > { %v1606_v25 = vpop.f32.mrf.mxu1 }
 0x243   : > { %2370 = vst.msk [vmem:[%s3629_s19 + $0x28] sm:$0xff] %vm341_vm1, %v2338_v36  ;;  %v2407_v24 = vsel %vm341_vm1, %v2338_v36, 0.0  ;;  %v2474_v33 = vmul.f32 %v2338_v36, %v2338_v36  ;;  %2797 = vmatmul.msk.bf16.gmra.mxu3 %vm341_vm1, %v1964_v61  ;;  %v1674_v61 = vadd.f32 %v1606_v25, %v3465_v47  ;;  %v1726_v47 = vld [vmem:[#allocation2 + $0x170] sm:$0xff] }
 0x244   : > { %v2408_v12 = vadd.f32 %v2407_v24, %v2406_v20  ;;  %v1824_v16 = vpop.f32.mrf.mxu2  ;;  %v2169_v24 = vld [vmem:[#allocation2 + $0x16a] sm:$0xff] }
 0x245   : > { %v2510_v17 = vsel %vm341_vm1, %v2474_v33, 0.0  ;;  %v1895_v30 = vadd.f32 %v1824_v16, %v1672_v50  ;;  %2764 = vmatmul.msk.bf16.gmra.mxu1 %vm341_vm1, %v1520_v31  ;;  %v2170_v33 = vld [vmem:[#allocation2 + $0x172] sm:$0xff] }
 0x246   : > { %v2511_v6 = vadd.f32 %v2510_v17, %v2509_v57  ;;  %v2046_v15 = vpop.f32.mrf.mxu3  ;;  %v2188_v17 = vpack.c.bf16 %v2170_v33, %v2169_v24 }
 0x247   : > { %v2117_v49 = vadd.f32 %v2046_v15, %v1895_v30  ;;  %v1725_v15 = vld [vmem:[#allocation2 + $0x168] sm:$0xff] }
 0x248   : > { %v2273_v10 = vpop.f32.mrf.mxu0  ;;  %v1744_v55 = vpack.c.bf16 %v1726_v47, %v1725_v15  ;;  %v3890_v15 = vld [vmem:[#allocation21_spill] sm:$0xff] }
 0x249   : > { %v2339_v11 = vadd.f32 %v2268_v52, %v2117_v49 }
 0x24a   : > { %v1608_v43 = vpop.f32.mrf.mxu1 }
 0x24b   : > { %2371 = vst.msk [vmem:[%s3629_s19 + $0x30] sm:$0xff] %vm341_vm1, %v2339_v11  ;;  %v2409_v9 = vsel %vm341_vm1, %v2339_v11, 0.0  ;;  %v2475_v53 = vmul.f32 %v2339_v11, %v2339_v11  ;;  %2815 = vmatmul.msk.bf16.gmra.mxu0 %vm341_vm1, %v3485_v7  ;;  %v1521_v7 = vpack.c.bf16 %v1503_v22, %v1502_v1  ;;  %v1675_v46 = vadd.f32 %v1608_v43, %v3888_v14  ;;  %v1950_v14 = vld [vmem:[#allocation2 + $0x189] sm:$0xff] }
 0x24c   : > { %v2410_v38 = vadd.f32 %v2409_v9, %v2408_v12  ;;  %v1826_v54 = vpop.f32.mrf.mxu2 }
 0x24d   : > { %v2512_v52 = vsel %vm341_vm1, %v2475_v53, 0.0  ;;  %v1896_v20 = vadd.f32 %v1826_v54, %v1673_v45  ;;  %v1947_v45 = vld [vmem:[#allocation2 + $0x169] sm:$0xff] }
 0x24e   : > { %v2513_v29 = vadd.f32 %v2512_v52, %v2511_v6  ;;  %v2048_v35 = vpop.f32.mrf.mxu3 }
 0x24f   : > { %v2118_v57 = vadd.f32 %v2048_v35, %v1896_v20 }
 0x250   : > { %v2275_v59 = vpop.f32.mrf.mxu0 }
 0x251   : > { %v2340_v18 = vadd.f32 %v2270_v4, %v2118_v57  ;;  %2781 = vmatmul.msk.bf16.gmra.mxu2 %vm341_vm1, %v1743_v37  ;;  %v3889_v57 = vld [vmem:[#allocation20_spill] sm:$0xff] }
 0x252   : > { %v1611_v28 = vpop.f32.mrf.mxu1 }
 0x253   : > { %2372 = vst.msk [vmem:[%s3629_s19 + $0x38] sm:$0xff] %vm341_vm1, %v2340_v18  ;;  %v2411_v62 = vsel %vm341_vm1, %v2340_v18, 0.0  ;;  %v2476_v51 = vmul.f32 %v2340_v18, %v2340_v18  ;;  %2798 = vmatmul.msk.bf16.gmra.mxu3 %vm341_vm1, %v1965_v48  ;;  %v1676_v48 = vadd.f32 %v1611_v28, %v3889_v57  ;;  %v1728_v28 = vld [vmem:[#allocation2 + $0x188] sm:$0xff] }
 0x254   : > { %v2412_v36 = vadd.f32 %v2411_v62, %v2410_v38  ;;  %v1829_v31 = vpop.f32.mrf.mxu2  ;;  %v1948_v38 = vld [vmem:[#allocation2 + $0x171] sm:$0xff]  ;;  %v2171_v62 = vld [vmem:[#allocation2 + $0x182] sm:$0xff] }
 0x255   : > { %v2514_v4 = vsel %vm341_vm1, %v2476_v51, 0.0  ;;  %v1897_v40 = vadd.f32 %v1829_v31, %v1674_v61  ;;  %2765 = vmatmul.msk.bf16.gmra.mxu1 %vm341_vm1, %v1521_v7  ;;  %v1966_v37 = vpack.c.bf16 %v1948_v38, %v1947_v45  ;;  %v2172_v51 = vld [vmem:[#allocation2 + $0x18a] sm:$0xff] }
 0x256   : > { %v2515_v50 = vadd.f32 %v2514_v4, %v2513_v29  ;;  %v2051_v12 = vpop.f32.mrf.mxu3  ;;  %v2189_v33 = vpack.c.bf16 %v2172_v51, %v2171_v62 }
 0x257   : > { %v2119_v16 = vadd.f32 %v2051_v12, %v1897_v40 }
 0x258   : > { %v2278_v30 = vpop.f32.mrf.mxu0 }
 0x259   : > { %v2341_v6 = vadd.f32 %v2273_v10, %v2119_v16 }
 0x25a   : > { %v1613_v25 = vpop.f32.mrf.mxu1 }
 0x25b   : > { %2373 = vst.msk [vmem:[%s3629_s19 + $0x40] sm:$0xff] %vm341_vm1, %v2341_v6  ;;  %v2413_v49 = vsel %vm341_vm1, %v2341_v6, 0.0  ;;  %v2477_v11 = vmul.f32 %v2341_v6, %v2341_v6  ;;  %2816 = vmatmul.msk.bf16.gmra.mxu0 %vm341_vm1, %v2188_v17  ;;  %v1677_v47 = vadd.f32 %v1613_v25, %v3890_v15 }
 0x25c   : > { %v2414_v9 = vadd.f32 %v2413_v49, %v2412_v36  ;;  %v1831_v53 = vpop.f32.mrf.mxu2 }
 0x25d   : > { %v2516_v54 = vsel %vm341_vm1, %v2477_v11, 0.0  ;;  %v1898_v10 = vadd.f32 %v1831_v53, %v1675_v46  ;;  %v1949_v11 = vld [vmem:[#allocation2 + $0x181] sm:$0xff] }
 0x25e   : > { %v2517_v26 = vadd.f32 %v2516_v54, %v2515_v50  ;;  %v2053_v52 = vpop.f32.mrf.mxu3  ;;  %v1727_v50 = vld [vmem:[#allocation2 + $0x180] sm:$0xff]  ;;  %v1967_v54 = vpack.c.bf16 %v1950_v14, %v1949_v11 }
 0x25f   : > { %v2120_v20 = vadd.f32 %v2053_v52, %v1898_v10 }
 0x260   : > { %v2280_v29 = vpop.f32.mrf.mxu0 }
 0x261   : > { %v2342_v35 = vadd.f32 %v2275_v59, %v2120_v20  ;;  %2782 = vmatmul.msk.bf16.gmra.mxu2 %vm341_vm1, %v1744_v55 }
 0x262   : > { %v1616_v43 = vpop.f32.mrf.mxu1 }
 0x263   : > { %2374 = vst.msk [vmem:[%s3629_s19 + $0x48] sm:$0xff] %vm341_vm1, %v2342_v35  ;;  %v2415_v1 = vsel %vm341_vm1, %v2342_v35, 0.0  ;;  %v2478_v22 = vmul.f32 %v2342_v35, %v2342_v35  ;;  %2799 = vmatmul.msk.bf16.gmra.mxu3 %vm341_vm1, %v1966_v37  ;;  %v1678_v20 = vadd.f32 %v1616_v43, %v3494_v34  ;;  %v1730_v34 = vld [vmem:[#allocation2 + $0x1a0] sm:$0xff] }
 0x264   : > { %v2416_v18 = vadd.f32 %v2415_v1, %v2414_v9  ;;  %v1834_v7 = vpop.f32.mrf.mxu2  ;;  %v1745_v9 = vpack.c.bf16 %v1728_v28, %v1727_v50  ;;  %v2173_v1 = vld [vmem:[#allocation2 + $0x19a] sm:$0xff] }
 0x265   : > { %v2518_v61 = vsel %vm341_vm1, %v2478_v22, 0.0  ;;  %v1899_v59 = vadd.f32 %v1834_v7, %v1676_v48  ;;  %2766 = vmatmul.msk.bf16.gmra.mxu1 %vm341_vm1, %v2188_v17  ;;  %v2174_v22 = vld [vmem:[#allocation2 + $0x1a2] sm:$0xff]  ;;  %v1951_v50 = vld [vmem:[#allocation2 + $0x199] sm:$0xff] }
 0x266   : > { %v2519_v36 = vadd.f32 %v2518_v61, %v2517_v26  ;;  %v2056_v31 = vpop.f32.mrf.mxu3  ;;  %v2190_v62 = vpack.c.bf16 %v2174_v22, %v2173_v1  ;;  %v1952_v28 = vld [vmem:[#allocation2 + $0x1a1] sm:$0xff] }
 0x267   : > { %v2121_v24 = vadd.f32 %v2056_v31, %v1899_v59  ;;  %v1729_v59 = vld [vmem:[#allocation2 + $0x198] sm:$0xff] }
 0x268   : > { %v2283_v4 = vpop.f32.mrf.mxu0 }
 0x269   : > { %v2343_v40 = vadd.f32 %v2278_v30, %v2121_v24 }
 0x26a   : > { %v1618_v12 = vpop.f32.mrf.mxu1 }
 0x26b   : > { %2375 = vst.msk [vmem:[%s3629_s19 + $0x50] sm:$0xff] %vm341_vm1, %v2343_v40  ;;  %v2417_v16 = vsel %vm341_vm1, %v2343_v40, 0.0  ;;  %v2479_v6 = vmul.f32 %v2343_v40, %v2343_v40  ;;  %2817 = vmatmul.msk.bf16.gmra.mxu0 %vm341_vm1, %v2189_v33  ;;  %v1679_v24 = vadd.f32 %v1618_v12, %v3499_v3 }
 0x26c   : > { %v2418_v17 = vadd.f32 %v2417_v16, %v2416_v18  ;;  %v1836_v49 = vpop.f32.mrf.mxu2 }
 0x26d   : > { %v2520_v46 = vsel %vm341_vm1, %v2479_v6, 0.0  ;;  %v1900_v30 = vadd.f32 %v1836_v49, %v1677_v47  ;;  %v1746_v6 = vpack.c.bf16 %v1730_v34, %v1729_v59  ;;  %v1968_v49 = vpack.c.bf16 %v1952_v28, %v1951_v50 }
 0x26e   : > { %v2521_v53 = vadd.f32 %v2520_v46, %v2519_v36  ;;  %v2058_v45 = vpop.f32.mrf.mxu3 }
 0x26f   : > { %v2122_v38 = vadd.f32 %v2058_v45, %v1900_v30 }
 0x270   : > { %v2285_v10 = vpop.f32.mrf.mxu0 }
 0x271   : > { %v2344_v55 = vadd.f32 %v2280_v29, %v2122_v38  ;;  %2783 = vmatmul.msk.bf16.gmra.mxu2 %vm341_vm1, %v1745_v9 }
 0x272   : > { %v1621_v25 = vpop.f32.mrf.mxu1 }
 0x273   : > { %2376 = vst.msk [vmem:[%s3629_s19 + $0x58] sm:$0xff] %vm341_vm1, %v2344_v55  ;;  %v2419_v26 = vsel %vm341_vm1, %v2344_v55, 0.0  ;;  %v2480_v52 = vmul.f32 %v2344_v55, %v2344_v55  ;;  %2800 = vmatmul.msk.bf16.gmra.mxu3 %vm341_vm1, %v1967_v54  ;;  %v1680_v30 = vadd.f32 %v1621_v25, %v3505_v39 }
 0x274   : > { %v2420_v37 = vadd.f32 %v2419_v26, %v2418_v17  ;;  %v1839_v35 = vpop.f32.mrf.mxu2 }
 0x275   : > { %v2522_v57 = vsel %vm341_vm1, %v2480_v52, 0.0  ;;  %v1901_v29 = vadd.f32 %v1839_v35, %v1678_v20  ;;  %2767 = vmatmul.msk.bf16.gmra.mxu1 %vm341_vm1, %v2189_v33 }
 0x276   : > { %v2523_v48 = vadd.f32 %v2522_v57, %v2521_v53  ;;  %v2061_v18 = vpop.f32.mrf.mxu3 }
 0x277   : > { %v2123_v7 = vadd.f32 %v2061_v18, %v1901_v29 }
 0x278   : > { %v2288_v51 = vpop.f32.mrf.mxu0 }
 0x279   : > { %v2345_v61 = vadd.f32 %v2283_v4, %v2123_v7 }
 0x27a   : > { %v1623_v43 = vpop.f32.mrf.mxu1 }
 0x27b   : > { %2377 = vst.msk [vmem:[%s3629_s19 + $0x60] sm:$0xff] %vm341_vm1, %v2345_v61  ;;  %v2421_v36 = vsel %vm341_vm1, %v2345_v61, 0.0  ;;  %v2481_v31 = vmul.f32 %v2345_v61, %v2345_v61  ;;  %2818 = vmatmul.msk.bf16.gmra.mxu0 %vm341_vm1, %v2190_v62  ;;  %v1681_v25 = vadd.f32 %v1623_v43, %v3512_v27  ;;  %v3891_v62 = vmov 0.0  }
 0x27c   : > { %v2422_v33 = vadd.f32 %v2421_v36, %v2420_v37  ;;  %v1841_v40 = vpop.f32.mrf.mxu2  ;;  %2397 = vst.msk [vmem:[%s3746_s23] sm:$0xff] %vm341_vm1, %v3891_v62 }
 0x27d   : > { %v2524_v16 = vsel %vm341_vm1, %v2481_v31, 0.0  ;;  %v1902_v4 = vadd.f32 %v1841_v40, %v1679_v24 }
 0x27e   : > { %v2525_v15 = vadd.f32 %v2524_v16, %v2523_v48  ;;  %v2063_v47 = vpop.f32.mrf.mxu3 }
 0x27f   : > { %v2124_v17 = vadd.f32 %v2063_v47, %v1902_v4 }
 0x280   : > { %v2290_v11 = vpop.f32.mrf.mxu0 }
 0x281   : > { %v2346_v14 = vadd.f32 %v2285_v10, %v2124_v17  ;;  %2784 = vmatmul.msk.bf16.gmra.mxu2 %vm341_vm1, %v1746_v6 }
 0x282   : > { %v1626_v3 = vpop.f32.mrf.mxu1 }
 0x283   : > { %2378 = vst.msk [vmem:[%s3629_s19 + $0x68] sm:$0xff] %vm341_vm1, %v2346_v14  ;;  %v2423_v12 = vsel %vm341_vm1, %v2346_v14, 0.0  ;;  %v2482_v46 = vmul.f32 %v2346_v14, %v2346_v14  ;;  %2801 = vmatmul.msk.bf16.gmra.mxu3 %vm341_vm1, %v1968_v49  ;;  %v1682_v34 = vadd.f32 %v1626_v3, %v3519_v13 }
 0x284   : > { %v2424_v9 = vadd.f32 %v2423_v12, %v2422_v33  ;;  %v1844_v53 = vpop.f32.mrf.mxu2 }
 0x285   : > { %v2526_v45 = vsel %vm341_vm1, %v2482_v46, 0.0  ;;  %v1903_v38 = vadd.f32 %v1844_v53, %v1680_v30 }
 0x286   : > { %v2527_v54 = vadd.f32 %v2526_v45, %v2525_v15  ;;  %v2066_v10 = vpop.f32.mrf.mxu3 }
 0x287   : > { %v2125_v55 = vadd.f32 %v2066_v10, %v1903_v38 }
 0x288   : > { %v2293_v26 = vpop.f32.mrf.mxu0 }
 0x289   : > { %v2347_v52 = vadd.f32 %v2288_v51, %v2125_v55 }
 0x28a   : > { %v1628_v20 = vpop.f32.mrf.mxu1 }
 0x28b   : > { %2379 = vst.msk [vmem:[%s3629_s19 + $0x70] sm:$0xff] %vm341_vm1, %v2347_v52  ;;  %v2425_v37 = vsel %vm341_vm1, %v2347_v52, 0.0  ;;  %v2483_v39 = vmul.f32 %v2347_v52, %v2347_v52  ;;  %v1683_v47 = vadd.f32 %v1628_v20, %v3526_v32 }
 0x28c   : > { %v2426_v35 = vadd.f32 %v2425_v37, %v2424_v9  ;;  %v1846_v1 = vpop.f32.mrf.mxu2 }
 0x28d   : > { %v2528_v22 = vsel %vm341_vm1, %v2483_v39, 0.0  ;;  %v1904_v57 = vadd.f32 %v1846_v1, %v1681_v25 }
 0x28e   : > { %v2529_v29 = vadd.f32 %v2528_v22, %v2527_v54  ;;  %v2068_v48 = vpop.f32.mrf.mxu3 }
 0x28f   : > { %v2126_v18 = vadd.f32 %v2068_v48, %v1904_v57 }
 0x290   : > { %v2295_v7 = vpop.f32.mrf.mxu0 }
 0x291   : > { %v2348_v27 = vadd.f32 %v2290_v11, %v2126_v18 }
 0x292   : > { %v1631_v51 = vpop.f32.mrf.mxu1 }
 0x293   : > { %2380 = vst.msk [vmem:[%s3629_s19 + $0x78] sm:$0xff] %vm341_vm1, %v2348_v27  ;;  %v2427_v61 = vsel %vm341_vm1, %v2348_v27, 0.0  ;;  %v2484_v59 = vmul.f32 %v2348_v27, %v2348_v27  ;;  %v1684_v38 = vadd.f32 %v1631_v51, %v3533_v63 }
 0x294   : > { %v2428_v43 = vadd.f32 %v2427_v61, %v2426_v35  ;;  %v1849_v36 = vpop.f32.mrf.mxu2 }
 0x295   : > { %v2530_v31 = vsel %vm341_vm1, %v2484_v59, 0.0  ;;  %v1905_v24 = vadd.f32 %v1849_v36, %v1682_v34 }
 0x296   : > { %v2531_v33 = vadd.f32 %v2530_v31, %v2529_v29  ;;  %v2071_v40 = vpop.f32.mrf.mxu3 }
 0x297   : > { %v2127_v50 = vadd.f32 %v2071_v40, %v1905_v24 }
 0x298   : > { %v2298_v28 = vpop.f32.mrf.mxu0 }
 0x299   : > { %v2349_v16 = vadd.f32 %v2293_v26, %v2127_v50 }
 0x29a   : > { %v1633_v4 = vpop.f32.mrf.mxu1 }
 0x29b   : > { %2381 = vst.msk [vmem:[%s3629_s19 + $0x80] sm:$0xff] %vm341_vm1, %v2349_v16  ;;  %v2429_v6 = vsel %vm341_vm1, %v2349_v16, 0.0  ;;  %v2485_v15 = vmul.f32 %v2349_v16, %v2349_v16  ;;  %v1685_v22 = vadd.f32 %v1633_v4, %v3540_v42 }
 0x29c   : > { %v2430_v13 = vadd.f32 %v2429_v6, %v2428_v43  ;;  %v1851_v17 = vpop.f32.mrf.mxu2 }
 0x29d   : > { %v2532_v49 = vsel %vm341_vm1, %v2485_v15, 0.0  ;;  %v1906_v11 = vadd.f32 %v1851_v17, %v1683_v47 }
 0x29e   : > { %v2533_v14 = vadd.f32 %v2532_v49, %v2531_v33  ;;  %v2073_v3 = vpop.f32.mrf.mxu3 }
 0x29f   : > { %v2128_v12 = vadd.f32 %v2073_v3, %v1906_v11 }
 0x2a0   : > { %v2300_v46 = vpop.f32.mrf.mxu0 }
 0x2a1   : > { %v2350_v30 = vadd.f32 %v2295_v7, %v2128_v12 }
 0x2a2   : > { %v1636_v9 = vpop.f32.mrf.mxu1 }
 0x2a3   : > { %2382 = vst.msk [vmem:[%s3629_s19 + $0x88] sm:$0xff] %vm341_vm1, %v2350_v30  ;;  %v2431_v53 = vsel %vm341_vm1, %v2350_v30, 0.0  ;;  %v2486_v45 = vmul.f32 %v2350_v30, %v2350_v30  ;;  %v1686_v43 = vadd.f32 %v1636_v9, %v3546_v23 }
 0x2a4   : > { %v2432_v32 = vadd.f32 %v2431_v53, %v2430_v13  ;;  %v1854_v54 = vpop.f32.mrf.mxu2 }
 0x2a5   : > { %v2534_v10 = vsel %vm341_vm1, %v2486_v45, 0.0  ;;  %v1907_v55 = vadd.f32 %v1854_v54, %v1684_v38 }
 0x2a6   : > { %v2535_v26 = vadd.f32 %v2534_v10, %v2533_v14  ;;  %v2076_v52 = vpop.f32.mrf.mxu3 }
 0x2a7   : > { %v2129_v20 = vadd.f32 %v2076_v52, %v1907_v55 }
 0x2a8   : > { %v2303_v37 = vpop.f32.mrf.mxu0 }
 0x2a9   : > { %v2351_v39 = vadd.f32 %v2298_v28, %v2129_v20 }
 0x2aa   : > { %v1638_v25 = vpop.f32.mrf.mxu1 }
 0x2ab   : > { %2383 = vst.msk [vmem:[%s3629_s19 + $0x90] sm:$0xff] %vm341_vm1, %v2351_v39  ;;  %v2433_v35 = vsel %vm341_vm1, %v2351_v39, 0.0  ;;  %v2487_v1 = vmul.f32 %v2351_v39, %v2351_v39  ;;  %v1687_v47 = vadd.f32 %v1638_v25, %v3553_v56 }
 0x2ac   : > { %v2434_v63 = vadd.f32 %v2433_v35, %v2432_v32  ;;  %v1856_v57 = vpop.f32.mrf.mxu2 }
 0x2ad   : > { %v2536_v29 = vsel %vm341_vm1, %v2487_v1, 0.0  ;;  %v1908_v48 = vadd.f32 %v1856_v57, %v1685_v22 }
 0x2ae   : > { %v2537_v18 = vadd.f32 %v2536_v29, %v2535_v26  ;;  %v2078_v7 = vpop.f32.mrf.mxu3 }
 0x2af   : > { %v2130_v62 = vadd.f32 %v2078_v7, %v1908_v48 }
 0x2b0   : > { %v2305_v27 = vpop.f32.mrf.mxu0 }
 0x2b1   : > { %v2352_v51 = vadd.f32 %v2300_v46, %v2130_v62 }
 0x2b2   : > { %v1641_v61 = vpop.f32.mrf.mxu1 }
 0x2b3   : > { %2384 = vst.msk [vmem:[%s3629_s19 + $0x98] sm:$0xff] %vm341_vm1, %v2352_v51  ;;  %v2435_v59 = vsel %vm341_vm1, %v2352_v51, 0.0  ;;  %v2488_v34 = vmul.f32 %v2352_v51, %v2352_v51  ;;  %v1688_v45 = vadd.f32 %v1641_v61, %v3559_v41 }
 0x2b4   : > { %v2436_v42 = vadd.f32 %v2435_v59, %v2434_v63  ;;  %v1859_v36 = vpop.f32.mrf.mxu2 }
 0x2b5   : > { %v2538_v31 = vsel %vm341_vm1, %v2488_v34, 0.0  ;;  %v1909_v24 = vadd.f32 %v1859_v36, %v1686_v43 }
 0x2b6   : > { %v2539_v33 = vadd.f32 %v2538_v31, %v2537_v18  ;;  %v2081_v40 = vpop.f32.mrf.mxu3 }
 0x2b7   : > { %v2131_v50 = vadd.f32 %v2081_v40, %v1909_v24 }
 0x2b8   : > { %v2308_v28 = vpop.f32.mrf.mxu0 }
 0x2b9   : > { %v2353_v16 = vadd.f32 %v2303_v37, %v2131_v50 }
 0x2ba   : > { %v1643_v4 = vpop.f32.mrf.mxu1 }
 0x2bb   : > { %2385 = vst.msk [vmem:[%s3629_s19 + $0xa0] sm:$0xff] %vm341_vm1, %v2353_v16  ;;  %v2437_v6 = vsel %vm341_vm1, %v2353_v16, 0.0  ;;  %v2489_v15 = vmul.f32 %v2353_v16, %v2353_v16  ;;  %v1689_v25 = vadd.f32 %v1643_v4, %v3566_v8 }
 0x2bc   : > { %v2438_v23 = vadd.f32 %v2437_v6, %v2436_v42  ;;  %v1861_v13 = vpop.f32.mrf.mxu2 }
 0x2bd   : > { %v2540_v17 = vsel %vm341_vm1, %v2489_v15, 0.0  ;;  %v1910_v49 = vadd.f32 %v1861_v13, %v1687_v47 }
 0x2be   : > { %v2541_v11 = vadd.f32 %v2540_v17, %v2539_v33  ;;  %v2083_v14 = vpop.f32.mrf.mxu3 }
 0x2bf   : > { %v2132_v3 = vadd.f32 %v2083_v14, %v1910_v49 }
 0x2c0   : > { %v2310_v12 = vpop.f32.mrf.mxu0 }
 0x2c1   : > { %v2354_v46 = vadd.f32 %v2305_v27, %v2132_v3 }
 0x2c2   : > { %v1646_v30 = vpop.f32.mrf.mxu1 }
 0x2c3   : > { %2386 = vst.msk [vmem:[%s3629_s19 + $0xa8] sm:$0xff] %vm341_vm1, %v2354_v46  ;;  %v2439_v9 = vsel %vm341_vm1, %v2354_v46, 0.0  ;;  %v2490_v53 = vmul.f32 %v2354_v46, %v2354_v46  ;;  %v1690_v27 = vadd.f32 %v1646_v30, %v3572_v60 }
 0x2c4   : > { %v2440_v56 = vadd.f32 %v2439_v9, %v2438_v23  ;;  %v1864_v38 = vpop.f32.mrf.mxu2 }
 0x2c5   : > { %v2542_v32 = vsel %vm341_vm1, %v2490_v53, 0.0  ;;  %v1911_v54 = vadd.f32 %v1864_v38, %v1688_v45 }
 0x2c6   : > { %v2543_v10 = vadd.f32 %v2542_v32, %v2541_v11  ;;  %v2086_v55 = vpop.f32.mrf.mxu3 }
 0x2c7   : > { %v2133_v26 = vadd.f32 %v2086_v55, %v1911_v54 }
 0x2c8   : > { %v2313_v20 = vpop.f32.mrf.mxu0 }
 0x2c9   : > { %v2355_v52 = vadd.f32 %v2308_v28, %v2133_v26 }
 0x2ca   : > { %v1648_v1 = vpop.f32.mrf.mxu1 }
 0x2cb   : > { %2387 = vst.msk [vmem:[%s3629_s19 + $0xb0] sm:$0xff] %vm341_vm1, %v2355_v52  ;;  %v2441_v37 = vsel %vm341_vm1, %v2355_v52, 0.0  ;;  %v2491_v39 = vmul.f32 %v2355_v52, %v2355_v52  ;;  %v1691_v50 = vadd.f32 %v1648_v1, %v3579_v5 }
 0x2cc   : > { %v2442_v35 = vadd.f32 %v2441_v37, %v2440_v56  ;;  %v1866_v41 = vpop.f32.mrf.mxu2 }
 0x2cd   : > { %v2544_v22 = vsel %vm341_vm1, %v2491_v39, 0.0  ;;  %v1912_v63 = vadd.f32 %v1866_v41, %v1689_v25 }
 0x2ce   : > { %v2545_v57 = vadd.f32 %v2544_v22, %v2543_v10  ;;  %v2088_v29 = vpop.f32.mrf.mxu3 }
 0x2cf   : > { %v2134_v48 = vadd.f32 %v2088_v29, %v1912_v63 }
 0x2d0   : > { %v2315_v61 = vpop.f32.mrf.mxu0 }
 0x2d1   : > { %v2356_v18 = vadd.f32 %v2310_v12, %v2134_v48 }
 0x2d2   : > { %v1651_v36 = vpop.f32.mrf.mxu1 }
 0x2d3   : > { %2388 = vst.msk [vmem:[%s3629_s19 + $0xb8] sm:$0xff] %vm341_vm1, %v2356_v18  ;;  %v2443_v7 = vsel %vm341_vm1, %v2356_v18, 0.0  ;;  %v2492_v62 = vmul.f32 %v2356_v18, %v2356_v18  ;;  %v1692_v14 = vadd.f32 %v1651_v36, %v3585_v58 }
 0x2d4   : > { %v2444_v51 = vadd.f32 %v2443_v7, %v2442_v35  ;;  %v1869_v8 = vpop.f32.mrf.mxu2 }
 0x2d5   : > { %v2546_v59 = vsel %vm341_vm1, %v2492_v62, 0.0  ;;  %v1913_v34 = vadd.f32 %v1869_v8, %v1690_v27 }
 0x2d6   : > { %v2547_v43 = vadd.f32 %v2546_v59, %v2545_v57  ;;  %v2091_v42 = vpop.f32.mrf.mxu3 }
 0x2d7   : > { %v2135_v31 = vadd.f32 %v2091_v42, %v1913_v34 }
 0x2d8   : > { %v2318_v47 = vpop.f32.mrf.mxu0 }
 0x2d9   : > { %v2357_v24 = vadd.f32 %v2313_v20, %v2135_v31 }
 0x2da   : > { %v1653_v13 = vpop.f32.mrf.mxu1 }
 0x2db   : > { %2389 = vst.msk [vmem:[%s3629_s19 + $0xc0] sm:$0xff] %vm341_vm1, %v2357_v24  ;;  %v2445_v33 = vsel %vm341_vm1, %v2357_v24, 0.0  ;;  %v2493_v40 = vmul.f32 %v2357_v24, %v2357_v24  ;;  %v1693_v10 = vadd.f32 %v1653_v13, %v3592_v0 }
 0x2dc   : > { %v2446_v60 = vadd.f32 %v2445_v33, %v2444_v51  ;;  %v1871_v28 = vpop.f32.mrf.mxu2 }
 0x2dd   : > { %v2548_v16 = vsel %vm341_vm1, %v2493_v40, 0.0  ;;  %v1914_v4 = vadd.f32 %v1871_v28, %v1691_v50 }
 0x2de   : > { %v2549_v6 = vadd.f32 %v2548_v16, %v2547_v43  ;;  %v2093_v15 = vpop.f32.mrf.mxu3 }
 0x2df   : > { %v2136_v23 = vadd.f32 %v2093_v15, %v1914_v4 }
 0x2e0   : > { %v2320_v45 = vpop.f32.mrf.mxu0 }
 0x2e1   : > { %v2358_v17 = vadd.f32 %v2315_v61, %v2136_v23 }
 0x2e2   : > { %v1656_v38 = vpop.f32.mrf.mxu1 }
 0x2e3   : > { %2390 = vst.msk [vmem:[%s3629_s19 + $0xc8] sm:$0xff] %vm341_vm1, %v2358_v17  ;;  %v2447_v49 = vsel %vm341_vm1, %v2358_v17, 0.0  ;;  %v2494_v11 = vmul.f32 %v2358_v17, %v2358_v17  ;;  %v1694_v22 = vadd.f32 %v1656_v38, %v3598_v19 }
 0x2e4   : > { %v2448_v5 = vadd.f32 %v2447_v49, %v2446_v60  ;;  %v1874_v3 = vpop.f32.mrf.mxu2 }
 0x2e5   : > { %v2550_v12 = vsel %vm341_vm1, %v2494_v11, 0.0  ;;  %v1915_v46 = vadd.f32 %v1874_v3, %v1692_v14 }
 0x2e6   : > { %v2551_v30 = vadd.f32 %v2550_v12, %v2549_v6  ;;  %v2096_v9 = vpop.f32.mrf.mxu3 }
 0x2e7   : > { %v2137_v53 = vadd.f32 %v2096_v9, %v1915_v46 }
 0x2e8   : > { %v2323_v35 = vpop.f32.mrf.mxu0 }
 0x2e9   : > { %v2359_v56 = vadd.f32 %v2318_v47, %v2137_v53 }
 0x2ea   : > { %v1658_v57 = vpop.f32.mrf.mxu1 }
 0x2eb   : > { %2391 = vst.msk [vmem:[%s3629_s19 + $0xd0] sm:$0xff] %vm341_vm1, %v2359_v56  ;;  %v2449_v32 = vsel %vm341_vm1, %v2359_v56, 0.0  ;;  %v2495_v54 = vmul.f32 %v2359_v56, %v2359_v56  ;;  %v1695_v61 = vadd.f32 %v1658_v57, %v3605_v2 }
 0x2ec   : > { %v2450_v58 = vadd.f32 %v2449_v32, %v2448_v5  ;;  %v1876_v55 = vpop.f32.mrf.mxu2 }
 0x2ed   : > { %v2552_v26 = vsel %vm341_vm1, %v2495_v54, 0.0  ;;  %v1916_v52 = vadd.f32 %v1876_v55, %v1693_v10 }
 0x2ee   : > { %v2553_v20 = vadd.f32 %v2552_v26, %v2551_v30  ;;  %v2098_v37 = vpop.f32.mrf.mxu3 }
 0x2ef   : > { %v2138_v39 = vadd.f32 %v2098_v37, %v1916_v52 }
 0x2f0   : > { %v2325_v19 = vpop.f32.mrf.mxu0 }
 0x2f1   : > { %v2360_v25 = vadd.f32 %v2320_v45, %v2138_v39 }
 0x2f2   : > { %v1661_v24 = vpop.f32.mrf.mxu1 }
 0x2f3   : > { %2392 = vst.msk [vmem:[%s3629_s19 + $0xd8] sm:$0xff] %vm341_vm1, %v2360_v25  ;;  %v2451_v41 = vsel %vm341_vm1, %v2360_v25, 0.0  ;;  %v2496_v1 = vmul.f32 %v2360_v25, %v2360_v25  ;;  %v1696_v28 = vadd.f32 %v1661_v24, %v3611_v21 }
 0x2f4   : > { %v2452_v63 = vadd.f32 %v2451_v41, %v2450_v58  ;;  %v1879_v0 = vpop.f32.mrf.mxu2 }
 0x2f5   : > { %v2554_v29 = vsel %vm341_vm1, %v2496_v1, 0.0  ;;  %v1917_v48 = vadd.f32 %v1879_v0, %v1694_v22 }
 0x2f6   : > { %v2555_v18 = vadd.f32 %v2554_v29, %v2553_v20  ;;  %v2101_v7 = vpop.f32.mrf.mxu3 }
 0x2f7   : > { %v2139_v62 = vadd.f32 %v2101_v7, %v1917_v48 }
 0x2f8   : > { %v2328_v47 = vpop.f32.mrf.mxu0 }
 0x2f9   : > { %v2361_v27 = vadd.f32 %v2323_v35, %v2139_v62 }
 0x2fa   : > { %v1663_v17 = vpop.f32.mrf.mxu1 }
 0x2fb   : > { %2393 = vst.msk [vmem:[%s3629_s19 + $0xe0] sm:$0xff] %vm341_vm1, %v2361_v27  ;;  %v2453_v51 = vsel %vm341_vm1, %v2361_v27, 0.0  ;;  %v2497_v8 = vmul.f32 %v2361_v27, %v2361_v27  ;;  %v1697_v5 = vadd.f32 %v1663_v17, %v3618_v44 }
 0x2fc   : > { %v2454_v59 = vadd.f32 %v2453_v51, %v2452_v63  ;;  %v1881_v34 = vpop.f32.mrf.mxu2 }
 0x2fd   : > { %v2556_v43 = vsel %vm341_vm1, %v2497_v8, 0.0  ;;  %v1918_v42 = vadd.f32 %v1881_v34, %v1695_v61 }
 0x2fe   : > { %v2557_v36 = vadd.f32 %v2556_v43, %v2555_v18  ;;  %v2103_v31 = vpop.f32.mrf.mxu3 }
 0x2ff   : > { %v2140_v33 = vadd.f32 %v2103_v31, %v1918_v42 }
 0x300   : > { %v2330_v45 = vpop.f32.mrf.mxu0 }
 0x301   : > { %v2362_v40 = vadd.f32 %v2325_v19, %v2140_v33 }
 0x303   : > { %2394 = vst.msk [vmem:[%s3629_s19 + $0xe8] sm:$0xff] %vm341_vm1, %v2362_v40  ;;  %v2455_v50 = vsel %vm341_vm1, %v2362_v40, 0.0  ;;  %v2498_v60 = vmul.f32 %v2362_v40, %v2362_v40 }
 0x304   : > { %v2456_v2 = vadd.f32 %v2455_v50, %v2454_v59  ;;  %v1884_v16 = vpop.f32.mrf.mxu2 }
 0x305   : > { %v2558_v4 = vsel %vm341_vm1, %v2498_v60, 0.0  ;;  %v1919_v6 = vadd.f32 %v1884_v16, %v1696_v28 }
 0x306   : > { %v2559_v15 = vadd.f32 %v2558_v4, %v2557_v36  ;;  %v2106_v23 = vpop.f32.mrf.mxu3 }
 0x307   : > { %v2141_v13 = vadd.f32 %v2106_v23, %v1919_v6 }
 0x309   : > { %v2363_v49 = vadd.f32 %v2328_v47, %v2141_v13 }
 0x30b   : > { %2395 = vst.msk [vmem:[%s3629_s19 + $0xf0] sm:$0xff] %vm341_vm1, %v2363_v49  ;;  %v2457_v11 = vsel %vm341_vm1, %v2363_v49, 0.0  ;;  %v2499_v14 = vmul.f32 %v2363_v49, %v2363_v49 }
 0x30c   : > { %v2458_v21 = vadd.f32 %v2457_v11, %v2456_v2  ;;  %v1886_v3 = vpop.f32.mrf.mxu2 }
 0x30d   : > { %v2560_v12 = vsel %vm341_vm1, %v2499_v14, 0.0  ;;  %v1920_v46 = vadd.f32 %v1886_v3, %v1697_v5 }
 0x30e   : > { %v2561_v30 = vadd.f32 %v2560_v12, %v2559_v15  ;;  %v2108_v9 = vpop.f32.mrf.mxu3 }
 0x30f   : > { %v2142_v53 = vadd.f32 %v2108_v9, %v1920_v46 }
 0x311   : > { %v2364_v56 = vadd.f32 %v2330_v45, %v2142_v53 }
 0x313   : > { %2396 = vst.msk [vmem:[%s3629_s19 + $0xf8] sm:$0xff] %vm341_vm1, %v2364_v56  ;;  %v2459_v38 = vsel %vm341_vm1, %v2364_v56, 0.0  ;;  %v2500_v32 = vmul.f32 %v2364_v56, %v2364_v56 }
 0x314   : > { %v2460_v54 = vadd.f32 %v2459_v38, %v2458_v21 }
 0x315   : > { %v2562_v10 = vsel %vm341_vm1, %v2500_v32, 0.0 }
 0x316   : > { %v2461_v44 = vrot.slane %v2460_v54, 4  ;;  %v2563_v58 = vadd.f32 %v2562_v10, %v2561_v30 }
 0x318   : > { %v2462_v55 = vadd.f32 %v2461_v44, %v2460_v54  ;;  %v2564_v26 = vrot.slane %v2563_v58, 4 }
 0x31a   : > { %v2463_v52 = vrot.slane %v2462_v55, 2  ;;  %v2565_v20 = vadd.f32 %v2564_v26, %v2563_v58 }
 0x31c   : > { %v2464_v37 = vadd.f32 %v2463_v52, %v2462_v55  ;;  %v2566_v39 = vrot.slane %v2565_v20, 2 }
 0x31e   : > { %v2465_v25 = vrot.slane %v2464_v37, 1  ;;  %v2567_v35 = vadd.f32 %v2566_v39, %v2565_v20 }
 0x320   : > { %v2466_v41 = vadd.f32 %v2465_v25, %v2464_v37  ;;  %v2568_v1 = vrot.slane %v2567_v35, 1 }
 0x322   : > { %2468 = vst.msk [vmem:[%s3746_s23] sm:$0x1] %vm2467_vm3, %v2466_v41  ;;  %v2569_v22 = vadd.f32 %v2568_v1, %v2567_v35 }
 0x324   : > { %2570 = vst.msk [vmem:[%s3746_s23 + $0x1] sm:$0x1] %vm2467_vm3, %v2569_v22 }
 0x325 PF: > { %s15_s15 = sadd.s32 1, %s2841_s15  }
 0x326   : > { %p12_p4 = scmp.ge.s32.totalorder %s15_s15, 4  }
 0x328   :  { %14 = sbr.rel (!%p12_p4) target bundleno = 1 (0x1), region = 84 }

</bundles_post_ra>
